<compile_context>
chip_gen: v6e
topology: v6e:2x2x1
jax: 0.10.0
libtpu: 0.0.40
codegen_flags: <defaults>
</compile_context>

<pallas_src>
import functools

import jax
import jax.numpy as jnp
from jax.experimental import pallas as pl
from jax.experimental.pallas import tpu as pltpu

LN_EPS = 1e-5        # nn.LayerNorm default
IN_EPS = 1e-5        # nn.InstanceNorm2d default (affine=False, no running stats)


def _elu(x):
    # ELU with alpha=1 (PyTorch default).  exp(x)-1 instead of expm1: expm1 has
    # no guaranteed Mosaic lowering; the accuracy delta is far below test tol.
    return jnp.where(x > 0, x, jnp.exp(x) - 1.0)


def _tile_conv(pair_tile, a_tile, b_full, wp):
    """y[i, j, c] = a[i, c] + b[j, c] + sum_p pair[i, j, p] * wp[p, c]."""
    ti, L, P = pair_tile.shape
    cout = wp.shape[1]
    cp = jnp.dot(pair_tile.reshape(ti * L, P), wp,
                 preferred_element_type=jnp.float32)          # (TI*L, Cout)
    return (cp.reshape(ti, L, cout)
            + a_tile[:, None, :]                              # rows of this tile
            + b_full[None, :, :])                             # all columns


# ---------------------------------------------------------------------------
# Pass 1: per-batch prologue (emb + fused a/b projection) and streaming
#         per-channel sum / sum-of-squares for InstanceNorm.
# ---------------------------------------------------------------------------
def _stats_kernel(msa_ref, pair_ref, w1_ref, lnw_ref, lnb_ref, wab_ref, wp_ref,
                  a_out, b_out, stats_out, sum_ref, sq_ref, *, cout, inv_n):
    i = pl.program_id(1)
    ni = pl.num_programs(1)
    ti = pair_ref.shape[1]

    @pl.when(i == 0)
    def _prologue():
        # emb_fc_2D: Linear(no bias) -> LayerNorm -> ELU, once per batch.
        xq = msa_ref[0, 0]                                    # (L, Cin)
        emb = jnp.dot(xq, w1_ref[...], preferred_element_type=jnp.float32)
        mu = jnp.mean(emb, axis=-1, keepdims=True)
        var = jnp.mean(jnp.square(emb - mu), axis=-1, keepdims=True)
        emb = (emb - mu) * jax.lax.rsqrt(var + LN_EPS)
        emb = emb * lnw_ref[...] + lnb_ref[...]
        emb = _elu(emb)                                       # (L, E)
        # Fused 1x1-conv projections for the two emb copies: (L, 2*Cout).
        ab = jnp.dot(emb, wab_ref[...], preferred_element_type=jnp.float32)
        a_out[0] = ab[:, :cout]
        b_out[0] = ab[:, cout:]
        sum_ref[...] = jnp.zeros_like(sum_ref)
        sq_ref[...] = jnp.zeros_like(sq_ref)

    start = i * ti
    if ti % 8 == 0:
        start = pl.multiple_of(start, 8)
    a_tile = a_out[0, pl.ds(start, ti), :]                    # (TI, Cout)
    b_full = b_out[0]                                         # (L, Cout)

    y = _tile_conv(pair_ref[0], a_tile, b_full, wp_ref[...])  # (TI, L, Cout)
    yf = y.reshape(-1, cout)
    sum_ref[...] += jnp.sum(yf, axis=0, keepdims=True)
    sq_ref[...] += jnp.sum(yf * yf, axis=0, keepdims=True)

    @pl.when(i == ni - 1)
    def _finalize():
        mean = sum_ref[...] * inv_n                           # (1, Cout)
        var = sq_ref[...] * inv_n - mean * mean               # biased variance
        rstd = jax.lax.rsqrt(var + IN_EPS)
        stats_out[0, 0:1, :] = mean
        stats_out[0, 1:2, :] = rstd


# ---------------------------------------------------------------------------
# Pass 2: recompute y per row tile, InstanceNorm + ELU, lane-dense NCHW store.
# ---------------------------------------------------------------------------
def _norm_store_kernel(pair_ref, a_ref, b_ref, stats_ref, wp_ref, out_ref):
    pair = pair_ref[0]                                        # (TI, L, P)
    ti, L, _ = pair.shape
    cout = wp_ref.shape[1]

    y = _tile_conv(pair, a_ref[0], b_ref[0], wp_ref[...])     # (TI, L, Cout)
    s = stats_ref[0]                                          # (2, Cout)
    z = (y - s[0:1, :]) * s[1:2, :]
    z = _elu(z)
    # Single in-kernel relayout: channels-last -> channels-first so the HBM
    # store is lane-dense ((Cout, TI*L), TI*L a multiple of 128).
    out_ref[0] = jnp.transpose(z.reshape(ti * L, cout)).astype(out_ref.dtype)


# ---------------------------------------------------------------------------
# Tiling / wrapper.
# ---------------------------------------------------------------------------
def _pick_row_tile(L, Cout, budget_bytes=12 * 1024 * 1024):
    """Largest row tile whose estimated per-step VMEM fits the budget.

    The pair tile (TI, L, P) is lane-padded (P -> 128) in VMEM, as are the
    channels-last intermediates, so the estimate uses 128-wide planes.  The
    conservative budget keeps the kernel comfortably inside the default scoped
    VMEM on v5e (16 MiB) and leaves plenty of headroom on v7x's 64 MiB chip.
    """
    def est(ti):
        plane = ti * L * 128 * 4                  # lane-padded f32 plane
        return 4 * plane + 2 * Cout * ti * L * 4 + 2 * L * 128 * 4

    cands = [t for t in range(8, L + 1, 8)
             if L % t == 0 and (t * L) % 128 == 0]
    if not cands:
        return L                                   # fallback: whole plane/step
    fits = [t for t in cands if est(t) <= budget_bytes]
    return max(fits) if fits else min(cands)


def msa_output_module(msa_feat, pair_feat, w1, ln_w, ln_b, wc, *, row_tile=None):
    """msa_feat: (B, S, L, Cin), pair_feat: (B, L, L, P).  Returns (B, Cout, L, L)."""
    B, _, L, Cin = msa_feat.shape
    P = pair_feat.shape[-1]
    E = ln_w.shape[0]
    Cout = wc.shape[1]
    assert wc.shape[0] == 2 * E + P

    # Parameter prep (tiny, done once by XLA).
    wab = jnp.concatenate([wc[:E, :], wc[E:2 * E, :]], axis=1)   # (E, 2*Cout)
    wp = wc[2 * E:, :]                                           # (P, Cout)
    lnw2 = ln_w.reshape(1, E)
    lnb2 = ln_b.reshape(1, E)

    TI = row_tile if row_tile is not None else _pick_row_tile(L, Cout)
    assert L % TI == 0, (L, TI)
    assert TI == L or (TI % 8 == 0 and (TI * L) % 128 == 0), (L, TI)
    NI = L // TI

    # ---- pass 1: stats + staged a/b projections --------------------------
    kernel1 = functools.partial(_stats_kernel, cout=Cout, inv_n=1.0 / (L * L))
    a_proj, b_proj, stats = pl.pallas_call(
        kernel1,
        out_shape=(jax.ShapeDtypeStruct((B, L, Cout), jnp.float32),
                   jax.ShapeDtypeStruct((B, L, Cout), jnp.float32),
                   jax.ShapeDtypeStruct((B, 2, Cout), jnp.float32)),
        grid_spec=pltpu.PrefetchScalarGridSpec(
            num_scalar_prefetch=0,
            grid=(B, NI),
            in_specs=[
                pl.BlockSpec((1, 1, L, Cin), lambda b, i: (b, 0, 0, 0)),  # MSA row 0
                pl.BlockSpec((1, TI, L, P), lambda b, i: (b, i, 0, 0)),   # pair rows
                pl.BlockSpec((Cin, E), lambda b, i: (0, 0)),              # W1
                pl.BlockSpec((1, E), lambda b, i: (0, 0)),                # LN weight
                pl.BlockSpec((1, E), lambda b, i: (0, 0)),                # LN bias
                pl.BlockSpec((E, 2 * Cout), lambda b, i: (0, 0)),         # [Wa|Wb]
                pl.BlockSpec((P, Cout), lambda b, i: (0, 0)),             # Wp
            ],
            out_specs=[
                pl.BlockSpec((1, L, Cout), lambda b, i: (b, 0, 0)),       # a_proj
                pl.BlockSpec((1, L, Cout), lambda b, i: (b, 0, 0)),       # b_proj
                pl.BlockSpec((1, 2, Cout), lambda b, i: (b, 0, 0)),       # mean/rstd
            ],
            scratch_shapes=[pltpu.VMEM((1, Cout), jnp.float32),
                            pltpu.VMEM((1, Cout), jnp.float32)],
        ),
        compiler_params=pltpu.CompilerParams(
            dimension_semantics=("parallel", "arbitrary"),
            vmem_limit_bytes=32 * 1024 * 1024),
        cost_estimate=pl.CostEstimate(
            flops=int(2 * B * L * (Cin * E + E * 2 * Cout + L * P * Cout)
                      + 4 * B * L * L * Cout),
            transcendentals=int(B * L * (E + 1)),
            bytes_accessed=int(4 * (B * L * Cin + B * L * L * P
                                    + 2 * B * L * Cout + 2 * B * Cout
                                    + Cin * E + 2 * E + E * 2 * Cout + P * Cout))),
    )(msa_feat, pair_feat, w1, lnw2, lnb2, wab, wp)

    # ---- pass 2: normalize + ELU + lane-dense channels-first store --------
    out_flat = pl.pallas_call(
        _norm_store_kernel,
        out_shape=jax.ShapeDtypeStruct((B, Cout, L * L), jnp.float32),
        grid_spec=pltpu.PrefetchScalarGridSpec(
            num_scalar_prefetch=0,
            grid=(B, NI),
            in_specs=[
                pl.BlockSpec((1, TI, L, P), lambda b, i: (b, i, 0, 0)),   # pair rows
                pl.BlockSpec((1, TI, Cout), lambda b, i: (b, i, 0)),      # a rows
                pl.BlockSpec((1, L, Cout), lambda b, i: (b, 0, 0)),       # b (all cols)
                pl.BlockSpec((1, 2, Cout), lambda b, i: (b, 0, 0)),       # stats
                pl.BlockSpec((P, Cout), lambda b, i: (0, 0)),             # Wp
            ],
            out_specs=pl.BlockSpec((1, Cout, TI * L), lambda b, i: (b, 0, i)),
        ),
        compiler_params=pltpu.CompilerParams(
            dimension_semantics=("parallel", "parallel"),
            vmem_limit_bytes=32 * 1024 * 1024),
        cost_estimate=pl.CostEstimate(
            flops=int(2 * B * L * L * P * Cout + 6 * B * L * L * Cout),
            transcendentals=int(B * L * L * Cout),
            bytes_accessed=int(4 * (B * L * L * (P + Cout)
                                    + B * L * Cout * (NI + 1)
                                    + 2 * B * Cout * NI + P * Cout))),
    )(pair_feat, a_proj, b_proj, stats, wp)

    # Free metadata reshape to the module's NCHW output convention.
    return out_flat.reshape(B, Cout, L, L)


# ---------------------------------------------------------------------------
# Pure-JAX reference mirroring the PyTorch module.
# ---------------------------------------------------------------------------
def reference_forward(msa_feat, pair_feat, w1, ln_w, ln_b, wc):
    xq = msa_feat[:, 0, :, :]
    emb = xq @ w1
    mu = emb.mean(-1, keepdims=True)
    var = ((emb - mu) ** 2).mean(-1, keepdims=True)
    emb = (emb - mu) / jnp.sqrt(var + LN_EPS) * ln_w + ln_b
    emb = jnp.where(emb > 0, emb, jnp.exp(emb) - 1.0)
    B, L, E = emb.shape
    feat = jnp.concatenate(
        [jnp.broadcast_to(emb[:, :, None, :], (B, L, L, E)),
         jnp.broadcast_to(emb[:, None, :, :], (B, L, L, E)),
         pair_feat], axis=-1)
    y = jnp.einsum('bijc,co->bijo', feat, wc)
    m = y.mean(axis=(1, 2), keepdims=True)
    v = ((y - m) ** 2).mean(axis=(1, 2), keepdims=True)
    z = (y - m) / jnp.sqrt(v + IN_EPS)
    z = jnp.where(z > 0, z, jnp.exp(z) - 1.0)
    return jnp.transpose(z, (0, 3, 1, 2))


if __name__ == "__main__":
    # Small shapes consistent with the module's forward.
    B, S, L = 2, 3, 32          # batch, seq_num, seq_len
    n_input = 32                # Cin
    n_inner_emb = 16            # E
    n_pair_feat = 8             # P
    n_output_2D = 24            # Cout (2E + P = 40 != 24, so proj layer exists)

    key = jax.random.PRNGKey(0)
    k1, k2, k3, k4, k5, k6 = jax.random.split(key, 6)

    msa_feat = jax.random.normal(k1, (B, S, L, n_input), dtype=jnp.float32)
    pair_feat = jax.random.normal(k2, (B, L, L, n_pair_feat), dtype=jnp.float32)

    # PyTorch-shaped params, laid out for matmul: Linear weight (E, Cin) -> (Cin, E);
    # 1x1 conv weight (Cout, 2E+P, 1, 1) -> (2E+P, Cout).
    w1 = (jax.random.normal(k3, (n_input, n_inner_emb), jnp.float32)
          * (1.0 / jnp.sqrt(n_input)))
    ln_w = 1.0 + 0.1 * jax.random.normal(k5, (n_inner_emb,), jnp.float32)
    ln_b = 0.1 * jax.random.normal(k6, (n_inner_emb,), jnp.float32)
    n_inner_2D = 2 * n_inner_emb + n_pair_feat
    wc = (jax.random.normal(k4, (n_inner_2D, n_output_2D), jnp.float32)
          * (1.0 / jnp.sqrt(n_inner_2D)))

    ref = reference_forward(msa_feat, pair_feat, w1, ln_w, ln_b, wc)

    # Auto-picked row tile (single tile at this tiny L).
    out_a = jax.block_until_ready(
        msa_output_module(msa_feat, pair_feat, w1, ln_w, ln_b, wc))
    # Forced multi-tile path (4 row tiles) to exercise the streaming two-pass
    # InstanceNorm accumulation across grid steps.
    out_b = jax.block_until_ready(
        msa_output_module(msa_feat, pair_feat, w1, ln_w, ln_b, wc, row_tile=8))

    assert out_a.shape == (B, n_output_2D, L, L), out_a.shape
    err_a = float(jnp.max(jnp.abs(out_a - ref)))
    err_b = float(jnp.max(jnp.abs(out_b - ref)))
    assert err_a < 1e-4, err_a
    assert err_b < 1e-4, err_b

    print("KERNEL_OK")
</pallas_src>

<mosaic_0001>
module attributes {stable_mosaic.version = 11 : i64} {
  func.func @_stats_kernel(%arg0: i32, %arg1: i32, %arg2: memref<1x1x32x32xf32, #tpu.memory_space<vmem>>, %arg3: memref<1x32x32x8xf32, #tpu.memory_space<vmem>>, %arg4: memref<32x16xf32, #tpu.memory_space<vmem>>, %arg5: memref<1x16xf32, #tpu.memory_space<vmem>>, %arg6: memref<1x16xf32, #tpu.memory_space<vmem>>, %arg7: memref<16x48xf32, #tpu.memory_space<vmem>>, %arg8: memref<8x24xf32, #tpu.memory_space<vmem>>, %arg9: memref<1x32x24xf32, #tpu.memory_space<vmem>>, %arg10: memref<1x32x24xf32, #tpu.memory_space<vmem>>, %arg11: memref<1x2x24xf32, #tpu.memory_space<vmem>>, %arg12: memref<1x24xf32, #tpu.memory_space<vmem>>, %arg13: memref<1x24xf32, #tpu.memory_space<vmem>>) attributes {dimension_semantics = [#tpu.dimension_semantics<parallel>, #tpu.dimension_semantics<arbitrary>], iteration_bounds = array<i64: 2, 1>, scalar_prefetch = 0 : i64, scratch_operands = 2 : i64, tpu.core_type = #tpu.core_type<tc>, window_params = [{transform_indices = @transform_0, window_bounds = array<i64: 1, 1, 32, 32>}, {transform_indices = @transform_1, window_bounds = array<i64: 1, 32, 32, 8>}, {pipeline_mode = #tpu.pipeline_mode<synchronous>, transform_indices = @transform_2, window_bounds = array<i64: 32, 16>}, {pipeline_mode = #tpu.pipeline_mode<synchronous>, transform_indices = @transform_3, window_bounds = array<i64: 1, 16>}, {pipeline_mode = #tpu.pipeline_mode<synchronous>, transform_indices = @transform_4, window_bounds = array<i64: 1, 16>}, {pipeline_mode = #tpu.pipeline_mode<synchronous>, transform_indices = @transform_5, window_bounds = array<i64: 16, 48>}, {pipeline_mode = #tpu.pipeline_mode<synchronous>, transform_indices = @transform_6, window_bounds = array<i64: 8, 24>}, {transform_indices = @transform_7, window_bounds = array<i64: 1, 32, 24>}, {transform_indices = @transform_8, window_bounds = array<i64: 1, 32, 24>}, {transform_indices = @transform_9, window_bounds = array<i64: 1, 2, 24>}]} {
    %c0_i32 = arith.constant 0 : i32
    %0 = arith.cmpi eq, %arg1, %c0_i32 : i32
    %1 = arith.extui %0 : i1 to i32
    %c0_i32_0 = arith.constant 0 : i32
    %2 = arith.cmpi ne, %1, %c0_i32_0 : i32
    scf.if %2 {
      %c0_23 = arith.constant 0 : index
      %c0_24 = arith.constant 0 : index
      %c0_25 = arith.constant 0 : index
      %c0_26 = arith.constant 0 : index
      %37 = vector.load %arg2[%c0_23, %c0_24, %c0_25, %c0_26] : memref<1x1x32x32xf32, #tpu.memory_space<vmem>>, vector<1x1x32x32xf32>
      %38 = vector.shape_cast %37 : vector<1x1x32x32xf32> to vector<32x32xf32>
      %c0_27 = arith.constant 0 : index
      %c0_28 = arith.constant 0 : index
      %39 = vector.load %arg4[%c0_27, %c0_28] : memref<32x16xf32, #tpu.memory_space<vmem>>, vector<32x16xf32>
      %cst_29 = arith.constant dense<0.000000e+00> : vector<32x16xf32>
      %40 = tpu.matmul %38, %39, %cst_29 {dimension_numbers = #tpu.dot_dimension_numbers<[1], [0], [0], [1], [0, 0, 1, 1], [], []>} : vector<32x32xf32>, vector<32x16xf32>, vector<32x16xf32> -> vector<32x16xf32>
      %cst_30 = arith.constant dense<0.000000e+00> : vector<32xf32>
      %41 = vector.multi_reduction <add>, %40, %cst_30 [1] : vector<32x16xf32> to vector<32xf32>
      %42 = vector.shape_cast %41 : vector<32xf32> to vector<32x1xf32>
      %cst_31 = arith.constant 1.600000e+01 : f32
      %43 = vector.broadcast %cst_31 : f32 to vector<32x1xf32>
      %44 = arith.divf %42, %43 : vector<32x1xf32>
      %45 = vector.broadcast %44 : vector<32x1xf32> to vector<32x16xf32>
      %46 = arith.subf %40, %45 : vector<32x16xf32>
      %47 = arith.mulf %46, %46 : vector<32x16xf32>
      %cst_32 = arith.constant dense<0.000000e+00> : vector<32xf32>
      %48 = vector.multi_reduction <add>, %47, %cst_32 [1] : vector<32x16xf32> to vector<32xf32>
      %49 = vector.shape_cast %48 : vector<32xf32> to vector<32x1xf32>
      %cst_33 = arith.constant 1.600000e+01 : f32
      %50 = vector.broadcast %cst_33 : f32 to vector<32x1xf32>
      %51 = arith.divf %49, %50 : vector<32x1xf32>
      %52 = vector.broadcast %44 : vector<32x1xf32> to vector<32x16xf32>
      %53 = arith.subf %40, %52 : vector<32x16xf32>
      %cst_34 = arith.constant 9.99999974E-6 : f32
      %54 = vector.broadcast %cst_34 : f32 to vector<32x1xf32>
      %55 = arith.addf %51, %54 : vector<32x1xf32>
      %56 = math.rsqrt %55 : vector<32x1xf32>
      %57 = vector.broadcast %56 : vector<32x1xf32> to vector<32x16xf32>
      %58 = arith.mulf %53, %57 : vector<32x16xf32>
      %c0_35 = arith.constant 0 : index
      %c0_36 = arith.constant 0 : index
      %59 = vector.load %arg5[%c0_35, %c0_36] : memref<1x16xf32, #tpu.memory_space<vmem>>, vector<1x16xf32>
      %60 = vector.broadcast %59 : vector<1x16xf32> to vector<32x16xf32>
      %61 = arith.mulf %58, %60 : vector<32x16xf32>
      %c0_37 = arith.constant 0 : index
      %c0_38 = arith.constant 0 : index
      %62 = vector.load %arg6[%c0_37, %c0_38] : memref<1x16xf32, #tpu.memory_space<vmem>>, vector<1x16xf32>
      %63 = vector.broadcast %62 : vector<1x16xf32> to vector<32x16xf32>
      %64 = arith.addf %61, %63 : vector<32x16xf32>
      %cst_39 = arith.constant 0.000000e+00 : f32
      %65 = vector.broadcast %cst_39 : f32 to vector<32x16xf32>
      %66 = arith.cmpf ogt, %64, %65 : vector<32x16xf32>
      %67 = math.exp %64 : vector<32x16xf32>
      %cst_40 = arith.constant 1.000000e+00 : f32
      %68 = vector.broadcast %cst_40 : f32 to vector<32x16xf32>
      %69 = arith.subf %67, %68 : vector<32x16xf32>
      %70 = arith.select %66, %64, %69 : vector<32x16xi1>, vector<32x16xf32>
      %c0_41 = arith.constant 0 : index
      %c0_42 = arith.constant 0 : index
      %71 = vector.load %arg7[%c0_41, %c0_42] : memref<16x48xf32, #tpu.memory_space<vmem>>, vector<16x48xf32>
      %cst_43 = arith.constant dense<0.000000e+00> : vector<32x48xf32>
      %72 = tpu.matmul %70, %71, %cst_43 {dimension_numbers = #tpu.dot_dimension_numbers<[1], [0], [0], [1], [0, 0, 1, 1], [], []>} : vector<32x16xf32>, vector<16x48xf32>, vector<32x48xf32> -> vector<32x48xf32>
      %73 = vector.extract_strided_slice %72 {offsets = [0, 0], sizes = [32, 24], strides = [1, 1]} : vector<32x48xf32> to vector<32x24xf32>
      %c0_44 = arith.constant 0 : index
      %c0_45 = arith.constant 0 : index
      %c0_46 = arith.constant 0 : index
      %74 = vector.load %arg9[%c0_44, %c0_45, %c0_46] : memref<1x32x24xf32, #tpu.memory_space<vmem>>, vector<1x32x24xf32>
      %75 = vector.shape_cast %74 : vector<1x32x24xf32> to vector<32x24xf32>
      %76 = vector.shape_cast %73 : vector<32x24xf32> to vector<1x32x24xf32>
      tpu.vector_store %arg9[%c0_44, %c0_45, %c0_46], %76 {strides = array<i32>} : memref<1x32x24xf32, #tpu.memory_space<vmem>>, vector<1x32x24xf32>,
      %77 = vector.extract_strided_slice %72 {offsets = [0, 24], sizes = [32, 24], strides = [1, 1]} : vector<32x48xf32> to vector<32x24xf32>
      %c0_47 = arith.constant 0 : index
      %c0_48 = arith.constant 0 : index
      %c0_49 = arith.constant 0 : index
      %78 = vector.load %arg10[%c0_47, %c0_48, %c0_49] : memref<1x32x24xf32, #tpu.memory_space<vmem>>, vector<1x32x24xf32>
      %79 = vector.shape_cast %78 : vector<1x32x24xf32> to vector<32x24xf32>
      %80 = vector.shape_cast %77 : vector<32x24xf32> to vector<1x32x24xf32>
      tpu.vector_store %arg10[%c0_47, %c0_48, %c0_49], %80 {strides = array<i32>} : memref<1x32x24xf32, #tpu.memory_space<vmem>>, vector<1x32x24xf32>,
      %cst_50 = arith.constant 0.000000e+00 : f32
      %81 = vector.broadcast %cst_50 : f32 to vector<1x24xf32>
      %c0_51 = arith.constant 0 : index
      %c0_52 = arith.constant 0 : index
      %82 = vector.load %arg12[%c0_51, %c0_52] : memref<1x24xf32, #tpu.memory_space<vmem>>, vector<1x24xf32>
      tpu.vector_store %arg12[%c0_51, %c0_52], %81 {strides = array<i32>} : memref<1x24xf32, #tpu.memory_space<vmem>>, vector<1x24xf32>,
      %cst_53 = arith.constant 0.000000e+00 : f32
      %83 = vector.broadcast %cst_53 : f32 to vector<1x24xf32>
      %c0_54 = arith.constant 0 : index
      %c0_55 = arith.constant 0 : index
      %84 = vector.load %arg13[%c0_54, %c0_55] : memref<1x24xf32, #tpu.memory_space<vmem>>, vector<1x24xf32>
      tpu.vector_store %arg13[%c0_54, %c0_55], %83 {strides = array<i32>} : memref<1x24xf32, #tpu.memory_space<vmem>>, vector<1x24xf32>,
    } else {
    }
    %c32_i32 = arith.constant 32 : i32
    %3 = arith.muli %arg1, %c32_i32 : i32
    %4 = tpu.assume_multiple %3, 8 : i32
    %c0 = arith.constant 0 : index
    %5 = arith.index_cast %4 : i32 to index
    %c0_1 = arith.constant 0 : index
    %6 = vector.load %arg9[%c0, %5, %c0_1] : memref<1x32x24xf32, #tpu.memory_space<vmem>>, vector<1x32x24xf32>
    %7 = vector.shape_cast %6 : vector<1x32x24xf32> to vector<32x24xf32>
    %c0_2 = arith.constant 0 : index
    %c0_3 = arith.constant 0 : index
    %c0_4 = arith.constant 0 : index
    %8 = vector.load %arg10[%c0_2, %c0_3, %c0_4] : memref<1x32x24xf32, #tpu.memory_space<vmem>>, vector<1x32x24xf32>
    %9 = vector.shape_cast %8 : vector<1x32x24xf32> to vector<32x24xf32>
    %c0_5 = arith.constant 0 : index
    %c0_6 = arith.constant 0 : index
    %c0_7 = arith.constant 0 : index
    %c0_8 = arith.constant 0 : index
    %10 = vector.load %arg3[%c0_5, %c0_6, %c0_7, %c0_8] : memref<1x32x32x8xf32, #tpu.memory_space<vmem>>, vector<1x32x32x8xf32>
    %11 = vector.shape_cast %10 : vector<1x32x32x8xf32> to vector<32x32x8xf32>
    %c0_9 = arith.constant 0 : index
    %c0_10 = arith.constant 0 : index
    %12 = vector.load %arg8[%c0_9, %c0_10] : memref<8x24xf32, #tpu.memory_space<vmem>>, vector<8x24xf32>
    %13 = vector.shape_cast %11 : vector<32x32x8xf32> to vector<1024x8xf32>
    %cst = arith.constant dense<0.000000e+00> : vector<1024x24xf32>
    %14 = tpu.matmul %13, %12, %cst {dimension_numbers = #tpu.dot_dimension_numbers<[1], [0], [0], [1], [0, 0, 1, 1], [], []>} : vector<1024x8xf32>, vector<8x24xf32>, vector<1024x24xf32> -> vector<1024x24xf32>
    %15 = vector.shape_cast %14 : vector<1024x24xf32> to vector<32x32x24xf32>
    %16 = vector.shape_cast %7 : vector<32x24xf32> to vector<32x1x24xf32>
    %17 = vector.broadcast %16 : vector<32x1x24xf32> to vector<32x32x24xf32>
    %18 = arith.addf %15, %17 : vector<32x32x24xf32>
    %19 = vector.shape_cast %9 : vector<32x24xf32> to vector<1x32x24xf32>
    %20 = vector.broadcast %19 : vector<1x32x24xf32> to vector<32x32x24xf32>
    %21 = arith.addf %18, %20 : vector<32x32x24xf32>
    %22 = vector.shape_cast %21 : vector<32x32x24xf32> to vector<1024x24xf32>
    %c0_11 = arith.constant 0 : index
    %c0_12 = arith.constant 0 : index
    %23 = vector.load %arg12[%c0_11, %c0_12] : memref<1x24xf32, #tpu.memory_space<vmem>>, vector<1x24xf32>
    %cst_13 = arith.constant dense<0.000000e+00> : vector<24xf32>
    %24 = vector.multi_reduction <add>, %22, %cst_13 [0] : vector<1024x24xf32> to vector<24xf32>
    %25 = vector.shape_cast %24 : vector<24xf32> to vector<1x24xf32>
    %26 = arith.addf %23, %25 : vector<1x24xf32>
    %c0_14 = arith.constant 0 : index
    %c0_15 = arith.constant 0 : index
    %27 = vector.load %arg12[%c0_14, %c0_15] : memref<1x24xf32, #tpu.memory_space<vmem>>, vector<1x24xf32>
    tpu.vector_store %arg12[%c0_14, %c0_15], %26 {strides = array<i32>} : memref<1x24xf32, #tpu.memory_space<vmem>>, vector<1x24xf32>,
    %c0_16 = arith.constant 0 : index
    %c0_17 = arith.constant 0 : index
    %28 = vector.load %arg13[%c0_16, %c0_17] : memref<1x24xf32, #tpu.memory_space<vmem>>, vector<1x24xf32>
    %29 = arith.mulf %22, %22 : vector<1024x24xf32>
    %cst_18 = arith.constant dense<0.000000e+00> : vector<24xf32>
    %30 = vector.multi_reduction <add>, %29, %cst_18 [0] : vector<1024x24xf32> to vector<24xf32>
    %31 = vector.shape_cast %30 : vector<24xf32> to vector<1x24xf32>
    %32 = arith.addf %28, %31 : vector<1x24xf32>
    %c0_19 = arith.constant 0 : index
    %c0_20 = arith.constant 0 : index
    %33 = vector.load %arg13[%c0_19, %c0_20] : memref<1x24xf32, #tpu.memory_space<vmem>>, vector<1x24xf32>
    tpu.vector_store %arg13[%c0_19, %c0_20], %32 {strides = array<i32>} : memref<1x24xf32, #tpu.memory_space<vmem>>, vector<1x24xf32>,
    %c0_i32_21 = arith.constant 0 : i32
    %34 = arith.cmpi eq, %arg1, %c0_i32_21 : i32
    %35 = arith.extui %34 : i1 to i32
    %c0_i32_22 = arith.constant 0 : i32
    %36 = arith.cmpi ne, %35, %c0_i32_22 : i32
    scf.if %36 {
      %c0_23 = arith.constant 0 : index
      %c0_24 = arith.constant 0 : index
      %37 = vector.load %arg12[%c0_23, %c0_24] : memref<1x24xf32, #tpu.memory_space<vmem>>, vector<1x24xf32>
      %cst_25 = arith.constant 9.765625E-4 : f32
      %38 = vector.broadcast %cst_25 : f32 to vector<1x24xf32>
      %39 = arith.mulf %37, %38 : vector<1x24xf32>
      %c0_26 = arith.constant 0 : index
      %c0_27 = arith.constant 0 : index
      %40 = vector.load %arg13[%c0_26, %c0_27] : memref<1x24xf32, #tpu.memory_space<vmem>>, vector<1x24xf32>
      %cst_28 = arith.constant 9.765625E-4 : f32
      %41 = vector.broadcast %cst_28 : f32 to vector<1x24xf32>
      %42 = arith.mulf %40, %41 : vector<1x24xf32>
      %43 = arith.mulf %39, %39 : vector<1x24xf32>
      %44 = arith.subf %42, %43 : vector<1x24xf32>
      %cst_29 = arith.constant 9.99999974E-6 : f32
      %45 = vector.broadcast %cst_29 : f32 to vector<1x24xf32>
      %46 = arith.addf %44, %45 : vector<1x24xf32>
      %47 = math.rsqrt %46 : vector<1x24xf32>
      %c0_30 = arith.constant 0 : index
      %c0_31 = arith.constant 0 : index
      %c0_32 = arith.constant 0 : index
      %48 = vector.load %arg11[%c0_30, %c0_31, %c0_32] : memref<1x2x24xf32, #tpu.memory_space<vmem>>, vector<1x1x24xf32>
      %49 = vector.shape_cast %48 : vector<1x1x24xf32> to vector<1x24xf32>
      %50 = vector.shape_cast %39 : vector<1x24xf32> to vector<1x1x24xf32>
      tpu.vector_store %arg11[%c0_30, %c0_31, %c0_32], %50 {strides = array<i32>} : memref<1x2x24xf32, #tpu.memory_space<vmem>>, vector<1x1x24xf32>,
      %c0_33 = arith.constant 0 : index
      %c1 = arith.constant 1 : index
      %c0_34 = arith.constant 0 : index
      %51 = vector.load %arg11[%c0_33, %c1, %c0_34] : memref<1x2x24xf32, #tpu.memory_space<vmem>>, vector<1x1x24xf32>
      %52 = vector.shape_cast %51 : vector<1x1x24xf32> to vector<1x24xf32>
      %53 = vector.shape_cast %47 : vector<1x24xf32> to vector<1x1x24xf32>
      tpu.vector_store %arg11[%c0_33, %c1, %c0_34], %53 {strides = array<i32>} : memref<1x2x24xf32, #tpu.memory_space<vmem>>, vector<1x1x24xf32>,
    } else {
    }
    return
  }
  func.func @transform_0(%arg0: i32, %arg1: i32) -> (i32, i32, i32, i32) {
    %c0_i32 = arith.constant 0 : i32
    %c0_i32_0 = arith.constant 0 : i32
    %c0_i32_1 = arith.constant 0 : i32
    %c0_i32_2 = arith.constant 0 : i32
    return %arg0, %c0_i32, %c0_i32_0, %c0_i32_1 : i32, i32, i32, i32
  }
  func.func @transform_1(%arg0: i32, %arg1: i32) -> (i32, i32, i32, i32) {
    %c0_i32 = arith.constant 0 : i32
    %c0_i32_0 = arith.constant 0 : i32
    %c0_i32_1 = arith.constant 0 : i32
    return %arg0, %arg1, %c0_i32, %c0_i32_0 : i32, i32, i32, i32
  }
  func.func @transform_2(%arg0: i32, %arg1: i32) -> (i32, i32) {
    %c0_i32 = arith.constant 0 : i32
    %c0_i32_0 = arith.constant 0 : i32
    %c0_i32_1 = arith.constant 0 : i32
    return %c0_i32, %c0_i32_0 : i32, i32
  }
  func.func @transform_3(%arg0: i32, %arg1: i32) -> (i32, i32) {
    %c0_i32 = arith.constant 0 : i32
    %c0_i32_0 = arith.constant 0 : i32
    %c0_i32_1 = arith.constant 0 : i32
    return %c0_i32, %c0_i32_0 : i32, i32
  }
  func.func @transform_4(%arg0: i32, %arg1: i32) -> (i32, i32) {
    %c0_i32 = arith.constant 0 : i32
    %c0_i32_0 = arith.constant 0 : i32
    %c0_i32_1 = arith.constant 0 : i32
    return %c0_i32, %c0_i32_0 : i32, i32
  }
  func.func @transform_5(%arg0: i32, %arg1: i32) -> (i32, i32) {
    %c0_i32 = arith.constant 0 : i32
    %c0_i32_0 = arith.constant 0 : i32
    %c0_i32_1 = arith.constant 0 : i32
    return %c0_i32, %c0_i32_0 : i32, i32
  }
  func.func @transform_6(%arg0: i32, %arg1: i32) -> (i32, i32) {
    %c0_i32 = arith.constant 0 : i32
    %c0_i32_0 = arith.constant 0 : i32
    %c0_i32_1 = arith.constant 0 : i32
    return %c0_i32, %c0_i32_0 : i32, i32
  }
  func.func @transform_7(%arg0: i32, %arg1: i32) -> (i32, i32, i32) {
    %c0_i32 = arith.constant 0 : i32
    %c0_i32_0 = arith.constant 0 : i32
    %c0_i32_1 = arith.constant 0 : i32
    return %arg0, %c0_i32, %c0_i32_0 : i32, i32, i32
  }
  func.func @transform_8(%arg0: i32, %arg1: i32) -> (i32, i32, i32) {
    %c0_i32 = arith.constant 0 : i32
    %c0_i32_0 = arith.constant 0 : i32
    %c0_i32_1 = arith.constant 0 : i32
    return %arg0, %c0_i32, %c0_i32_0 : i32, i32, i32
  }
  func.func @transform_9(%arg0: i32, %arg1: i32) -> (i32, i32, i32) {
    %c0_i32 = arith.constant 0 : i32
    %c0_i32_0 = arith.constant 0 : i32
    %c0_i32_1 = arith.constant 0 : i32
    return %arg0, %c0_i32, %c0_i32_0 : i32, i32, i32
  }
}

</mosaic_0001>

<bundles_post_ra>
// kernel: tpu_custom_call.1
= control target key start
LH: loop header
LB: loop body
LE: loop exit
PB: predicated region body
PF: predicated region fallthrough
CT: control target
= control target key end

     0   :  { %15 = vsyncpa [#allocation5], 0  ;;  %s5927_s0 = inlined_call_operand.vmem [shape: f32[2,3,32,32], index: 0, kind: input, shape index: {}]   ;;  %s5928_s1 = inlined_call_operand.vmem [shape: f32[2,32,32,8], index: 1, kind: input, shape index: {}]   ;;  %s5929_s2 = inlined_call_operand.vmem [shape: f32[32,16], index: 2, kind: input, shape index: {}]   ;;  %s5930_s3 = inlined_call_operand.vmem [shape: f32[1,16], index: 3, kind: input, shape index: {}]   ;;  %s5931_s4 = inlined_call_operand.vmem [shape: f32[1,16], index: 4, kind: input, shape index: {}]   ;;  %s5932_s5 = inlined_call_operand.vmem [shape: f32[16,48], index: 5, kind: input, shape index: {}]   ;;  %s5933_s6 = inlined_call_operand.vmem [shape: f32[8,24], index: 6, kind: input, shape index: {}]   ;;  %s5934_s7 = inlined_call_operand.vmem [shape: f32[2,32,24], index: 7, kind: output, shape index: {0}]   ;;  %s5935_s8 = inlined_call_operand.vmem [shape: f32[2,32,24], index: 8, kind: output, shape index: {1}]   ;;  %s5936_s9 = inlined_call_operand.hbm [shape: f32[2,2,24], index: 9, kind: output, shape index: {2}]  }
   0x1   :  { %17 = vsyncpa [#allocation5 + $0x1], 0  ;;  %s4167_s30 = smov 0   ;;  %s4169_s10 = smov 0  }
   0x2   :  { %s4171_s11 = smov 0   ;;  %s4173_s12 = smov 0  }
   0x3   :  { %s4175_s13 = smov 0   ;;  %s4177_s14 = smov 0  }
   0x4 LB: > { %s3426_s15 = sadd.s32 4294967295, %s4111_s14   ;;  %s3427_s16 = sadd.s32 4294967294, %s4111_s14   ;;  %s4111_s14 = sphi %s4177_s14, %s23_s14   ;;  %s4107_s13 = sphi %s4175_s13, %s6220_s13   ;;  %s4103_s12 = sphi %s4173_s12, %s6219_s12   ;;  %s4099_s11 = sphi %s4171_s11, %s6218_s11   ;;  %s4095_s10 = sphi %s4169_s10, %s6217_s10   ;;  %s4091_s30 = sphi %s4167_s30, %s6216_s30  }
   0x5   : > { %s35_s17 = sadd.s32 1, %s4107_s13  ;;  %s253_s18 = sadd.s32 1, %s4099_s11 }
   0x6   : > { %p37_p0 = scmp.ge.s32.totalorder %s35_s17, 2  ;;  %p263_p1 = scmp.ne.s32.totalorder %s4099_s11, %s4095_s10 }
   0x7   : > { %p264_p2 = scmp.eq.s32.totalorder %s3426_s15, 1  ;;  %p269_p3 = scmp.ne.s32.totalorder %s4095_s10, %s4091_s30 }
   0x8   : > { %s6222_s17 = smov (%p37_p0, %s35_s17), 0  ;;  %p270_p5 = scmp.eq.s32.totalorder %s3427_s16, 1 }
   0x9   : > { %p4207_p4 = por %p264_p2, %p263_p1  ;;  %s250_s20 = ssub.s32 %s4107_s13, %s6222_s17 }
   0xa   : > { %p3430_p6 = scmp.ge.s32.totalorder %s4111_s14, 1  ;;  %p251_p7 = scmp.eq.s32.totalorder %s250_s20, 0 }
   0xb   : > { %p4214_p8 = por %p270_p5, %p269_p3  ;;  %p325_p9 = scmp.lt.s32.totalorder %s4111_s14, 3 }
   0xc   : > { %s4220_s22 = scalar_select %p251_p7, %s4099_s11, %s253_s18  }
   0xd   : > { %p326_p10 = pnand %p3430_p6, %p325_p9 }
   0xf   : > { %329 = sbr.rel (%p326_p10) target bundleno = 1240 (0x4d8), region = 48 }
  0x14   : > { %v418_v0 = vld [vmem:[%s5929_s2 + $0x18] sm:$0xff]  ;;  %v417_v1 = vld [vmem:[%s5929_s2 + $0x10] sm:$0xff]  ;;  %p381_p11 = scmp.lt.s32.totalorder %s4103_s12, 1  ;;  %v416_v2 = vld [vmem:[%s5929_s2 + $0x8] sm:$0xff]  ;;  %vm419_vm0 = vcmask 261120   ;;  %vm517_vm1 = vcmask 130048  }
  0x15   : > { %3731 = vmatprep.subr.mxu0 %v418_v0  ;;  %v415_v3 = vld [vmem:[%s5929_s2] sm:$0xff]  ;;  %vm879_vm2 = vcmask 64512   ;;  %vm712_vm7 = vcmask 195584   ;;  %s4114_s23 = smov 104   ;;  %vm737_vm8 = vcmask 188416  }
  0x16   : > { %3732 = vmatpush3.msra.mxu0 %v418_v0  ;;  %s4233_s29 = scalar_select %p381_p11, %s4103_s12, 1  ;;  %v4267_v16 = vld [vmem:[%s5933_s6] sm:$0xff] }
  0x17   : > { %3733 = vmatprep.subr.mxu0 %v417_v1 }
  0x18   : > { %3734 = vmatpush3.msra.mxu0 %v417_v1  ;;  %s3951_s18 = smul.u32 96, %s4233_s29  ;;  %s3585_s25 = sshll.u32 %s4233_s29, 10 }
  0x19   : > { %3735 = vmatprep.subr.mxu0 %v416_v2  ;;  %s4262_s28 = scalar_lea.vmem %s5928_s1, %s3585_s25  ;;  %s3586_s16 = sshll.u32 %s4233_s29, 5 }
  0x1a   : > { %3736 = vmatpush3.msra.mxu0 %v416_v2  ;;  %s385_s24 = scalar_lea.vmem %s5927_s0, %s3951_s18  ;;  %v750_v17 = vld [vmem:[%s4262_s28] sm:$0xff]  ;;  %v751_v18 = vld [vmem:[%s4262_s28 + $0x8] sm:$0xff]  ;;  %v752_v19 = vld [vmem:[%s4262_s28 + $0x10] sm:$0xff]  ;;  %s4591_s20 = scalar_lea.vmem %s5934_s7, %s3586_s16 }
  0x1b   : > { %3737 = vmatprep.subr.mxu0 %v415_v3  ;;  %v411_v4 = vld [vmem:[%s385_s24] sm:$0xff]  ;;  %v412_v5 = vld [vmem:[%s385_s24 + $0x8] sm:$0xff]  ;;  %v413_v6 = vld [vmem:[%s385_s24 + $0x10] sm:$0xff]  ;;  %s4824_s26 = scalar_lea.vmem %s5935_s8, %s3586_s16  ;;  %s378_s29 = sand.u32 1, %s4095_s10  }
  0x1c   : > { %3738 = vmatpush3.msra.mxu0 %v415_v3  ;;  %3739 = vmatprep.mubr.msk.f32.mxu0 %vm419_vm0, %v411_v4  ;;  %v414_v7 = vld [vmem:[%s385_s24 + $0x18] sm:$0xff]  ;;  %v754_v21 = vld [vmem:[%s4262_s28 + $0x20] sm:$0xff]  ;;  %v755_v22 = vld [vmem:[%s4262_s28 + $0x28] sm:$0xff]  ;;  %s3431_s27 = sshll.u32 %s378_s29, 1  ;;  %s3582_s16 = sshll.u32 %s4103_s12, 5 }
  0x1d   : > { %3740 = vmatmul.mubr.msk.f32.vlgmr.msra.gmra.mxu0 %vm419_vm0, %v412_v5  ;;  %3755 = vmatprep.subr.mxu0 %v4267_v16  ;;  %v753_v20 = vld [vmem:[%s4262_s28 + $0x18] sm:$0xff]  ;;  %v756_v23 = vld [vmem:[%s4262_s28 + $0x30] sm:$0xff]  ;;  %v758_v25 = vld [vmem:[%s4262_s28 + $0x40] sm:$0xff]  ;;  %s380_s15 = scalar_lea.vmem [#allocation4], %s3431_s27  ;;  %s3267_s24 = scalar_lea.sflag [#allocation5], %s378_s29 }
  0x1e   : > { %3742 = vmatprep.mubr.msk.f32.mxu0 %vm419_vm0, %v413_v6  ;;  %3756 = vmatpush3.msra.mxu0 %v4267_v16  ;;  %v757_v24 = vld [vmem:[%s4262_s28 + $0x38] sm:$0xff]  ;;  %v759_v26 = vld [vmem:[%s4262_s28 + $0x48] sm:$0xff]  ;;  %v760_v27 = vld [vmem:[%s4262_s28 + $0x50] sm:$0xff] }
  0x1f   : > { %v761_v28 = vld [vmem:[%s4262_s28 + $0x58] sm:$0xff]  ;;  %v762_v29 = vld [vmem:[%s4262_s28 + $0x60] sm:$0xff]  ;;  %v763_v30 = vld [vmem:[%s4262_s28 + $0x68] sm:$0xff] }
  0x20   : > { %v764_v31 = vld [vmem:[%s4262_s28 + $0x70] sm:$0xff]  ;;  %v765_v32 = vld [vmem:[%s4262_s28 + $0x78] sm:$0xff]  ;;  %v766_v33 = vld [vmem:[%s4262_s28 + $0x80] sm:$0xff] }
  0x21   : > { %3743 = vmatmul.mubr.msk.f32.gmra.mxu0 %vm419_vm0, %v414_v7  ;;  %v767_v34 = vld [vmem:[%s4262_s28 + $0x88] sm:$0xff]  ;;  %v768_v35 = vld [vmem:[%s4262_s28 + $0x90] sm:$0xff]  ;;  %v769_v36 = vld [vmem:[%s4262_s28 + $0x98] sm:$0xff] }
  0x22   : > { %3757 = vmatprep.mubr.msk.f32.mxu0 %vm879_vm2, %v750_v17  ;;  %v770_v37 = vld [vmem:[%s4262_s28 + $0xa0] sm:$0xff]  ;;  %v771_v38 = vld [vmem:[%s4262_s28 + $0xa8] sm:$0xff]  ;;  %v772_v39 = vld [vmem:[%s4262_s28 + $0xb0] sm:$0xff] }
  0x23   : > { %v773_v40 = vld [vmem:[%s4262_s28 + $0xb8] sm:$0xff]  ;;  %v774_v41 = vld [vmem:[%s4262_s28 + $0xc0] sm:$0xff]  ;;  %v775_v42 = vld [vmem:[%s4262_s28 + $0xc8] sm:$0xff] }
  0x24   : > { %v776_v43 = vld [vmem:[%s4262_s28 + $0xd0] sm:$0xff]  ;;  %v777_v44 = vld [vmem:[%s4262_s28 + $0xd8] sm:$0xff]  ;;  %v778_v1 = vld [vmem:[%s4262_s28 + $0xe0] sm:$0xff] }
  0x25   : > { %3758 = vmatmul.mubr.msk.f32.vlgmr.msra.gmra.mxu0 %vm879_vm2, %v751_v18  ;;  %v779_v2 = vld [vmem:[%s4262_s28 + $0xe8] sm:$0xff]  ;;  %v780_v3 = vld [vmem:[%s4262_s28 + $0xf0] sm:$0xff]  ;;  %v781_v4 = vld [vmem:[%s4262_s28 + $0xf8] sm:$0xff] }
  0x26   : > { %3760 = vmatprep.mubr.msk.f32.mxu0 %vm879_vm2, %v752_v19  ;;  %v782_v5 = vld [vmem:[%s4262_s28 + $0x100] sm:$0xff]  ;;  %v783_v6 = vld [vmem:[%s4262_s28 + $0x108] sm:$0xff]  ;;  %v784_v7 = vld [vmem:[%s4262_s28 + $0x110] sm:$0xff] }
  0x27   : > { %v792_v17 = vld [vmem:[%s4262_s28 + $0x150] sm:$0xff]  ;;  %v793_v18 = vld [vmem:[%s4262_s28 + $0x158] sm:$0xff]  ;;  %v794_v19 = vld [vmem:[%s4262_s28 + $0x160] sm:$0xff] }
  0x29   : > { %3761 = vmatmul.mubr.msk.f32.gmra.mxu0 %vm879_vm2, %v753_v20  ;;  %v795_v20 = vld [vmem:[%s4262_s28 + $0x168] sm:$0xff] }
  0x2a   : > { %3763 = vmatprep.mubr.msk.f32.mxu0 %vm879_vm2, %v754_v21  ;;  %v796_v21 = vld [vmem:[%s4262_s28 + $0x170] sm:$0xff] }
  0x2d   : > { %3764 = vmatmul.mubr.msk.f32.gmra.mxu0 %vm879_vm2, %v755_v22  ;;  %v797_v22 = vld [vmem:[%s4262_s28 + $0x178] sm:$0xff] }
  0x2e   : > { %3766 = vmatprep.mubr.msk.f32.mxu0 %vm879_vm2, %v756_v23  ;;  %v798_v23 = vld [vmem:[%s4262_s28 + $0x180] sm:$0xff] }
  0x31   : > { %3767 = vmatmul.mubr.msk.f32.gmra.mxu0 %vm879_vm2, %v757_v24  ;;  %v799_v24 = vld [vmem:[%s4262_s28 + $0x188] sm:$0xff] }
  0x32   : > { %3769 = vmatprep.mubr.msk.f32.mxu0 %vm879_vm2, %v758_v25  ;;  %v800_v25 = vld [vmem:[%s4262_s28 + $0x190] sm:$0xff] }
  0x35   : > { %3770 = vmatmul.mubr.msk.f32.gmra.mxu0 %vm879_vm2, %v759_v26  ;;  %v613_v26 = vld [vmem:[%s5932_s5] sm:$0xff] }
  0x36   : > { %3772 = vmatprep.mubr.msk.f32.mxu0 %vm879_vm2, %v760_v27  ;;  %v801_v27 = vld [vmem:[%s4262_s28 + $0x198] sm:$0xff] }
  0x39   : > { %3773 = vmatmul.mubr.msk.f32.gmra.mxu0 %vm879_vm2, %v761_v28  ;;  %v802_v28 = vld [vmem:[%s4262_s28 + $0x1a0] sm:$0xff] }
  0x3a   : > { %3775 = vmatprep.mubr.msk.f32.mxu0 %vm879_vm2, %v762_v29  ;;  %v803_v29 = vld [vmem:[%s4262_s28 + $0x1a8] sm:$0xff] }
  0x3d   : > { %3776 = vmatmul.mubr.msk.f32.gmra.mxu0 %vm879_vm2, %v763_v30  ;;  %v804_v30 = vld [vmem:[%s4262_s28 + $0x1b0] sm:$0xff] }
  0x3e   : > { %3778 = vmatprep.mubr.msk.f32.mxu0 %vm879_vm2, %v764_v31  ;;  %v805_v31 = vld [vmem:[%s4262_s28 + $0x1b8] sm:$0xff] }
  0x41   : > { %3779 = vmatmul.mubr.msk.f32.gmra.mxu0 %vm879_vm2, %v765_v32  ;;  %v806_v32 = vld [vmem:[%s4262_s28 + $0x1c0] sm:$0xff] }
  0x42   : > { %3781 = vmatprep.mubr.msk.f32.mxu0 %vm879_vm2, %v766_v33  ;;  %v807_v33 = vld [vmem:[%s4262_s28 + $0x1c8] sm:$0xff] }
  0x45   : > { %3782 = vmatmul.mubr.msk.f32.gmra.mxu0 %vm879_vm2, %v767_v34  ;;  %v808_v34 = vld [vmem:[%s4262_s28 + $0x1d0] sm:$0xff] }
  0x46   : > { %3784 = vmatprep.mubr.msk.f32.mxu0 %vm879_vm2, %v768_v35  ;;  %v809_v35 = vld [vmem:[%s4262_s28 + $0x1d8] sm:$0xff] }
  0x49   : > { %3785 = vmatmul.mubr.msk.f32.gmra.mxu0 %vm879_vm2, %v769_v36  ;;  %v810_v36 = vld [vmem:[%s4262_s28 + $0x1e0] sm:$0xff] }
  0x4a   : > { %3787 = vmatprep.mubr.msk.f32.mxu0 %vm879_vm2, %v770_v37  ;;  %v811_v37 = vld [vmem:[%s4262_s28 + $0x1e8] sm:$0xff] }
  0x4d   : > { %3788 = vmatmul.mubr.msk.f32.gmra.mxu0 %vm879_vm2, %v771_v38 }
  0x4e   : > { %3790 = vmatprep.mubr.msk.f32.mxu0 %vm879_vm2, %v772_v39 }
  0x51   : > { %3791 = vmatmul.mubr.msk.f32.gmra.mxu0 %vm879_vm2, %v773_v40 }
  0x52   : > { %3793 = vmatprep.mubr.msk.f32.mxu0 %vm879_vm2, %v774_v41 }
  0x55   : > { %3794 = vmatmul.mubr.msk.f32.gmra.mxu0 %vm879_vm2, %v775_v42 }
  0x56   : > { %3796 = vmatprep.mubr.msk.f32.mxu0 %vm879_vm2, %v776_v43 }
  0x59   : > { %3797 = vmatmul.mubr.msk.f32.gmra.mxu0 %vm879_vm2, %v777_v44 }
  0x5a   : > { %3799 = vmatprep.mubr.msk.f32.mxu0 %vm879_vm2, %v778_v1 }
  0x5d   : > { %3800 = vmatmul.mubr.msk.f32.gmra.mxu0 %vm879_vm2, %v779_v2 }
  0x5e   : > { %3802 = vmatprep.mubr.msk.f32.mxu0 %vm879_vm2, %v780_v3 }
  0x61   : > { %3803 = vmatmul.mubr.msk.f32.gmra.mxu0 %vm879_vm2, %v781_v4 }
  0x62   : > { %3805 = vmatprep.mubr.msk.f32.mxu0 %vm879_vm2, %v782_v5 }
  0x65   : > { %3806 = vmatmul.mubr.msk.f32.gmra.mxu0 %vm879_vm2, %v783_v6 }
  0x66   : > { %3808 = vmatprep.mubr.msk.f32.mxu0 %vm879_vm2, %v784_v7 }
  0xdd   : > { %v4242_v8 = vpop.f32.mrf.mxu0 }
  0xde   : > { %v521_v13 = vsel %vm517_vm1, %v4242_v8, 0.0 }
  0xdf   : > { %v4244_v9 = vpop.f32.mrf.mxu0 }
  0xe0   : > { %v518_v10 = vsel %vm517_vm1, %v4244_v9, 0.0 }
  0xe1   : > { %519 = vadd.xlane.f32.xlu0 %v518_v10  ;;  %v4248_v11 = vpop.f32.mrf.mxu0  ;;  %v787_v10 = vld [vmem:[%s4262_s28 + $0x128] sm:$0xff] }
  0xe2   : > { %v527_v15 = vsel %vm517_vm1, %v4248_v11, 0.0 }
  0xe3   : > { %v4250_v12 = vpop.f32.mrf.mxu0 }
  0xe4   : > { %v524_v14 = vsel %vm517_vm1, %v4250_v12, 0.0 }
  0xe5   : > { %522 = vadd.xlane.f32.xlu0 %v521_v13  ;;  %525 = vadd.xlane.f32.xlu1 %v524_v14  ;;  %v789_v13 = vld [vmem:[%s4262_s28 + $0x138] sm:$0xff]  ;;  %v790_v14 = vld [vmem:[%s4262_s28 + $0x140] sm:$0xff] }
  0xe9   : > { %528 = vadd.xlane.f32.xlu1 %v527_v15  ;;  %v791_v15 = vld [vmem:[%s4262_s28 + $0x148] sm:$0xff] }
 0x16a   : > { %v520_v45 = vpop.xlane.xlu0 %519 }
 0x16b   : > { %v531_v46 = vmul.f32 0.0625, %v520_v45 }
 0x16d   : > { %v4328_v47 = vsub.f32 %v4244_v9, %v531_v46  ;;  %v786_v9 = vld [vmem:[%s4262_s28 + $0x120] sm:$0xff] }
 0x16e   : > { %v523_v48 = vpop.xlane.xlu0 %522  ;;  %v526_v49 = vpop.xlane.xlu1 %525 }
 0x16f   : > { %v532_v50 = vmul.f32 0.0625, %v523_v48  ;;  %v533_v51 = vmul.f32 0.0625, %v526_v49  ;;  %v539_v52 = vmul.f32 %v4328_v47, %v4328_v47 }
 0x171   : > { %v4333_v53 = vsub.f32 %v4242_v8, %v532_v50  ;;  %v4336_v54 = vsub.f32 %v4250_v12, %v533_v51  ;;  %v543_v55 = vsel %vm517_vm1, %v539_v52, 0.0  ;;  %v785_v8 = vld [vmem:[%s4262_s28 + $0x118] sm:$0xff]  ;;  %v614_v12 = vld [vmem:[%s5932_s5 + $0x8] sm:$0xff]  ;;  %v3443_v52 = vld [vmem:[%s5930_s3] ss:$0 sm:$0xff] }
 0x172   : > { %544 = vadd.xlane.f32.xlu0 %v543_v55  ;;  %v529_v56 = vpop.xlane.xlu1 %528  ;;  %3809 = vmatmul.mubr.msk.f32.gmra.mxu0 %vm879_vm2, %v785_v8 }
 0x173   : > { %v534_v57 = vmul.f32 0.0625, %v529_v56  ;;  %v540_v58 = vmul.f32 %v4333_v53, %v4333_v53  ;;  %v541_v59 = vmul.f32 %v4336_v54, %v4336_v54  ;;  %3811 = vmatprep.mubr.msk.f32.mxu0 %vm879_vm2, %v786_v9  ;;  %3745 = vmatprep.subr.mxu1 %v614_v12  ;;  %v3444_v56 = vld [vmem:[%s5931_s4] ss:$0 sm:$0xff] }
 0x174   : > { %3746 = vmatpush3.msra.mxu1 %v614_v12 }
 0x175   : > { %v4344_v60 = vsub.f32 %v4248_v11, %v534_v57  ;;  %v546_v61 = vsel %vm517_vm1, %v540_v58, 0.0  ;;  %v549_v62 = vsel %vm517_vm1, %v541_v59, 0.0  ;;  %v788_v11 = vld [vmem:[%s4262_s28 + $0x130] sm:$0xff]  ;;  %3747 = vmatprep.subr.mxu1 %v613_v26 }
 0x176   : > { %547 = vadd.xlane.f32.xlu1 %v546_v61  ;;  %550 = vadd.xlane.f32.xlu0 %v549_v62 }
 0x177   : > { %v542_v63 = vmul.f32 %v4344_v60, %v4344_v60  ;;  %3812 = vmatmul.mubr.msk.f32.gmra.mxu0 %vm879_vm2, %v787_v10  ;;  %3748 = vmatpush3.msra.mxu1 %v613_v26  ;;  %v818_v26 = vld [vmem:[%s4262_s28 + $0x220] sm:$0xff] }
 0x178   : > { %3814 = vmatprep.mubr.msk.f32.mxu0 %vm879_vm2, %v788_v11  ;;  %3949 = vmatprep.subr.mxu1 %v4267_v16 }
 0x179   : > { %v552_v0 = vsel %vm517_vm1, %v542_v63, 0.0 }
 0x17a   : > { %553 = vadd.xlane.f32.xlu1 %v552_v0 }
 0x17b   : > { %3815 = vmatmul.mubr.msk.f32.gmra.mxu0 %vm879_vm2, %v789_v13 }
 0x17c   : > { %3817 = vmatprep.mubr.msk.f32.mxu0 %vm879_vm2, %v790_v14 }
 0x17f   : > { %3818 = vmatmul.mubr.msk.f32.gmra.mxu0 %vm879_vm2, %v791_v15 }
 0x180   : > { %3820 = vmatprep.mubr.msk.f32.mxu0 %vm879_vm2, %v792_v17 }
 0x183   : > { %3821 = vmatmul.mubr.msk.f32.gmra.mxu0 %vm879_vm2, %v793_v18 }
 0x184   : > { %3823 = vmatprep.mubr.msk.f32.mxu0 %vm879_vm2, %v794_v19 }
 0x187   : > { %3824 = vmatmul.mubr.msk.f32.gmra.mxu0 %vm879_vm2, %v795_v20 }
 0x188   : > { %3826 = vmatprep.mubr.msk.f32.mxu0 %vm879_vm2, %v796_v21  ;;  %v812_v21 = vld [vmem:[%s4262_s28 + $0x1f0] sm:$0xff] }
 0x18b   : > { %3827 = vmatmul.mubr.msk.f32.gmra.mxu0 %vm879_vm2, %v797_v22  ;;  %v813_v22 = vld [vmem:[%s4262_s28 + $0x1f8] sm:$0xff] }
 0x18c   : > { %3829 = vmatprep.mubr.msk.f32.mxu0 %vm879_vm2, %v798_v23  ;;  %v814_v23 = vld [vmem:[%s4262_s28 + $0x200] sm:$0xff] }
 0x18f   : > { %3830 = vmatmul.mubr.msk.f32.gmra.mxu0 %vm879_vm2, %v799_v24  ;;  %v815_v24 = vld [vmem:[%s4262_s28 + $0x208] sm:$0xff] }
 0x190   : > { %3832 = vmatprep.mubr.msk.f32.mxu0 %vm879_vm2, %v800_v25  ;;  %v816_v25 = vld [vmem:[%s4262_s28 + $0x210] sm:$0xff] }
 0x193   : > { %3833 = vmatmul.mubr.msk.f32.gmra.mxu0 %vm879_vm2, %v801_v27  ;;  %v819_v27 = vld [vmem:[%s4262_s28 + $0x228] sm:$0xff] }
 0x194   : > { %3835 = vmatprep.mubr.msk.f32.mxu0 %vm879_vm2, %v802_v28  ;;  %v820_v28 = vld [vmem:[%s4262_s28 + $0x230] sm:$0xff] }
 0x197   : > { %3836 = vmatmul.mubr.msk.f32.gmra.mxu0 %vm879_vm2, %v803_v29  ;;  %v821_v29 = vld [vmem:[%s4262_s28 + $0x238] sm:$0xff] }
 0x198   : > { %3838 = vmatprep.mubr.msk.f32.mxu0 %vm879_vm2, %v804_v30  ;;  %v822_v30 = vld [vmem:[%s4262_s28 + $0x240] sm:$0xff] }
 0x19b   : > { %3839 = vmatmul.mubr.msk.f32.gmra.mxu0 %vm879_vm2, %v805_v31  ;;  %v823_v31 = vld [vmem:[%s4262_s28 + $0x248] sm:$0xff] }
 0x19c   : > { %3841 = vmatprep.mubr.msk.f32.mxu0 %vm879_vm2, %v806_v32  ;;  %v824_v32 = vld [vmem:[%s4262_s28 + $0x250] sm:$0xff] }
 0x19f   : > { %3842 = vmatmul.mubr.msk.f32.gmra.mxu0 %vm879_vm2, %v807_v33  ;;  %v825_v33 = vld [vmem:[%s4262_s28 + $0x258] sm:$0xff] }
 0x1a0   : > { %3844 = vmatprep.mubr.msk.f32.mxu0 %vm879_vm2, %v808_v34  ;;  %v826_v34 = vld [vmem:[%s4262_s28 + $0x260] sm:$0xff] }
 0x1a3   : > { %3845 = vmatmul.mubr.msk.f32.gmra.mxu0 %vm879_vm2, %v809_v35  ;;  %v827_v35 = vld [vmem:[%s4262_s28 + $0x268] sm:$0xff] }
 0x1a4   : > { %3847 = vmatprep.mubr.msk.f32.mxu0 %vm879_vm2, %v810_v36  ;;  %v828_v36 = vld [vmem:[%s4262_s28 + $0x270] sm:$0xff] }
 0x1a7   : > { %3848 = vmatmul.mubr.msk.f32.gmra.mxu0 %vm879_vm2, %v811_v37  ;;  %v829_v37 = vld [vmem:[%s4262_s28 + $0x278] sm:$0xff] }
 0x1fb   : > { %v545_v38 = vpop.xlane.xlu0 %544 }
 0x1fc   : > { %v555_v39 = vmul.f32 0.0625, %v545_v38  ;;  %v830_v38 = vld [vmem:[%s4262_s28 + $0x280] sm:$0xff] }
 0x1fe   : > { %v559_v40 = vadd.f32 1e-05, %v555_v39  ;;  %v831_v39 = vld [vmem:[%s4262_s28 + $0x288] sm:$0xff] }
 0x1ff   : > { %v551_v41 = vpop.xlane.xlu0 %550  ;;  %v548_v42 = vpop.xlane.xlu1 %547 }
 0x200   : > { %4014 = vrsqrt.f32 %v559_v40  ;;  %v557_v43 = vmul.f32 0.0625, %v551_v41  ;;  %v556_v44 = vmul.f32 0.0625, %v548_v42  ;;  %v832_v40 = vld [vmem:[%s4262_s28 + $0x290] sm:$0xff]  ;;  %v833_v41 = vld [vmem:[%s4262_s28 + $0x298] sm:$0xff]  ;;  %v834_v42 = vld [vmem:[%s4262_s28 + $0x2a0] sm:$0xff] }
 0x202   : > { %v561_v45 = vadd.f32 1e-05, %v557_v43  ;;  %v560_v46 = vadd.f32 1e-05, %v556_v44  ;;  %v835_v43 = vld [vmem:[%s4262_s28 + $0x2a8] sm:$0xff]  ;;  %v836_v44 = vld [vmem:[%s4262_s28 + $0x2b0] sm:$0xff] }
 0x203   : > { %v554_v48 = vpop.xlane.xlu1 %553 }
 0x204   : > { %4016 = vrsqrt.f32 %v561_v45  ;;  %v558_v49 = vmul.f32 0.0625, %v554_v48  ;;  %v837_v45 = vld [vmem:[%s4262_s28 + $0x2b8] sm:$0xff]  ;;  %v839_v48 = vld [vmem:[%s4262_s28 + $0x2c8] sm:$0xff] }
 0x205   : > { %4018 = vrsqrt.f32 %v560_v46  ;;  %v838_v46 = vld [vmem:[%s4262_s28 + $0x2c0] sm:$0xff] }
 0x206   : > { %v562_v50 = vadd.f32 1e-05, %v558_v49  ;;  %v840_v49 = vld [vmem:[%s4262_s28 + $0x2d0] sm:$0xff] }
 0x208   : > { %4020 = vrsqrt.f32 %v562_v50  ;;  %v841_v50 = vld [vmem:[%s4262_s28 + $0x2d8] sm:$0xff] }
 0x20d   : > { %v4015_v51 = vpop.eup %4014 }
 0x20e   : > { %v567_v55 = vmul.f32 %v4015_v51, %v4328_v47  ;;  %v842_v51 = vld [vmem:[%s4262_s28 + $0x2e0] sm:$0xff] }
 0x210   : > { %v578_v57 = vmul.f32 %v3443_v52, %v567_v55  ;;  %v844_v55 = vld [vmem:[%s4262_s28 + $0x2f0] sm:$0xff] }
 0x211   : > { %v4017_v58 = vpop.eup %4016 }
 0x212   : > { %v4019_v59 = vpop.eup %4018  ;;  %v589_v61 = vadd.f32 %v3444_v56, %v578_v57  ;;  %v569_v62 = vmul.f32 %v4017_v58, %v4336_v54  ;;  %v846_v57 = vld [vmem:[%s4262_s28 + $0x300] sm:$0xff]  ;;  %v847_v58 = vld [vmem:[%s4262_s28 + $0x308] sm:$0xff] }
 0x213   : > { %v568_v63 = vmul.f32 %v4019_v59, %v4333_v53  ;;  %v848_v59 = vld [vmem:[%s4262_s28 + $0x310] sm:$0xff] }
 0x214   : > { %v597_v0 = vmul.f32 1.442695, %v589_v61  ;;  %v580_v1 = vmul.f32 %v3443_v52, %v569_v62  ;;  %vm593_vm3 = vcmp.gt.f32.partialorder %v589_v61, 0.0  ;;  %v850_v62 = vld [vmem:[%s4262_s28 + $0x320] sm:$0xff] }
 0x215   : > { %v4021_v2 = vpop.eup %4020  ;;  %v579_v3 = vmul.f32 %v3443_v52, %v568_v63  ;;  %v851_v63 = vld [vmem:[%s4262_s28 + $0x328] sm:$0xff] }
 0x216   : > { %4022 = vpow2.f32 %v597_v0  ;;  %v591_v4 = vadd.f32 %v3444_v56, %v580_v1  ;;  %v570_v47 = vmul.f32 %v4021_v2, %v4344_v60  ;;  %v852_v0 = vld [vmem:[%s4262_s28 + $0x330] sm:$0xff]  ;;  %v853_v1 = vld [vmem:[%s4262_s28 + $0x338] sm:$0xff]  ;;  %v854_v2 = vld [vmem:[%s4262_s28 + $0x340] sm:$0xff] }
 0x217   : > { %v590_v5 = vadd.f32 %v3444_v56, %v579_v3  ;;  %v855_v3 = vld [vmem:[%s4262_s28 + $0x348] sm:$0xff] }
 0x218   : > { %v601_v6 = vmul.f32 1.442695, %v591_v4  ;;  %v581_v7 = vmul.f32 %v3443_v52, %v570_v47  ;;  %vm595_vm4 = vcmp.gt.f32.partialorder %v591_v4, 0.0  ;;  %v843_v52 = vld [vmem:[%s4262_s28 + $0x2e8] sm:$0xff]  ;;  %v857_v47 = vld [vmem:[%s4262_s28 + $0x358] sm:$0xff] }
 0x219   : > { %v599_v8 = vmul.f32 1.442695, %v590_v5  ;;  %vm594_vm5 = vcmp.gt.f32.partialorder %v590_v5, 0.0 }
 0x21a   : > { %4024 = vpow2.f32 %v601_v6  ;;  %v592_v9 = vadd.f32 %v3444_v56, %v581_v7  ;;  %v845_v56 = vld [vmem:[%s4262_s28 + $0x2f8] sm:$0xff]  ;;  %v859_v6 = vld [vmem:[%s4262_s28 + $0x368] sm:$0xff]  ;;  %v860_v7 = vld [vmem:[%s4262_s28 + $0x370] sm:$0xff] }
 0x21b   : > { %4026 = vpow2.f32 %v599_v8  ;;  %v861_v8 = vld [vmem:[%s4262_s28 + $0x378] sm:$0xff] }
 0x21c   : > { %v603_v10 = vmul.f32 1.442695, %v592_v9  ;;  %vm596_vm6 = vcmp.gt.f32.partialorder %v592_v9, 0.0 }
 0x21e   : > { %4028 = vpow2.f32 %v603_v10  ;;  %v863_v10 = vld [vmem:[%s4262_s28 + $0x388] sm:$0xff] }
 0x223   : > { %v4023_v54 = vpop.eup %4022 }
 0x224   : > { %v3445_v11 = vadd.f32 -1.0, %v4023_v54  ;;  %v864_v54 = vld [vmem:[%s4262_s28 + $0x390] sm:$0xff] }
 0x226   : > { %v609_v53 = vsel %vm593_vm3, %v589_v61, %v3445_v11  ;;  %v849_v61 = vld [vmem:[%s4262_s28 + $0x318] sm:$0xff] }
 0x227   : > { %v4025_v12 = vpop.eup %4024  ;;  %3749 = vmatprep.mubr.msk.f32.mxu1 %vm517_vm1, %v609_v53  ;;  %v865_v11 = vld [vmem:[%s4262_s28 + $0x398] sm:$0xff]  ;;  %v866_v53 = vld [vmem:[%s4262_s28 + $0x3a0] sm:$0xff] }
 0x228   : > { %v4027_v13 = vpop.eup %4026  ;;  %v3447_v14 = vadd.f32 -1.0, %v4025_v12  ;;  %v867_v12 = vld [vmem:[%s4262_s28 + $0x3a8] sm:$0xff] }
 0x229   : > { %v3446_v60 = vadd.f32 -1.0, %v4027_v13  ;;  %v868_v13 = vld [vmem:[%s4262_s28 + $0x3b0] sm:$0xff] }
 0x22a   : > { %v611_v15 = vsel %vm595_vm4, %v591_v4, %v3447_v14  ;;  %v856_v4 = vld [vmem:[%s4262_s28 + $0x350] sm:$0xff]  ;;  %v869_v14 = vld [vmem:[%s4262_s28 + $0x3b8] sm:$0xff] }
 0x22b   : > { %v4029_v17 = vpop.eup %4028  ;;  %v610_v18 = vsel %vm594_vm5, %v590_v5, %v3446_v60  ;;  %v858_v5 = vld [vmem:[%s4262_s28 + $0x360] sm:$0xff] }
 0x22c   : > { %3750 = vmatmul.mubr.msk.f32.vlgmr.msra.gmra.mxu1 %vm517_vm1, %v610_v18  ;;  %v3448_v19 = vadd.f32 -1.0, %v4029_v17  ;;  %v870_v60 = vld [vmem:[%s4262_s28 + $0x3c0] sm:$0xff]  ;;  %v872_v17 = vld [vmem:[%s4262_s28 + $0x3d0] sm:$0xff]  ;;  %v873_v18 = vld [vmem:[%s4262_s28 + $0x3d8] sm:$0xff] }
 0x22d   : > { %3752 = vmatprep.mubr.msk.f32.mxu1 %vm517_vm1, %v611_v15  ;;  %3950 = vmatpush3.msra.mxu1 %v4267_v16  ;;  %v817_v16 = vld [vmem:[%s4262_s28 + $0x218] sm:$0xff]  ;;  %v871_v15 = vld [vmem:[%s4262_s28 + $0x3c8] sm:$0xff] }
 0x22e   : > { %v612_v20 = vsel %vm596_vm6, %v592_v9, %v3448_v19  ;;  %v862_v9 = vld [vmem:[%s4262_s28 + $0x380] sm:$0xff] }
 0x22f   : > { %v874_v19 = vld [vmem:[%s4262_s28 + $0x3e0] sm:$0xff] }
 0x230   : > { %3753 = vmatmul.mubr.msk.f32.gmra.mxu1 %vm517_vm1, %v612_v20  ;;  %v875_v20 = vld [vmem:[%s4262_s28 + $0x3e8] sm:$0xff] }
 0x231   : > { %3850 = vmatprep.mubr.msk.f32.mxu1 %vm879_vm2, %v812_v21  ;;  %v876_v21 = vld [vmem:[%s4262_s28 + $0x3f0] sm:$0xff] }
 0x234   : > { %3851 = vmatmul.mubr.msk.f32.vlgmr.msra.gmra.mxu1 %vm879_vm2, %v813_v22  ;;  %v877_v22 = vld [vmem:[%s4262_s28 + $0x3f8] sm:$0xff]  ;;  %s3286_s28 = sshll.u32 %s380_s15, 4  ;;  %s3287_s28 = int_to_ptr.vmem [resolvable:$true] %s3286_s28 }
 0x235   : > { %3853 = vmatprep.mubr.msk.f32.mxu1 %vm879_vm2, %v814_v23  ;;  %v4573_v23 = vpop.f32.mrf.mxu0  ;;  %s4035_s25 = scalar_lea.vmem %s3287_s28, 32 }
 0x236   : > { %p4036_p12 = scmp.ne.s32.totalorder %s3287_s28, %s4035_s25 }
 0x238   : > { %3854 = vmatmul.mubr.msk.f32.gmra.mxu1 %vm879_vm2, %v815_v24  ;;  %v4575_v24 = vpop.f32.mrf.mxu0  ;;  %p4037_p13 = pnand %p4036_p12, %p4207_p4 }
 0x239   : > { %3856 = vmatprep.mubr.msk.f32.mxu1 %vm879_vm2, %v816_v25 }
 0x23a   : > { %v4577_v25 = vpop.f32.mrf.mxu0  ;;  %p4038_p0 = pneg %p4037_p13 }
 0x23c   : > { %3857 = vmatmul.mubr.msk.f32.gmra.mxu1 %vm879_vm2, %v817_v16  ;;  %v4579_v16 = vpop.f32.mrf.mxu0 }
 0x23d   : > { %3859 = vmatprep.mubr.msk.f32.mxu1 %vm879_vm2, %v818_v26 }
 0x23e   : > { %v4581_v26 = vpop.f32.mrf.mxu0 }
 0x240   : > { %3860 = vmatmul.mubr.msk.f32.gmra.mxu1 %vm879_vm2, %v819_v27  ;;  %v4584_v27 = vpop.f32.mrf.mxu0 }
 0x241   : > { %3862 = vmatprep.mubr.msk.f32.mxu1 %vm879_vm2, %v820_v28  ;;  %v4113_v28 = vmov 1966171168  }
 0x244   : > { %3863 = vmatmul.mubr.msk.f32.gmra.mxu1 %vm879_vm2, %v821_v29  ;;  %v1975_v29 = vunpack.c.l.s4 %v4113_v28 }
 0x245   : > { %3865 = vmatprep.mubr.msk.f32.mxu1 %vm879_vm2, %v822_v30  ;;  %v1977_v30 = vlaneseq }
 0x248   : > { %3866 = vmatmul.mubr.msk.f32.gmra.mxu1 %vm879_vm2, %v823_v31 }
 0x249   : > { %3868 = vmatprep.mubr.msk.f32.mxu1 %vm879_vm2, %v824_v32  ;;  %v4593_v32 = vpop.f32.mrf.mxu0 }
 0x24c   : > { %3869 = vmatmul.mubr.msk.f32.gmra.mxu1 %vm879_vm2, %v825_v33  ;;  %v1976_v33 = vunpack.c.0.s8 %v1975_v29 }
 0x24d   : > { %3871 = vmatprep.mubr.msk.f32.mxu1 %vm879_vm2, %v826_v34  ;;  %v1978_v34 = vshrl.u32 %v1977_v30, 7 }
 0x250   : > { %3872 = vmatmul.mubr.msk.f32.gmra.mxu1 %vm879_vm2, %v827_v35 }
 0x251   : > { %3874 = vmatprep.mubr.msk.f32.mxu1 %vm879_vm2, %v828_v36 }
 0x254   : > { %3875 = vmatmul.mubr.msk.f32.gmra.mxu1 %vm879_vm2, %v829_v37  ;;  %v4599_v37 = vpop.f32.mrf.mxu0 }
 0x255   : > { %3877 = vmatprep.mubr.msk.f32.mxu1 %vm879_vm2, %v830_v38  ;;  %5978 = vst [vmem:[#allocation7_spill] sm:$0xff] %v4599_v37  ;;  %v4601_v38 = vsub.s32 %v1976_v33, %v1978_v34 }
 0x258   : > { %3878 = vmatmul.mubr.msk.f32.gmra.mxu1 %vm879_vm2, %v831_v39 }
 0x259   : > { %3880 = vmatprep.mubr.msk.f32.mxu1 %vm879_vm2, %v832_v40 }
 0x25c   : > { %3881 = vmatmul.mubr.msk.f32.gmra.mxu1 %vm879_vm2, %v833_v41 }
 0x25d   : > { %3883 = vmatprep.mubr.msk.f32.mxu1 %vm879_vm2, %v834_v42  ;;  %v4610_v42 = vpop.f32.mrf.mxu0 }
 0x25e   : > { %5979 = vst [vmem:[#allocation8_spill] sm:$0xff] %v4610_v42 }
 0x260   : > { %3884 = vmatmul.mubr.msk.f32.gmra.mxu1 %vm879_vm2, %v835_v43 }
 0x261   : > { %3886 = vmatprep.mubr.msk.f32.mxu1 %vm879_vm2, %v836_v44 }
 0x264   : > { %3887 = vmatmul.mubr.msk.f32.gmra.mxu1 %vm879_vm2, %v837_v45 }
 0x265   : > { %3889 = vmatprep.mubr.msk.f32.mxu1 %vm879_vm2, %v838_v46 }
 0x268   : > { %3890 = vmatmul.mubr.msk.f32.gmra.mxu1 %vm879_vm2, %v839_v48 }
 0x269   : > { %3892 = vmatprep.mubr.msk.f32.mxu1 %vm879_vm2, %v840_v49 }
 0x26c   : > { %3893 = vmatmul.mubr.msk.f32.gmra.mxu1 %vm879_vm2, %v841_v50 }
 0x26d   : > { %3895 = vmatprep.mubr.msk.f32.mxu1 %vm879_vm2, %v842_v51  ;;  %v4621_v51 = vpop.f32.mrf.mxu0 }
 0x26e   : > { %5982 = vst [vmem:[#allocation11_spill] sm:$0xff] %v4621_v51 }
 0x270   : > { %3896 = vmatmul.mubr.msk.f32.gmra.mxu1 %vm879_vm2, %v843_v52 }
 0x271   : > { %3898 = vmatprep.mubr.msk.f32.mxu1 %vm879_vm2, %v844_v55 }
 0x274   : > { %3899 = vmatmul.mubr.msk.f32.gmra.mxu1 %vm879_vm2, %v845_v56 }
 0x275   : > { %3901 = vmatprep.mubr.msk.f32.mxu1 %vm879_vm2, %v846_v57  ;;  %v4627_v57 = vsub.s32 0, %v1978_v34 }
 0x278   : > { %3902 = vmatmul.mubr.msk.f32.gmra.mxu1 %vm879_vm2, %v847_v58 }
 0x279   : > { %3904 = vmatprep.mubr.msk.f32.mxu1 %vm879_vm2, %v848_v59 }
 0x27c   : > { %3905 = vmatmul.mubr.msk.f32.gmra.mxu1 %vm879_vm2, %v849_v61 }
 0x27d   : > { %3907 = vmatprep.mubr.msk.f32.mxu1 %vm879_vm2, %v850_v62 }
 0x280   : > { %3908 = vmatmul.mubr.msk.f32.gmra.mxu1 %vm879_vm2, %v851_v63 }
 0x281   : > { %3910 = vmatprep.mubr.msk.f32.mxu1 %vm879_vm2, %v852_v0 }
 0x284   : > { %3911 = vmatmul.mubr.msk.f32.gmra.mxu1 %vm879_vm2, %v853_v1  ;;  %v4642_v1 = vpop.f32.mrf.mxu0 }
 0x285   : > { %3913 = vmatprep.mubr.msk.f32.mxu1 %vm879_vm2, %v854_v2 }
 0x288   : > { %3914 = vmatmul.mubr.msk.f32.gmra.mxu1 %vm879_vm2, %v855_v3 }
 0x289   : > { %3916 = vmatprep.mubr.msk.f32.mxu1 %vm879_vm2, %v856_v4 }
 0x28c   : > { %3917 = vmatmul.mubr.msk.f32.gmra.mxu1 %vm879_vm2, %v857_v47 }
 0x28d   : > { %3919 = vmatprep.mubr.msk.f32.mxu1 %vm879_vm2, %v858_v5 }
 0x290   : > { %3920 = vmatmul.mubr.msk.f32.gmra.mxu1 %vm879_vm2, %v859_v6  ;;  %v4652_v6 = vpop.f32.mrf.mxu0 }
 0x291   : > { %3922 = vmatprep.mubr.msk.f32.mxu1 %vm879_vm2, %v860_v7  ;;  %5987 = vst [vmem:[#allocation16_spill] sm:$0xff] %v4652_v6 }
 0x294   : > { %3923 = vmatmul.mubr.msk.f32.gmra.mxu1 %vm879_vm2, %v861_v8 }
 0x295   : > { %3925 = vmatprep.mubr.msk.f32.mxu1 %vm879_vm2, %v862_v9 }
 0x298   : > { %3926 = vmatmul.mubr.msk.f32.gmra.mxu1 %vm879_vm2, %v863_v10 }
 0x299   : > { %3928 = vmatprep.mubr.msk.f32.mxu1 %vm879_vm2, %v864_v54  ;;  %v4660_v54 = vpop.f32.mrf.mxu0 }
 0x29a   : > { %5989 = vst [vmem:[#allocation18_spill] sm:$0xff] %v4660_v54 }
 0x29c   : > { %3929 = vmatmul.mubr.msk.f32.gmra.mxu1 %vm879_vm2, %v865_v11 }
 0x29d   : > { %3931 = vmatprep.mubr.msk.f32.mxu1 %vm879_vm2, %v866_v53 }
 0x2a0   : > { %3932 = vmatmul.mubr.msk.f32.gmra.mxu1 %vm879_vm2, %v867_v12  ;;  %v4666_v12 = vpop.f32.mrf.mxu0 }
 0x2a1   : > { %3934 = vmatprep.mubr.msk.f32.mxu1 %vm879_vm2, %v868_v13  ;;  %5992 = vst [vmem:[#allocation21_spill] sm:$0xff] %v4666_v12 }
 0x2a4   : > { %3935 = vmatmul.mubr.msk.f32.gmra.mxu1 %vm879_vm2, %v869_v14 }
 0x2a5   : > { %3937 = vmatprep.mubr.msk.f32.mxu1 %vm879_vm2, %v870_v60  ;;  %v4670_v60 = vpop.f32.mrf.mxu0 }
 0x2a7   : > { %v4687_v29 = vpop.f32.mrf.mxu0 }
 0x2a8   : > { %3938 = vmatmul.mubr.msk.f32.gmra.mxu1 %vm879_vm2, %v871_v15  ;;  %5998 = vst [vmem:[#allocation27_spill] sm:$0xff] %v4687_v29 }
 0x2a9   : > { %3940 = vmatprep.mubr.msk.f32.mxu1 %vm879_vm2, %v872_v17 }
 0x2ac   : > { %3941 = vmatmul.mubr.msk.f32.gmra.mxu1 %vm879_vm2, %v873_v18 }
 0x2ad   : > { %3943 = vmatprep.mubr.msk.f32.mxu1 %vm879_vm2, %v874_v19 }
 0x2b0   : > { %3944 = vmatmul.mubr.msk.f32.gmra.mxu1 %vm879_vm2, %v875_v20 }
 0x2b1   : > { %3946 = vmatprep.mubr.msk.f32.mxu1 %vm879_vm2, %v876_v21 }
 0x2b4   : > { %3947 = vmatmul.mubr.msk.f32.gmra.mxu1 %vm879_vm2, %v877_v22 }
 0x2ec   : > { %v3751_v31 = vpop.f32.mrf.mxu1 }
 0x2ed   : > { %714 = vst.msk [vmem:[%s4591_s20 + $0x8] sm:$0xff] %vm712_vm7, %v3751_v31  ;;  %723 = vrot.lane.b32.xlu1 %v3751_v31, %s4114_s23 }
 0x2ee   : > { %v693_v35 = vpop.f32.mrf.mxu1 }
 0x2ef   : > { %713 = vst.msk [vmem:[%s4591_s20] sm:$0xff] %vm712_vm7, %v693_v35  ;;  %721 = vrot.lane.b32.xlu0 %v693_v35, %s4114_s23 }
 0x2f0   : > { %v3754_v36 = vpop.f32.mrf.mxu1 }
 0x2f1   : > { %716 = vst.msk [vmem:[%s4591_s20 + $0x18] sm:$0xff] %vm712_vm7, %v3754_v36 }
 0x2f2   : > { %v703_v39 = vpop.f32.mrf.mxu1 }
 0x2f3   : > { %715 = vst.msk [vmem:[%s4591_s20 + $0x10] sm:$0xff] %vm712_vm7, %v703_v39  ;;  %725 = vrot.lane.b32.xlu1 %v703_v39, %s4114_s23 }
 0x2f4   : > { %v743_v40 = vld [vmem:[%s4591_s20 + $0x8] sm:$0xff]  ;;  %v4608_v41 = vpop.f32.mrf.mxu1 }
 0x2f5   : > { %v2022_v43 = vcombine.high %v743_v40, %v743_v40  ;;  %v2029_v44 = vrot.slane %v743_v40, %v4601_v38  ;;  %v4696_v40 = vpop.f32.mrf.mxu0 }
 0x2f6   : > { %v4613_v45 = vpop.f32.mrf.mxu1  ;;  %6001 = vst [vmem:[#allocation30_spill] sm:$0xff] %v4696_v40  ;;  %v742_v51 = vld [vmem:[%s4591_s20] sm:$0xff] }
 0x2f7   : > { %5980 = vst [vmem:[#allocation9_spill] sm:$0xff] %v4613_v45  ;;  %v2036_v46 = vrot.slane %v2022_v43, %v4601_v38  ;;  %v2037_v48 = vcombine.high %v2029_v44, %v2029_v44  ;;  %v4617_v49 = vrot.slane %v2029_v44, %v4601_v38  ;;  %727 = vrot.lane.b32.xlu1 %v3754_v36, %s4114_s23  ;;  %s5886_s23 = scalar_lea.hbm %s5936_s9, %s3582_s16 }
 0x2f8   : > { %v4619_v50 = vpop.f32.mrf.mxu1  ;;  %v745_v31 = vld [vmem:[%s4591_s20 + $0x18] sm:$0xff] }
 0x2f9   : > { %5981 = vst [vmem:[#allocation10_spill] sm:$0xff] %v4619_v50  ;;  %v2052_v52 = vrot.slane %v2036_v46, %v4601_v38  ;;  %v2059_v55 = vrot.slane %v2037_v48, %v4601_v38  ;;  %v2067_v56 = vcombine.high %v4617_v49, %v4617_v49  ;;  %v2038_v3 = vcombine.high %v2036_v46, %v2036_v46 }
 0x2fa   : > { %v4629_v58 = vpop.f32.mrf.mxu1  ;;  %v744_v47 = vld [vmem:[%s4591_s20 + $0x10] sm:$0xff]  ;;  %v2127_v43 = vrot.slane %v745_v31, %v4601_v38  ;;  %v2120_v44 = vcombine.high %v745_v31, %v745_v31 }
 0x2fb   : > { %5983 = vst [vmem:[#allocation12_spill] sm:$0xff] %v4629_v58  ;;  %v2069_v59 = vcombine.high %v2059_v55, %v2059_v55  ;;  %v4632_v61 = vrot.slane %v2059_v55, %v4627_v57  ;;  %v4635_v62 = vrot.slane %v2067_v56, %v4627_v57  ;;  %v4638_v63 = vrot.slane %v2052_v52, %v4627_v57 }
 0x2fc   : > { %v4640_v0 = vpop.f32.mrf.mxu1  ;;  %v2066_v7 = vrot.slane %v2038_v3, %v4601_v38  ;;  %v2078_v8 = vrot.slane %v744_v47, %v4601_v38  ;;  %v2068_v13 = vcombine.high %v2052_v52, %v2052_v52  ;;  %v2071_v39 = vcombine.high %v744_v47, %v744_v47  ;;  %v4710_v47 = vpop.f32.mrf.mxu0 }
 0x2fd   : > { %5984 = vst [vmem:[#allocation13_spill] sm:$0xff] %v4635_v62  ;;  %v4645_v2 = vrot.slane %v2069_v59, %v4627_v57  ;;  %v2143_v55 = vrot.slane %v2127_v43, %v4601_v38  ;;  %v2135_v59 = vcombine.high %v2127_v43, %v2127_v43  ;;  %v2134_v3 = vrot.slane %v2120_v44, %v4601_v38 }
 0x2fe   : > { %v4647_v4 = vpop.f32.mrf.mxu1  ;;  %v4673_v15 = vrot.slane %v2066_v7, %v4627_v57  ;;  %v2070_v17 = vcombine.high %v2066_v7, %v2066_v7  ;;  %v4676_v18 = vrot.slane %v2068_v13, %v4627_v57  ;;  %v2094_v19 = vrot.slane %v2078_v8, %v4601_v38  ;;  %6005 = vst [vmem:[#allocation34_spill] sm:$0xff] %v4710_v47 }
 0x2ff   : > { %5985 = vst [vmem:[#allocation14_spill] sm:$0xff] %v4647_v4  ;;  %v2086_v20 = vcombine.high %v2078_v8, %v2078_v8  ;;  %v2085_v52 = vrot.slane %v2071_v39, %v4601_v38  ;;  %v4714_v13 = vrot.slane %v2143_v55, %v4627_v57  ;;  %v2136_v31 = vcombine.high %v2134_v3, %v2134_v3 }
 0x300   : > { %v4650_v5 = vpop.f32.mrf.mxu1  ;;  %5994 = vst [vmem:[#allocation23_spill] sm:$0xff] %v4673_v15  ;;  %5995 = vst [vmem:[#allocation24_spill] sm:$0xff] %v4676_v18  ;;  %v4680_v21 = vrot.slane %v2070_v17, %v4627_v57  ;;  %v4683_v22 = vrot.slane %v2094_v19, %v4627_v57  ;;  %v2116_v34 = vcombine.high %v2094_v19, %v2094_v19 }
 0x301   : > { %5986 = vst [vmem:[#allocation15_spill] sm:$0xff] %v4650_v5  ;;  %v2108_v30 = vrot.slane %v2086_v20, %v4601_v38  ;;  %v2101_v7 = vrot.slane %v2085_v52, %v4601_v38  ;;  %v2087_v8 = vcombine.high %v2085_v52, %v2085_v52  ;;  %6006 = vst [vmem:[#allocation35_spill] sm:$0xff] %v4714_v13 }
 0x302   : > { %v4656_v9 = vpop.f32.mrf.mxu1  ;;  %5996 = vst [vmem:[#allocation25_spill] sm:$0xff] %v4680_v21  ;;  %5997 = vst [vmem:[#allocation26_spill] sm:$0xff] %v4683_v22  ;;  %v4700_v46 = vrot.slane %v2116_v34, %v4627_v57  ;;  %v2157_v17 = vrot.slane %v2135_v59, %v4601_v38  ;;  %v2165_v20 = vcombine.high %v2143_v55, %v2143_v55  ;;  %v4720_v34 = vpop.f32.mrf.mxu0 }
 0x303   : > { %5988 = vst [vmem:[#allocation17_spill] sm:$0xff] %v4656_v9  ;;  %v4692_v33 = vrot.slane %v2108_v30, %v4627_v57  ;;  %v2118_v36 = vcombine.high %v2108_v30, %v2108_v30  ;;  %v2150_v30 = vrot.slane %v2134_v3, %v4601_v38  ;;  %v2115_v39 = vrot.slane %v2087_v8, %v4601_v38 }
 0x304   : > { %v4658_v10 = vpop.f32.mrf.mxu1  ;;  %6002 = vst [vmem:[#allocation31_spill] sm:$0xff] %v4700_v46  ;;  %v2117_v43 = vcombine.high %v2101_v7, %v2101_v7  ;;  %v4727_v44 = vrot.slane %v2157_v17, %v4627_v57  ;;  %v4730_v52 = vrot.slane %v2165_v20, %v4627_v57  ;;  %v2167_v59 = vcombine.high %v2157_v17, %v2157_v17  ;;  %v4747_v20 = vpop.f32.mrf.mxu0 }
 0x305   : > { %5999 = vst [vmem:[#allocation28_spill] sm:$0xff] %v4692_v33  ;;  %v4703_v48 = vrot.slane %v2118_v36, %v4627_v57  ;;  %v4723_v36 = vrot.slane %v2101_v7, %v4627_v57  ;;  %v4733_v55 = vrot.slane %v2150_v30, %v4627_v57  ;;  %v2164_v3 = vrot.slane %v2136_v31, %v4601_v38 }
 0x306   : > { %v4662_v11 = vpop.f32.mrf.mxu1  ;;  %6009 = vst [vmem:[#allocation38_spill] sm:$0xff] %v4727_v44  ;;  %6010 = vst [vmem:[#allocation39_spill] sm:$0xff] %v4730_v52  ;;  %v4742_v8 = vrot.slane %v2117_v43, %v4627_v57  ;;  %v2119_v7 = vcombine.high %v2115_v39, %v2115_v39 }
 0x307   : > { %5990 = vst [vmem:[#allocation19_spill] sm:$0xff] %v4662_v11  ;;  %6003 = vst [vmem:[#allocation32_spill] sm:$0xff] %v4703_v48  ;;  %v4750_v17 = vrot.slane %v2164_v3, %v4627_v57 }
 0x308   : > { %v4664_v53 = vpop.f32.mrf.mxu1  ;;  %6008 = vst [vmem:[#allocation37_spill] sm:$0xff] %v4723_v36  ;;  %6011 = vst [vmem:[#allocation40_spill] sm:$0xff] %v4733_v55  ;;  %v4753_v31 = vrot.slane %v2119_v7, %v4627_v57 }
 0x309   : > { %5991 = vst [vmem:[#allocation20_spill] sm:$0xff] %v4664_v53  ;;  %6014 = vst [vmem:[#allocation43_spill] sm:$0xff] %v4747_v20  ;;  %v2166_v53 = vcombine.high %v2150_v30, %v2150_v30 }
 0x30a   : > { %v4668_v14 = vpop.f32.mrf.mxu1  ;;  %6015 = vst [vmem:[#allocation44_spill] sm:$0xff] %v4750_v17  ;;  %6016 = vst [vmem:[#allocation45_spill] sm:$0xff] %v4753_v31 }
 0x30b   : > { %5993 = vst [vmem:[#allocation22_spill] sm:$0xff] %v4668_v14  ;;  %v2168_v14 = vcombine.high %v2164_v3, %v2164_v3  ;;  %v4756_v11 = vrot.slane %v2166_v53, %v4627_v57 }
 0x30c   : > { %v4685_v28 = vpop.f32.mrf.mxu1 }
 0x30d   : > { %6017 = vst [vmem:[#allocation46_spill] sm:$0xff] %v4756_v11  ;;  %v4759_v43 = vrot.slane %v2168_v14, %v4627_v57 }
 0x30e   : > { %v4694_v35 = vpop.f32.mrf.mxu1 }
 0x30f   : > { %6000 = vst [vmem:[#allocation29_spill] sm:$0xff] %v4694_v35  ;;  %v4745_v35 = vrot.slane %v2167_v59, %v4627_v57  ;;  %6018 = vst [vmem:[#allocation47_spill] sm:$0xff] %v4759_v43  ;;  %v4763_v59 = vpop.f32.mrf.mxu0 }
 0x310   : > { %v4707_v56 = vpop.f32.mrf.mxu1  ;;  %6020 = vst [vmem:[#allocation49_spill] sm:$0xff] %v4763_v59 }
 0x311   : > { %6004 = vst [vmem:[#allocation33_spill] sm:$0xff] %v4707_v56  ;;  %6013 = vst [vmem:[#allocation42_spill] sm:$0xff] %v4745_v35  ;;  %v4767_v9 = vpop.f32.mrf.mxu0 }
 0x312   : > { %v4717_v19 = vpop.f32.mrf.mxu1  ;;  %6022 = vst [vmem:[#allocation51_spill] sm:$0xff] %v4767_v9 }
 0x313   : > { %6007 = vst [vmem:[#allocation36_spill] sm:$0xff] %v4717_v19  ;;  %v4739_v19 = vrot.slane %v2115_v39, %v4627_v57  ;;  %v4771_v30 = vpop.f32.mrf.mxu0 }
 0x314   : > { %v4736_v56 = vpop.f32.mrf.mxu1 }
 0x315   : > { %6012 = vst [vmem:[#allocation41_spill] sm:$0xff] %v4739_v19  ;;  %v4775_v7 = vpop.f32.mrf.mxu0 }
 0x316   : > { %v4761_v39 = vpop.f32.mrf.mxu1  ;;  %6024 = vst [vmem:[#allocation53_spill] sm:$0xff] %v4775_v7 }
 0x317   : > { %6019 = vst [vmem:[#allocation48_spill] sm:$0xff] %v4761_v39  ;;  %v4779_v14 = vpop.f32.mrf.mxu0 }
 0x318   : > { %v4765_v5 = vpop.f32.mrf.mxu1  ;;  %6026 = vst [vmem:[#allocation55_spill] sm:$0xff] %v4779_v14 }
 0x319   : > { %6021 = vst [vmem:[#allocation50_spill] sm:$0xff] %v4765_v5  ;;  %v4783_v39 = vpop.f32.mrf.mxu0 }
 0x31a   : > { %v4769_v4 = vpop.f32.mrf.mxu1  ;;  %6028 = vst [vmem:[#allocation57_spill] sm:$0xff] %v4783_v39 }
 0x31b   : > { %6023 = vst [vmem:[#allocation52_spill] sm:$0xff] %v4769_v4  ;;  %v4787_v5 = vpop.f32.mrf.mxu0 }
 0x31c   : > { %v4773_v3 = vpop.f32.mrf.mxu1 }
 0x31d   : > { %v4791_v45 = vpop.f32.mrf.mxu0 }
 0x31e   : > { %v4777_v53 = vpop.f32.mrf.mxu1  ;;  %6030 = vst [vmem:[#allocation59_spill] sm:$0xff] %v4791_v45 }
 0x31f   : > { %6025 = vst [vmem:[#allocation54_spill] sm:$0xff] %v4777_v53  ;;  %v4795_v7 = vpop.f32.mrf.mxu0 }
 0x320   : > { %v4781_v50 = vpop.f32.mrf.mxu1  ;;  %6032 = vst [vmem:[#allocation61_spill] sm:$0xff] %v4795_v7 }
 0x321   : > { %6027 = vst [vmem:[#allocation56_spill] sm:$0xff] %v4781_v50  ;;  %v4799_v14 = vpop.f32.mrf.mxu0 }
 0x322   : > { %v4785_v58 = vpop.f32.mrf.mxu1  ;;  %6034 = vst [vmem:[#allocation63_spill] sm:$0xff] %v4799_v14 }
 0x323   : > { %6029 = vst [vmem:[#allocation58_spill] sm:$0xff] %v4785_v58  ;;  %v4803_v39 = vpop.f32.mrf.mxu0 }
 0x324   : > { %v4789_v4 = vpop.f32.mrf.mxu1 }
 0x325   : > { %v4807_v11 = vpop.f32.mrf.mxu0 }
 0x326   : > { %v4793_v43 = vpop.f32.mrf.mxu1  ;;  %6036 = vst [vmem:[#allocation65_spill] sm:$0xff] %v4807_v11 }
 0x327   : > { %6031 = vst [vmem:[#allocation60_spill] sm:$0xff] %v4793_v43  ;;  %v4811_v9 = vpop.f32.mrf.mxu0 }
 0x328   : > { %v4797_v53 = vpop.f32.mrf.mxu1  ;;  %6038 = vst [vmem:[#allocation67_spill] sm:$0xff] %v4811_v9 }
 0x329   : > { %6033 = vst [vmem:[#allocation62_spill] sm:$0xff] %v4797_v53  ;;  %v4815_v43 = vpop.f32.mrf.mxu0 }
 0x32a   : > { %v4801_v50 = vpop.f32.mrf.mxu1  ;;  %6040 = vst [vmem:[#allocation69_spill] sm:$0xff] %v4815_v43 }
 0x32b   : > { %6035 = vst [vmem:[#allocation64_spill] sm:$0xff] %v4801_v50  ;;  %v4826_v53 = vpop.f32.mrf.mxu0 }
 0x32c   : > { %v4805_v58 = vpop.f32.mrf.mxu1 }
 0x32e   : > { %v4809_v59 = vpop.f32.mrf.mxu1 }
 0x32f   : > { %6037 = vst [vmem:[#allocation66_spill] sm:$0xff] %v4809_v59 }
 0x330   : > { %v4813_v45 = vpop.f32.mrf.mxu1 }
 0x331   : > { %6039 = vst [vmem:[#allocation68_spill] sm:$0xff] %v4813_v45  ;;  %v4832_v45 = vpop.f32.mrf.mxu0 }
 0x332   : > { %v4817_v7 = vpop.f32.mrf.mxu1  ;;  %6042 = vst [vmem:[#allocation71_spill] sm:$0xff] %v4832_v45 }
 0x333   : > { %6041 = vst [vmem:[#allocation70_spill] sm:$0xff] %v4817_v7  ;;  %v4838_v43 = vpop.f32.mrf.mxu0 }
 0x334   : > { %v4828_v50 = vpop.f32.mrf.mxu1  ;;  %6044 = vst [vmem:[#allocation73_spill] sm:$0xff] %v4838_v43 }
 0x335   : > { %v4844_v20 = vpop.f32.mrf.mxu0 }
 0x336   : > { %v4836_v9 = vpop.f32.mrf.mxu1  ;;  %6046 = vst [vmem:[#allocation75_spill] sm:$0xff] %v4844_v20 }
 0x337   : > { %6043 = vst [vmem:[#allocation72_spill] sm:$0xff] %v4836_v9  ;;  %v3816_v45 = vpop.f32.mrf.mxu0 }
 0x338   : > { %v4842_v14 = vpop.f32.mrf.mxu1 }
 0x339   : > { %6045 = vst [vmem:[#allocation74_spill] sm:$0xff] %v4842_v14 }
 0x35f   : > { %v724_v59 = vpop.permute.xlu1 %723 }
 0x360   : > { %734 = vst.msk [vmem:[%s4824_s26 + $0x8] sm:$0xff] %vm712_vm7, %v724_v59  ;;  %v4848_v59 = vpop.f32.mrf.mxu1 }
 0x361   : > { %v722_v7 = vpop.permute.xlu0 %721  ;;  %6047 = vst [vmem:[#allocation76_spill] sm:$0xff] %v4848_v59 }
 0x362   : > { %733 = vst.msk [vmem:[%s4824_s26] sm:$0xff] %vm712_vm7, %v722_v7  ;;  %v4850_v47 = vpop.f32.mrf.mxu1  ;;  %v4852_v7 = vpop.f32.mrf.mxu0 }
 0x363   : > { %6048 = vst [vmem:[#allocation77_spill] sm:$0xff] %v4852_v7 }
 0x364   : > { %v4854_v9 = vpop.f32.mrf.mxu1  ;;  %v4856_v43 = vpop.f32.mrf.mxu0 }
 0x365   : > { %v726_v11 = vpop.permute.xlu1 %725  ;;  %6049 = vst [vmem:[#allocation78_spill] sm:$0xff] %v4854_v9  ;;  %6050 = vst [vmem:[#allocation79_spill] sm:$0xff] %v4856_v43 }
 0x366   : > { %735 = vst.msk [vmem:[%s4824_s26 + $0x10] sm:$0xff] %vm712_vm7, %v726_v11  ;;  %v4858_v29 = vpop.f32.mrf.mxu1  ;;  %v4860_v11 = vpop.f32.mrf.mxu0 }
 0x367   : > { %6051 = vst [vmem:[#allocation80_spill] sm:$0xff] %v4858_v29  ;;  %6052 = vst [vmem:[#allocation81_spill] sm:$0xff] %v4860_v11 }
 0x368   : > { %v4862_v14 = vpop.f32.mrf.mxu1  ;;  %v3822_v20 = vpop.f32.mrf.mxu0 }
 0x369   : > { %v728_v40 = vpop.permute.xlu1 %727  ;;  %6053 = vst [vmem:[#allocation82_spill] sm:$0xff] %v4862_v14 }
 0x36a   : > { %736 = vst.msk [vmem:[%s4824_s26 + $0x18] sm:$0xff] %vm712_vm7, %v728_v40  ;;  %v4864_v54 = vpop.f32.mrf.mxu1  ;;  %v4866_v40 = vpop.f32.mrf.mxu0 }
 0x36b   : > { %6054 = vst [vmem:[#allocation83_spill] sm:$0xff] %v4864_v54  ;;  %6055 = vst [vmem:[#allocation84_spill] sm:$0xff] %v4866_v40 }
 0x36c   : > { %v4868_v59 = vpop.f32.mrf.mxu1  ;;  %v4870_v12 = vpop.f32.mrf.mxu0 }
 0x36d   : > { %6056 = vst [vmem:[#allocation85_spill] sm:$0xff] %v4868_v59  ;;  %6057 = vst [vmem:[#allocation86_spill] sm:$0xff] %v4870_v12 }
 0x36e   : > { %v4872_v7 = vpop.f32.mrf.mxu1  ;;  %v4874_v9 = vpop.f32.mrf.mxu0 }
 0x36f   : > { %6058 = vst [vmem:[#allocation87_spill] sm:$0xff] %v4872_v7  ;;  %6059 = vst [vmem:[#allocation88_spill] sm:$0xff] %v4874_v9 }
 0x370   : > { %v4876_v43 = vpop.f32.mrf.mxu1  ;;  %v3828_v29 = vpop.f32.mrf.mxu0 }
 0x371   : > { %6060 = vst [vmem:[#allocation89_spill] sm:$0xff] %v4876_v43 }
 0x372   : > { %v4878_v11 = vpop.f32.mrf.mxu1  ;;  %v4880_v14 = vpop.f32.mrf.mxu0 }
 0x373   : > { %6061 = vst [vmem:[#allocation90_spill] sm:$0xff] %v4878_v11  ;;  %6062 = vst [vmem:[#allocation91_spill] sm:$0xff] %v4880_v14  ;;  %v1973_v14 = vcombine.high %v742_v51, %v742_v51 }
 0x374   : > { %v4882_v6 = vpop.f32.mrf.mxu1  ;;  %v4884_v42 = vpop.f32.mrf.mxu0 }
 0x375   : > { %6063 = vst [vmem:[#allocation92_spill] sm:$0xff] %v4882_v6  ;;  %6064 = vst [vmem:[#allocation93_spill] sm:$0xff] %v4884_v42  ;;  %v1980_v6 = vrot.slane %v742_v51, %v4601_v38 }
 0x376   : > { %v4886_v40 = vpop.f32.mrf.mxu1  ;;  %v4888_v59 = vpop.f32.mrf.mxu0 }
 0x377   : > { %6065 = vst [vmem:[#allocation94_spill] sm:$0xff] %v4886_v40  ;;  %6066 = vst [vmem:[#allocation95_spill] sm:$0xff] %v4888_v59  ;;  %v1987_v40 = vrot.slane %v1973_v14, %v4601_v38  ;;  %v4921_v14 = vrot.slane %v4617_v49, %v4627_v57  ;;  %v4936_v49 = vadd.f32 %v3816_v45, %v4632_v61 }
 0x378   : > { %v4890_v12 = vpop.f32.mrf.mxu1  ;;  %v4892_v7 = vpop.f32.mrf.mxu0 }
 0x379   : > { %6067 = vst [vmem:[#allocation96_spill] sm:$0xff] %v4890_v12  ;;  %v1988_v12 = vcombine.high %v1980_v6, %v1980_v6 }
 0x37a   : > { %v4894_v9 = vpop.f32.mrf.mxu1  ;;  %v4896_v43 = vpop.f32.mrf.mxu0 }
 0x37b   : > { %6068 = vst [vmem:[#allocation97_spill] sm:$0xff] %v4894_v9  ;;  %6069 = vst [vmem:[#allocation98_spill] sm:$0xff] %v4896_v43  ;;  %v1989_v9 = vcombine.high %v1987_v40, %v1987_v40  ;;  %v1996_v43 = vrot.slane %v1980_v6, %v4601_v38 }
 0x37c   : > { %v4899_v37 = vpop.f32.mrf.mxu1  ;;  %v4901_v17 = vpop.f32.mrf.mxu0 }
 0x37d   : > { %6070 = vst [vmem:[#allocation99_spill] sm:$0xff] %v4899_v37  ;;  %6071 = vst [vmem:[#allocation100_spill] sm:$0xff] %v4901_v17  ;;  %v2010_v37 = vrot.slane %v1988_v12, %v4601_v38  ;;  %v2003_v17 = vrot.slane %v1987_v40, %v4601_v38  ;;  %v2017_v51 = vrot.slane %v1989_v9, %v4601_v38 }
 0x37e   : > { %v4904_v42 = vpop.f32.mrf.mxu1  ;;  %v4907_v59 = vpop.f32.mrf.mxu0  ;;  %v4930_v38 = vadd.f32 %v4826_v53, %v4921_v14  ;;  %v2372_v53 = vadd.f32 %v3822_v20, %v4635_v62 }
 0x37f   : > { %6072 = vst [vmem:[#allocation101_spill] sm:$0xff] %v4904_v42  ;;  %6073 = vst [vmem:[#allocation102_spill] sm:$0xff] %v4907_v59  ;;  %v2018_v59 = vcombine.high %v1996_v43, %v1996_v43  ;;  %v2019_v54 = vcombine.high %v2003_v17, %v2003_v17  ;;  %v2021_v6 = vcombine.high %v2017_v51, %v2017_v51 }
 0x380   : > { %v4909_v55 = vpop.f32.mrf.mxu1  ;;  %v3840_v35 = vpop.f32.mrf.mxu0  ;;  %v4933_v9 = vrot.slane %v2010_v37, %v4627_v57 }
 0x381   : > { %6074 = vst [vmem:[#allocation103_spill] sm:$0xff] %v4909_v55  ;;  %v2020_v55 = vcombine.high %v2010_v37, %v2010_v37  ;;  %v4939_v40 = vrot.slane %v2018_v59, %v4627_v57  ;;  %v4951_v37 = vrot.slane %v2017_v51, %v4627_v57  ;;  %v4954_v45 = vrot.slane %v2019_v54, %v4627_v57 }
 0x382   : > { %v4913_v11 = vpop.f32.mrf.mxu1  ;;  %v4917_v42 = vpop.f32.mrf.mxu0  ;;  %v4957_v59 = vrot.slane %v2021_v6, %v4627_v57  ;;  %v2333_v54 = vadd.f32 %v4933_v9, %v4584_v27  ;;  %v2336_v6 = vadd.f32 %v4593_v32, %v4933_v9 }
 0x383   : > { %6075 = vst [vmem:[#allocation104_spill] sm:$0xff] %v4913_v11  ;;  %6076 = vst [vmem:[#allocation105_spill] sm:$0xff] %v4917_v42  ;;  %v2172_v11 = vrot.slane %v1996_v43, %v4627_v57  ;;  %v2352_v32 = vadd.f32 %v4771_v30, %v4951_v37 }
 0x384   : > { %v4923_v52 = vpop.f32.mrf.mxu1  ;;  %v4925_v12 = vpop.f32.mrf.mxu0 }
 0x385   : > { %6077 = vst [vmem:[#allocation106_spill] sm:$0xff] %v4923_v52  ;;  %6078 = vst [vmem:[#allocation107_spill] sm:$0xff] %v4925_v12  ;;  %v4942_v52 = vrot.slane %v2020_v55, %v4627_v57  ;;  %v4945_v12 = vrot.slane %v2003_v17, %v4627_v57  ;;  %v4962_v55 = vld [vmem:[%s4824_s26] sm:$0xff]  ;;  %v2376_v17 = vadd.f32 %v3828_v29, %v4645_v2 }
 0x386   : > { %v4947_v43 = vpop.f32.mrf.mxu1  ;;  %v4959_v42 = vpop.f32.mrf.mxu0  ;;  %v2330_v20 = vadd.f32 %v4573_v23, %v2172_v11  ;;  %v2331_v51 = vadd.f32 %v2172_v11, %v4579_v16  ;;  %v2332_v62 = vadd.f32 %v4577_v25, %v2172_v11  ;;  %v4973_v57 = vadd.f32 %v4581_v26, %v4933_v9  ;;  %v4992_v26 = vld [vmem:[%s4824_s26 + $0x10] sm:$0xff] }
 0x387   : > { %6079 = vst [vmem:[#allocation108_spill] sm:$0xff] %v4947_v43  ;;  %6080 = vst [vmem:[#allocation109_spill] sm:$0xff] %v4959_v42  ;;  %v2329_v43 = vadd.f32 %v2172_v11, %v4575_v24  ;;  %v4978_v42 = vld [vmem:[%s4824_s26 + $0x8] sm:$0xff]  ;;  %v2340_v24 = vadd.f32 %v4642_v1, %v4939_v40  ;;  %v2344_v23 = vadd.f32 %v4670_v60, %v4942_v52 }
 0x388   : > { %v2348_v25 = vadd.f32 %v4720_v34, %v4945_v12  ;;  %v4989_v27 = vpop.f32.mrf.mxu1  ;;  %v2356_v29 = vadd.f32 %v4787_v5, %v4954_v45  ;;  %v2360_v1 = vadd.f32 %v4803_v39, %v4957_v59  ;;  %v2384_v60 = vadd.f32 %v3840_v35, %v4673_v15  ;;  %v3846_v11 = vpop.f32.mrf.mxu0 }
 0x389   : > { %v4987_v16 = vadd.f32 %v2329_v43, %v4962_v55  ;;  %6081 = vst [vmem:[#allocation110_spill] sm:$0xff] %v4989_v27  ;;  %v2392_v34 = vadd.f32 %v4608_v41, %v4680_v21  ;;  %v2388_v43 = vadd.f32 %v3846_v11, %v4676_v18  ;;  %v2380_v27 = vadd.f32 %v4892_v7, %v4638_v63  ;;  %v6087_v18 = vld [vmem:[#allocation40_spill] sm:$0xff] }
 0x38a   : > { %v5007_v30 = vadd.f32 %v2330_v20, %v4978_v42  ;;  %v2396_v5 = vadd.f32 %v4640_v0, %v4683_v22  ;;  %v2400_v39 = vadd.f32 %v4658_v10, %v4692_v33  ;;  %v2404_v35 = vadd.f32 %v4685_v28, %v4700_v46  ;;  %v3936_v22 = vpop.f32.mrf.mxu1  ;;  %v6085_v46 = vld [vmem:[#allocation42_spill] sm:$0xff]  ;;  %v6086_v33 = vld [vmem:[#allocation97_spill] sm:$0xff]  ;;  %v6088_v15 = vld [vmem:[#allocation104_spill] sm:$0xff] }
 0x38b   : > { %v5016_v41 = vadd.f32 %v2331_v51, %v4992_v26  ;;  %v2408_v11 = vadd.f32 %v4736_v56, %v4703_v48  ;;  %v2412_v7 = vadd.f32 %v4773_v3, %v4723_v36  ;;  %v2416_v20 = vadd.f32 %v4789_v4, %v4739_v19  ;;  %v6082_v56 = vld [vmem:[#allocation83_spill] sm:$0xff]  ;;  %v5035_v3 = vld [vmem:[%s4824_s26 + $0x18] sm:$0xff] }
 0x38c   : > { %v2587_v0 = vsel %vm712_vm7, %v4987_v16, 0.0  ;;  %v2420_v10 = vadd.f32 %v4805_v58, %v4742_v8  ;;  %v2424_v28 = vadd.f32 %v4828_v50, %v4753_v31  ;;  %v2428_v51 = vadd.f32 %v4850_v47, %v4714_v13  ;;  %v6083_v36 = vld [vmem:[#allocation39_spill] sm:$0xff]  ;;  %v6084_v4 = vld [vmem:[#allocation90_spill] sm:$0xff]  ;;  %v6089_v47 = vld [vmem:[#allocation44_spill] sm:$0xff] }
 0x38d   : > { %v2432_v48 = vadd.f32 %v6082_v56, %v4727_v44  ;;  %v2436_v19 = vadd.f32 %v6084_v4, %v6083_v36  ;;  %v2440_v21 = vadd.f32 %v6086_v33, %v6085_v46  ;;  %v2444_v58 = vadd.f32 %v6088_v15, %v6087_v18  ;;  %v6107_v36 = vld [vmem:[#allocation27_spill] sm:$0xff] }
 0x38e   : > { %v2588_v50 = vsel %vm712_vm7, %v5007_v30, 0.0  ;;  %v5046_v31 = vadd.f32 %v2333_v54, %v4962_v55  ;;  %v2448_v13 = vadd.f32 %v3936_v22, %v6089_v47  ;;  %v2590_v44 = vsel %vm712_vm7, %v5016_v41, 0.0 }
 0x38f   : > { %v2589_v56 = vadd.f32 %v2588_v50, %v2587_v0  ;;  %v5052_v4 = vadd.f32 %v2332_v62, %v5035_v3  ;;  %v5055_v33 = vadd.f32 %v2336_v6, %v5035_v3  ;;  %v5058_v15 = vadd.f32 %v2340_v24, %v5035_v3 }
 0x390   : > { %v5061_v18 = vadd.f32 %v2344_v23, %v5035_v3  ;;  %v5064_v54 = vadd.f32 %v2348_v25, %v5035_v3  ;;  %v5067_v22 = vadd.f32 %v2352_v32, %v5035_v3  ;;  %v5070_v0 = vadd.f32 %v2356_v29, %v5035_v3 }
 0x391   : > { %v5073_v62 = vadd.f32 %v2360_v1, %v5035_v3  ;;  %v5077_v6 = vadd.f32 %v4930_v38, %v5035_v3  ;;  %v5081_v24 = vadd.f32 %v4936_v49, %v5035_v3  ;;  %v5084_v23 = vadd.f32 %v2372_v53, %v5035_v3 }
 0x392   : > { %v5087_v25 = vadd.f32 %v2376_v17, %v5035_v3  ;;  %v5090_v32 = vadd.f32 %v2380_v27, %v5035_v3  ;;  %v5093_v29 = vadd.f32 %v2384_v60, %v5035_v3  ;;  %v5096_v1 = vadd.f32 %v2388_v43, %v5035_v3 }
 0x393   : > { %v5099_v38 = vadd.f32 %v2392_v34, %v5035_v3  ;;  %v5102_v49 = vadd.f32 %v2396_v5, %v5035_v3  ;;  %v5105_v53 = vadd.f32 %v2400_v39, %v5035_v3  ;;  %v5108_v17 = vadd.f32 %v2404_v35, %v5035_v3  ;;  %v5125_v39 = vpop.f32.mrf.mxu1 }
 0x394   : > { %v5111_v27 = vadd.f32 %v2408_v11, %v5035_v3  ;;  %v5114_v60 = vadd.f32 %v2412_v7, %v5035_v3  ;;  %v5117_v43 = vadd.f32 %v2416_v20, %v5035_v3  ;;  %v5120_v34 = vadd.f32 %v2420_v10, %v5035_v3  ;;  %6091 = vst [vmem:[#allocation90_spill] sm:$0xff] %v5125_v39  ;;  %v6098_v39 = vld [vmem:[#allocation7_spill] sm:$0xff] }
 0x395   : > { %v5123_v5 = vadd.f32 %v2424_v28, %v5035_v3  ;;  %v5128_v35 = vadd.f32 %v2428_v51, %v5035_v3  ;;  %v5131_v11 = vadd.f32 %v2432_v48, %v5035_v3  ;;  %v5134_v7 = vadd.f32 %v2436_v19, %v5035_v3 }
 0x396   : > { %v5137_v20 = vadd.f32 %v2440_v21, %v5035_v3  ;;  %v2591_v50 = vadd.f32 %v2590_v44, %v2589_v56  ;;  %v5140_v10 = vadd.f32 %v2444_v58, %v5035_v3  ;;  %v5143_v28 = vadd.f32 %v2448_v13, %v5035_v3  ;;  %v5154_v58 = vpop.f32.mrf.mxu1  ;;  %v6100_v13 = vld [vmem:[#allocation11_spill] sm:$0xff] }
 0x397   : > { %6090 = vst [vmem:[#allocation83_spill] sm:$0xff] %v5123_v5  ;;  %6092 = vst [vmem:[#allocation97_spill] sm:$0xff] %v5128_v35  ;;  %v2335_v51 = vadd.f32 %v4933_v9, %v6098_v39  ;;  %v2462_v48 = vadd.f32 %v4973_v57, %v4978_v42  ;;  %v2592_v19 = vsel %vm712_vm7, %v5052_v4, 0.0  ;;  %v2594_v21 = vsel %vm712_vm7, %v5046_v31, 0.0  ;;  %v6101_v57 = vld [vmem:[#allocation8_spill] sm:$0xff] }
 0x398   : > { %6093 = vst [vmem:[#allocation104_spill] sm:$0xff] %v5131_v11  ;;  %6094 = vst [vmem:[#allocation111_spill] sm:$0xff] %v5134_v7  ;;  %v2593_v47 = vadd.f32 %v2592_v19, %v2591_v50  ;;  %v5163_v19 = vpop.f32.mrf.mxu1 }
 0x399   : > { %6095 = vst [vmem:[#allocation112_spill] sm:$0xff] %v5137_v20  ;;  %6096 = vst [vmem:[#allocation113_spill] sm:$0xff] %v5140_v10  ;;  %v2463_v44 = vadd.f32 %v2335_v51, %v4992_v26  ;;  %v2596_v9 = vsel %vm712_vm7, %v2462_v48, 0.0  ;;  %v2338_v10 = vadd.f32 %v6101_v57, %v4939_v40  ;;  %v6103_v51 = vld [vmem:[#allocation16_spill] sm:$0xff]  ;;  %v2857_v35 = vmul.f32 %v2462_v48, %v2462_v48 }
 0x39a   : > { %6097 = vst [vmem:[#allocation114_spill] sm:$0xff] %v5143_v28  ;;  %6099 = vst [vmem:[#allocation7_spill] sm:$0xff] %v5154_v58  ;;  %v2595_v56 = vadd.f32 %v2594_v21, %v2593_v47  ;;  %v2337_v28 = vadd.f32 %v4939_v40, %v6100_v13  ;;  %v2339_v58 = vadd.f32 %v4939_v40, %v6103_v51  ;;  %v3942_v40 = vpop.f32.mrf.mxu1 }
 0x39b   : > { %v2598_v50 = vsel %vm712_vm7, %v2463_v44, 0.0  ;;  %6102 = vst [vmem:[#allocation11_spill] sm:$0xff] %v5163_v19  ;;  %v2466_v47 = vadd.f32 %v2338_v10, %v4978_v42  ;;  %v2852_v21 = vmul.f32 %v4987_v16, %v4987_v16 }
 0x39c   : > { %v2597_v39 = vadd.f32 %v2596_v9, %v2595_v56  ;;  %v2465_v20 = vadd.f32 %v2337_v28, %v4962_v55  ;;  %v2600_v56 = vsel %vm712_vm7, %v5055_v33, 0.0  ;;  %v2853_v28 = vmul.f32 %v5007_v30, %v5007_v30 }
 0x39d   : > { %v2467_v57 = vadd.f32 %v2339_v58, %v4992_v26  ;;  %v2604_v16 = vsel %vm712_vm7, %v2466_v47, 0.0  ;;  %v2980_v19 = vsel %vm712_vm7, %v2852_v21, 0.0 }
 0x39e   : > { %v2599_v7 = vadd.f32 %v2598_v50, %v2597_v39  ;;  %v2602_v9 = vsel %vm712_vm7, %v2465_v20, 0.0  ;;  %v2854_v39 = vmul.f32 %v5016_v41, %v5016_v41  ;;  %v6104_v50 = vld [vmem:[#allocation21_spill] sm:$0xff]  ;;  %v2981_v58 = vsel %vm712_vm7, %v2853_v28, 0.0 }
 0x39f   : > { %v2341_v10 = vadd.f32 %v4942_v52, %v6104_v50  ;;  %v2606_v41 = vsel %vm712_vm7, %v2467_v57, 0.0  ;;  %v2982_v50 = vadd.f32 %v2981_v58, %v2980_v19  ;;  %v2856_v28 = vmul.f32 %v5046_v31, %v5046_v31  ;;  %v6109_v58 = vld [vmem:[#allocation34_spill] sm:$0xff] }
 0x3a0   : > { %v2601_v13 = vadd.f32 %v2600_v56, %v2599_v7  ;;  %v6105_v7 = vld [vmem:[#allocation18_spill] sm:$0xff]  ;;  %v2983_v11 = vsel %vm712_vm7, %v2854_v39, 0.0  ;;  %v2345_v31 = vadd.f32 %v4945_v12, %v6109_v58 }
 0x3a1   : > { %v2342_v56 = vadd.f32 %v6105_v7, %v4942_v52  ;;  %v5185_v30 = vadd.f32 %v2341_v10, %v4962_v55  ;;  %v2343_v7 = vadd.f32 %v4942_v52, %v6107_v36  ;;  %v2984_v39 = vadd.f32 %v2983_v11, %v2982_v50  ;;  %v6110_v50 = vld [vmem:[#allocation30_spill] sm:$0xff] }
 0x3a2   : > { %v2603_v51 = vadd.f32 %v2602_v9, %v2601_v13  ;;  %v2855_v13 = vmul.f32 %v5052_v4, %v5052_v4  ;;  %v5192_v9 = vpop.f32.mrf.mxu1  ;;  %v2987_v48 = vsel %vm712_vm7, %v2856_v28, 0.0  ;;  %v6112_v28 = vld [vmem:[#allocation43_spill] sm:$0xff] }
 0x3a3   : > { %6106 = vst [vmem:[#allocation8_spill] sm:$0xff] %v5192_v9  ;;  %v5197_v10 = vadd.f32 %v2342_v56, %v4978_v42  ;;  %v2610_v4 = vsel %vm712_vm7, %v5185_v30, 0.0  ;;  %v6116_v9 = vld [vmem:[#allocation47_spill] sm:$0xff] }
 0x3a4   : > { %v2605_v46 = vadd.f32 %v2604_v16, %v2603_v51  ;;  %v2608_v51 = vsel %vm712_vm7, %v5058_v15, 0.0  ;;  %v2985_v36 = vsel %vm712_vm7, %v2855_v13, 0.0  ;;  %v5209_v52 = vpop.f32.mrf.mxu1  ;;  %v5219_v13 = vadd.f32 %v2345_v31, %v4962_v55 }
 0x3a5   : > { %6108 = vst [vmem:[#allocation16_spill] sm:$0xff] %v5209_v52  ;;  %v2986_v56 = vadd.f32 %v2985_v36, %v2984_v39  ;;  %v2612_v11 = vsel %vm712_vm7, %v5197_v10, 0.0  ;;  %v2861_v52 = vmul.f32 %v2466_v47, %v2466_v47 }
 0x3a6   : > { %v2607_v21 = vadd.f32 %v2606_v41, %v2605_v46  ;;  %v5206_v46 = vadd.f32 %v2343_v7, %v4992_v26  ;;  %v2858_v41 = vmul.f32 %v2463_v44, %v2463_v44  ;;  %v5226_v36 = vpop.f32.mrf.mxu1  ;;  %v2347_v44 = vadd.f32 %v4945_v12, %v6112_v28 }
 0x3a7   : > { %6111 = vst [vmem:[#allocation21_spill] sm:$0xff] %v5226_v36  ;;  %v2997_v5 = vsel %vm712_vm7, %v2861_v52, 0.0  ;;  %v2864_v52 = vmul.f32 %v5185_v30, %v5185_v30  ;;  %v6118_v30 = vld [vmem:[#allocation57_spill] sm:$0xff] }
 0x3a8   : > { %v2609_v16 = vadd.f32 %v2608_v51, %v2607_v21  ;;  %v2346_v21 = vadd.f32 %v6110_v50, %v4945_v12  ;;  %v2988_v51 = vadd.f32 %v2987_v48, %v2986_v56  ;;  %v2614_v39 = vsel %vm712_vm7, %v5206_v46, 0.0 }
 0x3a9   : > { %v2860_v56 = vmul.f32 %v2465_v20, %v2465_v20  ;;  %v2991_v31 = vsel %vm712_vm7, %v2858_v41, 0.0  ;;  %v5239_v36 = vadd.f32 %v2347_v44, %v4992_v26  ;;  %v6114_v41 = vld [vmem:[#allocation49_spill] sm:$0xff] }
 0x3aa   : > { %v2611_v19 = vadd.f32 %v2610_v4, %v2609_v16  ;;  %v2989_v16 = vsel %vm712_vm7, %v2857_v35, 0.0  ;;  %v2859_v4 = vmul.f32 %v5055_v33, %v5055_v33  ;;  %v2616_v35 = vsel %vm712_vm7, %v5061_v18, 0.0 }
 0x3ab   : > { %v2990_v50 = vadd.f32 %v2989_v16, %v2988_v51  ;;  %v2618_v33 = vsel %vm712_vm7, %v5219_v13, 0.0  ;;  %v2350_v51 = vadd.f32 %v6114_v41, %v4951_v37  ;;  %v2995_v28 = vsel %vm712_vm7, %v2860_v56, 0.0 }
 0x3ac   : > { %v2613_v7 = vadd.f32 %v2612_v11, %v2611_v19  ;;  %v5231_v19 = vadd.f32 %v2346_v21, %v4978_v42  ;;  %v2993_v12 = vsel %vm712_vm7, %v2859_v4, 0.0  ;;  %v6113_v21 = vld [vmem:[#allocation51_spill] sm:$0xff] }
 0x3ad   : > { %v2992_v48 = vadd.f32 %v2991_v31, %v2990_v50  ;;  %v2349_v20 = vadd.f32 %v4951_v37, %v6113_v21  ;;  %v6115_v50 = vld [vmem:[#allocation46_spill] sm:$0xff] }
 0x3ae   : > { %v2615_v58 = vadd.f32 %v2614_v39, %v2613_v7  ;;  %v3948_v7 = vpop.f32.mrf.mxu1  ;;  %v2620_v47 = vsel %vm712_vm7, %v5231_v19, 0.0  ;;  %v2452_v44 = vadd.f32 %v3942_v40, %v6115_v50 }
 0x3af   : > { %v2994_v39 = vadd.f32 %v2993_v12, %v2992_v48  ;;  %v5251_v31 = vadd.f32 %v2349_v20, %v4962_v55  ;;  %v2456_v21 = vadd.f32 %v3948_v7, %v6116_v9  ;;  %v2863_v48 = vmul.f32 %v5058_v15, %v5058_v15 }
 0x3b0   : > { %v2617_v11 = vadd.f32 %v2616_v35, %v2615_v58  ;;  %v2862_v58 = vmul.f32 %v2467_v57, %v2467_v57  ;;  %v5260_v56 = vadd.f32 %v2452_v44, %v5035_v3  ;;  %v6117_v57 = vld [vmem:[#allocation53_spill] sm:$0xff]  ;;  %v2478_v7 = vadd.f32 %v2350_v51, %v4978_v42 }
 0x3b1   : > { %v2996_v35 = vadd.f32 %v2995_v28, %v2994_v39  ;;  %v2351_v40 = vadd.f32 %v4951_v37, %v6117_v57  ;;  %v5265_v20 = vadd.f32 %v2456_v21, %v5035_v3  ;;  %v2624_v15 = vsel %vm712_vm7, %v5064_v54, 0.0 }
 0x3b2   : > { %v2619_v16 = vadd.f32 %v2618_v33, %v2617_v11  ;;  %v2622_v11 = vsel %vm712_vm7, %v5239_v36, 0.0  ;;  %v2999_v41 = vsel %vm712_vm7, %v2862_v58, 0.0  ;;  %v2865_v37 = vmul.f32 %v5197_v10, %v5197_v10  ;;  %v6119_v10 = vld [vmem:[#allocation55_spill] sm:$0xff] }
 0x3b3   : > { %v2998_v12 = vadd.f32 %v2997_v5, %v2996_v35  ;;  %v2626_v5 = vsel %vm712_vm7, %v5251_v31, 0.0  ;;  %v2479_v3 = vadd.f32 %v2351_v40, %v4992_v26  ;;  %v3001_v51 = vsel %vm712_vm7, %v2863_v48, 0.0 }
 0x3b4   : > { %v2621_v4 = vadd.f32 %v2620_v47, %v2619_v16  ;;  %v2353_v58 = vadd.f32 %v4954_v45, %v6118_v30  ;;  %v2628_v44 = vsel %vm712_vm7, %v2478_v7, 0.0  ;;  %v2866_v35 = vmul.f32 %v5206_v46, %v5206_v46 }
 0x3b5   : > { %v3000_v39 = vadd.f32 %v2999_v41, %v2998_v12  ;;  %v2354_v21 = vadd.f32 %v6119_v10, %v4954_v45  ;;  %v3005_v48 = vsel %vm712_vm7, %v2865_v37, 0.0  ;;  %v2867_v12 = vmul.f32 %v5061_v18, %v5061_v18  ;;  %v6120_v41 = vld [vmem:[#allocation59_spill] sm:$0xff] }
 0x3b6   : > { %v2623_v33 = vadd.f32 %v2622_v11, %v2621_v4  ;;  %v3003_v4 = vsel %vm712_vm7, %v2864_v52, 0.0  ;;  %v2481_v40 = vadd.f32 %v2353_v58, %v4962_v55  ;;  %v2355_v52 = vadd.f32 %v4954_v45, %v6120_v41 }
 0x3b7   : > { %v3002_v28 = vadd.f32 %v3001_v51, %v3000_v39  ;;  %v2482_v46 = vadd.f32 %v2354_v21, %v4978_v42  ;;  %v2868_v39 = vmul.f32 %v5219_v13, %v5219_v13  ;;  %v2632_v37 = vsel %vm712_vm7, %v5067_v22, 0.0 }
 0x3b8   : > { %v2625_v16 = vadd.f32 %v2624_v15, %v2623_v33  ;;  %v2630_v33 = vsel %vm712_vm7, %v2479_v3, 0.0  ;;  %v2869_v18 = vmul.f32 %v5231_v19, %v5231_v19  ;;  %v2483_v45 = vadd.f32 %v2355_v52, %v4992_v26  ;;  %v6122_v19 = vld [vmem:[#allocation61_spill] sm:$0xff] }
 0x3b9   : > { %v3004_v57 = vadd.f32 %v3003_v4, %v3002_v28  ;;  %v2634_v28 = vsel %vm712_vm7, %v2481_v40, 0.0  ;;  %v3009_v30 = vsel %vm712_vm7, %v2867_v12, 0.0  ;;  %v6121_v4 = vld [vmem:[#allocation63_spill] sm:$0xff]  ;;  %v3011_v10 = vsel %vm712_vm7, %v2868_v39, 0.0 }
 0x3ba   : > { %v2627_v47 = vadd.f32 %v2626_v5, %v2625_v16  ;;  %v3007_v5 = vsel %vm712_vm7, %v2866_v35, 0.0  ;;  %v2357_v13 = vadd.f32 %v4957_v59, %v6121_v4  ;;  %v2636_v35 = vsel %vm712_vm7, %v2482_v46, 0.0 }
 0x3bb   : > { %v3006_v16 = vadd.f32 %v3005_v48, %v3004_v57  ;;  %v2870_v21 = vmul.f32 %v5239_v36, %v5239_v36  ;;  %v3013_v12 = vsel %vm712_vm7, %v2869_v18, 0.0  ;;  %v2638_v41 = vsel %vm712_vm7, %v2483_v45, 0.0 }
 0x3bc   : > { %v2629_v11 = vadd.f32 %v2628_v44, %v2627_v47  ;;  %v2871_v52 = vmul.f32 %v5064_v54, %v5064_v54 }
 0x3bd   : > { %v3008_v47 = vadd.f32 %v3007_v5, %v3006_v16 }
 0x3be   : > { %v2631_v15 = vadd.f32 %v2630_v33, %v2629_v11  ;;  %v2358_v11 = vadd.f32 %v6122_v19, %v4957_v59  ;;  %v2485_v33 = vadd.f32 %v2357_v13, %v4962_v55  ;;  %v6124_v13 = vld [vmem:[#allocation69_spill] sm:$0xff]  ;;  %v6125_v19 = vld [vmem:[#allocation67_spill] sm:$0xff] }
 0x3bf   : > { %v3010_v44 = vadd.f32 %v3009_v30, %v3008_v47  ;;  %v2640_v47 = vsel %vm712_vm7, %v5070_v0, 0.0  ;;  %v2873_v30 = vmul.f32 %v2478_v7, %v2478_v7 }
 0x3c0   : > { %v2633_v51 = vadd.f32 %v2632_v37, %v2631_v15  ;;  %v6123_v15 = vld [vmem:[#allocation65_spill] sm:$0xff]  ;;  %v2486_v36 = vadd.f32 %v2358_v11, %v4978_v42  ;;  %v2872_v37 = vmul.f32 %v5251_v31, %v5251_v31  ;;  %v2642_v54 = vsel %vm712_vm7, %v2485_v33, 0.0 }
 0x3c1   : > { %v3012_v48 = vadd.f32 %v3011_v10, %v3010_v44  ;;  %v2359_v16 = vadd.f32 %v4957_v59, %v6123_v15  ;;  %v3017_v59 = vsel %vm712_vm7, %v2871_v52, 0.0  ;;  %v2362_v11 = vadd.f32 %v6125_v19, %v4921_v14  ;;  %v6126_v15 = vld [vmem:[#allocation71_spill] sm:$0xff] }
 0x3c2   : > { %v2635_v58 = vadd.f32 %v2634_v28, %v2633_v51  ;;  %v3015_v51 = vsel %vm712_vm7, %v2870_v21, 0.0  ;;  %v2644_v31 = vsel %vm712_vm7, %v2486_v36, 0.0  ;;  %v3019_v10 = vsel %vm712_vm7, %v2872_v37, 0.0 }
 0x3c3   : > { %v3014_v5 = vadd.f32 %v3013_v12, %v3012_v48  ;;  %v2874_v21 = vmul.f32 %v2479_v3, %v2479_v3  ;;  %v3021_v12 = vsel %vm712_vm7, %v2873_v30, 0.0  ;;  %v2875_v52 = vmul.f32 %v5067_v22, %v5067_v22 }
 0x3c4   : > { %v2637_v57 = vadd.f32 %v2636_v35, %v2635_v58  ;;  %v2487_v58 = vadd.f32 %v2359_v16, %v4992_v26  ;;  %v2361_v35 = vadd.f32 %v4921_v14, %v6124_v13  ;;  %v2363_v16 = vadd.f32 %v4921_v14, %v6126_v15 }
 0x3c5   : > { %v3016_v28 = vadd.f32 %v3015_v51, %v3014_v5  ;;  %v2490_v3 = vadd.f32 %v2362_v11, %v4978_v42  ;;  %v2876_v37 = vmul.f32 %v2481_v40, %v2481_v40  ;;  %v3023_v51 = vsel %vm712_vm7, %v2874_v21, 0.0 }
 0x3c6   : > { %v2639_v39 = vadd.f32 %v2638_v41, %v2637_v57  ;;  %v2489_v48 = vadd.f32 %v2361_v35, %v4962_v55  ;;  %v2646_v41 = vsel %vm712_vm7, %v2487_v58, 0.0  ;;  %v2877_v30 = vmul.f32 %v2482_v46, %v2482_v46 }
 0x3c7   : > { %v3018_v4 = vadd.f32 %v3017_v59, %v3016_v28  ;;  %v2491_v22 = vadd.f32 %v2363_v16, %v4992_v26  ;;  %v3025_v59 = vsel %vm712_vm7, %v2875_v52, 0.0  ;;  %v2652_v40 = vsel %vm712_vm7, %v2490_v3, 0.0 }
 0x3c8   : > { %v2641_v18 = vadd.f32 %v2640_v47, %v2639_v39  ;;  %v2648_v47 = vsel %vm712_vm7, %v5073_v62, 0.0  ;;  %v3027_v35 = vsel %vm712_vm7, %v2876_v37, 0.0  ;;  %v2656_v37 = vsel %vm712_vm7, %v5077_v6, 0.0 }
 0x3c9   : > { %v3020_v57 = vadd.f32 %v3019_v10, %v3018_v4  ;;  %v6127_v4 = vld [vmem:[#allocation75_spill] sm:$0xff]  ;;  %v6128_v10 = vld [vmem:[#allocation73_spill] sm:$0xff] }
 0x3ca   : > { %v2643_v44 = vadd.f32 %v2642_v54, %v2641_v18  ;;  %v2650_v54 = vsel %vm712_vm7, %v2489_v48, 0.0  ;;  %v2365_v13 = vadd.f32 %v4632_v61, %v6127_v4  ;;  %v2366_v21 = vadd.f32 %v6128_v10, %v4632_v61 }
 0x3cb   : > { %v3022_v5 = vadd.f32 %v3021_v12, %v3020_v57  ;;  %v2654_v57 = vsel %vm712_vm7, %v2491_v22, 0.0  ;;  %v2879_v12 = vmul.f32 %v5070_v0, %v5070_v0 }
 0x3cc   : > { %v2645_v7 = vadd.f32 %v2644_v31, %v2643_v44  ;;  %v2878_v31 = vmul.f32 %v2483_v45, %v2483_v45  ;;  %v2493_v11 = vadd.f32 %v2365_v13, %v4962_v55  ;;  %v2494_v45 = vadd.f32 %v2366_v21, %v4978_v42 }
 0x3cd   : > { %v3024_v28 = vadd.f32 %v3023_v51, %v3022_v5  ;;  %v2882_v13 = vmul.f32 %v2487_v58, %v2487_v58 }
 0x3ce   : > { %v2647_v39 = vadd.f32 %v2646_v41, %v2645_v7  ;;  %v3029_v7 = vsel %vm712_vm7, %v2877_v30, 0.0  ;;  %v6129_v41 = vld [vmem:[#allocation77_spill] sm:$0xff]  ;;  %v3031_v5 = vsel %vm712_vm7, %v2878_v31, 0.0  ;;  %v3033_v30 = vsel %vm712_vm7, %v2879_v12, 0.0 }
 0x3cf   : > { %v3026_v44 = vadd.f32 %v3025_v59, %v3024_v28  ;;  %v2367_v52 = vadd.f32 %v4632_v61, %v6129_v41  ;;  %v2658_v28 = vsel %vm712_vm7, %v2493_v11, 0.0  ;;  %v6130_v59 = vld [vmem:[#allocation81_spill] sm:$0xff] }
 0x3d0   : > { %v2649_v18 = vadd.f32 %v2648_v47, %v2647_v39  ;;  %v2880_v39 = vmul.f32 %v2485_v33, %v2485_v33  ;;  %v2660_v33 = vsel %vm712_vm7, %v2494_v45, 0.0 }
 0x3d1   : > { %v3028_v19 = vadd.f32 %v3027_v35, %v3026_v44  ;;  %v2495_v0 = vadd.f32 %v2367_v52, %v4992_v26  ;;  %v2884_v52 = vmul.f32 %v2489_v48, %v2489_v48 }
 0x3d2   : > { %v2651_v14 = vadd.f32 %v2650_v54, %v2649_v18  ;;  %v2881_v18 = vmul.f32 %v2486_v36, %v2486_v36  ;;  %v3035_v4 = vsel %vm712_vm7, %v2880_v39, 0.0 }
 0x3d3   : > { %v3030_v16 = vadd.f32 %v3029_v7, %v3028_v19  ;;  %v2883_v19 = vmul.f32 %v5073_v62, %v5073_v62  ;;  %v6133_v7 = vld [vmem:[#allocation84_spill] sm:$0xff] }
 0x3d4   : > { %v2653_v46 = vadd.f32 %v2652_v40, %v2651_v14  ;;  %v6131_v14 = vld [vmem:[#allocation13_spill] sm:$0xff]  ;;  %v6132_v40 = vld [vmem:[#allocation79_spill] sm:$0xff]  ;;  %v3037_v21 = vsel %vm712_vm7, %v2881_v18, 0.0 }
 0x3d5   : > { %v3032_v47 = vadd.f32 %v3031_v5, %v3030_v16  ;;  %v2369_v44 = vadd.f32 %v6131_v14, %v6130_v59  ;;  %v2370_v35 = vadd.f32 %v6132_v40, %v6131_v14  ;;  %v2664_v16 = vsel %vm712_vm7, %v5081_v24, 0.0 }
 0x3d6   : > { %v2655_v15 = vadd.f32 %v2654_v57, %v2653_v46  ;;  %v2662_v46 = vsel %vm712_vm7, %v2495_v0, 0.0  ;;  %v2371_v57 = vadd.f32 %v6131_v14, %v6133_v7  ;;  %v2886_v59 = vmul.f32 %v2491_v22, %v2491_v22  ;;  %v6135_v14 = vld [vmem:[#allocation86_spill] sm:$0xff] }
 0x3d7   : > { %v3034_v54 = vadd.f32 %v3033_v30, %v3032_v47  ;;  %v2497_v10 = vadd.f32 %v2369_v44, %v4962_v55  ;;  %v2498_v58 = vadd.f32 %v2370_v35, %v4978_v42  ;;  %v3041_v47 = vsel %vm712_vm7, %v2883_v19, 0.0  ;;  %v6134_v30 = vld [vmem:[#allocation88_spill] sm:$0xff] }
 0x3d8   : > { %v2657_v51 = vadd.f32 %v2656_v37, %v2655_v15  ;;  %v3039_v15 = vsel %vm712_vm7, %v2882_v13, 0.0  ;;  %v2885_v37 = vmul.f32 %v2490_v3, %v2490_v3  ;;  %v2499_v62 = vadd.f32 %v2371_v57, %v4992_v26 }
 0x3d9   : > { %v3036_v31 = vadd.f32 %v3035_v4, %v3034_v54  ;;  %v2668_v48 = vsel %vm712_vm7, %v2498_v58, 0.0  ;;  %v3043_v54 = vsel %vm712_vm7, %v2884_v52, 0.0  ;;  %v2374_v44 = vadd.f32 %v6135_v14, %v4645_v2  ;;  %v6139_v14 = vld [vmem:[#allocation98_spill] sm:$0xff] }
 0x3da   : > { %v2659_v61 = vadd.f32 %v2658_v28, %v2657_v51  ;;  %v2666_v51 = vsel %vm712_vm7, %v2497_v10, 0.0  ;;  %v3045_v13 = vsel %vm712_vm7, %v2885_v37, 0.0  ;;  %v2670_v40 = vsel %vm712_vm7, %v2499_v62, 0.0 }
 0x3db   : > { %v3038_v41 = vadd.f32 %v3037_v21, %v3036_v31  ;;  %v2887_v35 = vmul.f32 %v5077_v6, %v5077_v6  ;;  %v2502_v22 = vadd.f32 %v2374_v44, %v4978_v42  ;;  %v2888_v19 = vmul.f32 %v2493_v11, %v2493_v11 }
 0x3dc   : > { %v2661_v36 = vadd.f32 %v2660_v33, %v2659_v61  ;;  %v2373_v61 = vadd.f32 %v4645_v2, %v6134_v30  ;;  %v3047_v7 = vsel %vm712_vm7, %v2886_v59, 0.0  ;;  %v2672_v57 = vsel %vm712_vm7, %v5084_v23, 0.0 }
 0x3dd   : > { %v3040_v5 = vadd.f32 %v3039_v15, %v3038_v41  ;;  %v2889_v52 = vmul.f32 %v2494_v45, %v2494_v45  ;;  %v2676_v11 = vsel %vm712_vm7, %v2502_v22, 0.0  ;;  %v2891_v59 = vmul.f32 %v5081_v24, %v5081_v24 }
 0x3de   : > { %v2663_v12 = vadd.f32 %v2662_v46, %v2661_v36  ;;  %v2501_v4 = vadd.f32 %v2373_v61, %v4962_v55  ;;  %v6136_v36 = vld [vmem:[#allocation91_spill] sm:$0xff]  ;;  %v2379_v44 = vadd.f32 %v4638_v63, %v6139_v14 }
 0x3df   : > { %v3042_v28 = vadd.f32 %v3041_v47, %v3040_v5  ;;  %v2375_v31 = vadd.f32 %v4645_v2, %v6136_v36  ;;  %v6137_v5 = vld [vmem:[#allocation95_spill] sm:$0xff]  ;;  %v2890_v47 = vmul.f32 %v2495_v0, %v2495_v0 }
 0x3e0   : > { %v2665_v39 = vadd.f32 %v2664_v16, %v2663_v12  ;;  %v2674_v15 = vsel %vm712_vm7, %v2501_v4, 0.0  ;;  %v3049_v16 = vsel %vm712_vm7, %v2887_v35, 0.0  ;;  %v2377_v37 = vadd.f32 %v4638_v63, %v6137_v5 }
 0x3e1   : > { %v3044_v33 = vadd.f32 %v3043_v54, %v3042_v28  ;;  %v2503_v6 = vadd.f32 %v2375_v31, %v4992_v26  ;;  %v2680_v35 = vsel %vm712_vm7, %v5087_v25, 0.0  ;;  %v2507_v24 = vadd.f32 %v2379_v44, %v4992_v26 }
 0x3e2   : > { %v2667_v18 = vadd.f32 %v2666_v51, %v2665_v39  ;;  %v3051_v51 = vsel %vm712_vm7, %v2888_v19, 0.0  ;;  %v2505_v61 = vadd.f32 %v2377_v37, %v4962_v55  ;;  %v3057_v19 = vsel %vm712_vm7, %v2891_v59, 0.0  ;;  %v1620_v59 = vpop.f32.mrf.mxu0 }
 0x3e3   : > { %v3046_v46 = vadd.f32 %v3045_v13, %v3044_v33  ;;  %v2678_v54 = vsel %vm712_vm7, %v2503_v6, 0.0  ;;  %v2892_v13 = vmul.f32 %v2497_v10, %v2497_v10 }
 0x3e4   : > { %v2669_v3 = vadd.f32 %v2668_v48, %v2667_v18  ;;  %v6138_v18 = vld [vmem:[#allocation93_spill] sm:$0xff]  ;;  %v3053_v48 = vsel %vm712_vm7, %v2889_v52, 0.0 }
 0x3e5   : > { %v3048_v41 = vadd.f32 %v3047_v7, %v3046_v46  ;;  %v2378_v28 = vadd.f32 %v6138_v18, %v4638_v63  ;;  %v2682_v46 = vsel %vm712_vm7, %v2505_v61, 0.0  ;;  %v3059_v52 = vsel %vm712_vm7, %v2892_v13, 0.0 }
 0x3e6   : > { %v2671_v21 = vadd.f32 %v2670_v40, %v2669_v3  ;;  %v3055_v40 = vsel %vm712_vm7, %v2890_v47, 0.0  ;;  %v6143_v47 = vld [vmem:[#allocation105_spill] sm:$0xff] }
 0x3e7   : > { %v3050_v39 = vadd.f32 %v3049_v16, %v3048_v41  ;;  %v2506_v0 = vadd.f32 %v2378_v28, %v4978_v42  ;;  %v6142_v16 = vld [vmem:[#allocation100_spill] sm:$0xff] }
 0x3e8   : > { %v2673_v12 = vadd.f32 %v2672_v57, %v2671_v21  ;;  %v2893_v21 = vmul.f32 %v2498_v58, %v2498_v58  ;;  %v6140_v57 = vld [vmem:[#allocation102_spill] sm:$0xff] }
 0x3e9   : > { %v3052_v30 = vadd.f32 %v3051_v51, %v3050_v39  ;;  %v2684_v10 = vsel %vm712_vm7, %v2506_v0, 0.0  ;;  %v2895_v51 = vmul.f32 %v5084_v23, %v5084_v23 }
 0x3ea   : > { %v2675_v2 = vadd.f32 %v2674_v15, %v2673_v12  ;;  %v6141_v12 = vld [vmem:[#allocation23_spill] sm:$0xff]  ;;  %v2894_v15 = vmul.f32 %v2499_v62, %v2499_v62  ;;  %v3061_v37 = vsel %vm712_vm7, %v2893_v21, 0.0 }
 0x3eb   : > { %v3054_v33 = vadd.f32 %v3053_v48, %v3052_v30  ;;  %v2381_v41 = vadd.f32 %v6141_v12, %v6140_v57  ;;  %v2383_v18 = vadd.f32 %v6141_v12, %v6143_v47  ;;  %v2896_v30 = vmul.f32 %v2501_v4, %v2501_v4  ;;  %v6145_v4 = vld [vmem:[#allocation24_spill] sm:$0xff] }
 0x3ec   : > { %v2677_v45 = vadd.f32 %v2676_v11, %v2675_v2  ;;  %v2382_v2 = vadd.f32 %v6142_v16, %v6141_v12  ;;  %v2686_v11 = vsel %vm712_vm7, %v2507_v24, 0.0  ;;  %v3063_v48 = vsel %vm712_vm7, %v2894_v15, 0.0 }
 0x3ed   : > { %v3056_v31 = vadd.f32 %v3055_v40, %v3054_v33  ;;  %v5436_v5 = vadd.f32 %v2381_v41, %v4962_v55  ;;  %v2511_v33 = vadd.f32 %v2383_v18, %v4992_v26  ;;  %v3065_v13 = vsel %vm712_vm7, %v2895_v51, 0.0 }
 0x3ee   : > { %v2679_v3 = vadd.f32 %v2678_v54, %v2677_v45  ;;  %v2510_v45 = vadd.f32 %v2382_v2, %v4978_v42  ;;  %v2688_v54 = vsel %vm712_vm7, %v5090_v32, 0.0  ;;  %v2899_v15 = vmul.f32 %v5087_v25, %v5087_v25 }
 0x3ef   : > { %v3058_v7 = vadd.f32 %v3057_v19, %v3056_v31  ;;  %v2690_v23 = vsel %vm712_vm7, %v5436_v5, 0.0  ;;  %v2898_v19 = vmul.f32 %v2503_v6, %v2503_v6  ;;  %v2387_v16 = vadd.f32 %v6145_v4, %v1620_v59  ;;  %v6147_v59 = vld [vmem:[#allocation25_spill] sm:$0xff] }
 0x3f0   : > { %v2681_v36 = vadd.f32 %v2680_v35, %v2679_v3  ;;  %v2897_v3 = vmul.f32 %v2502_v22, %v2502_v22  ;;  %v2692_v21 = vsel %vm712_vm7, %v2510_v45, 0.0 }
 0x3f1   : > { %v3060_v39 = vadd.f32 %v3059_v52, %v3058_v7  ;;  %v3849_v7 = vpop.f32.mrf.mxu0  ;;  %v2694_v52 = vsel %vm712_vm7, %v2511_v33, 0.0  ;;  %v2515_v25 = vadd.f32 %v2387_v16, %v4992_v26 }
 0x3f2   : > { %v2683_v63 = vadd.f32 %v2682_v46, %v2681_v36  ;;  %v6144_v36 = vld [vmem:[#allocation109_spill] sm:$0xff]  ;;  %v3067_v46 = vsel %vm712_vm7, %v2896_v30, 0.0  ;;  %v3073_v30 = vsel %vm712_vm7, %v2899_v15, 0.0 }
 0x3f3   : > { %v3062_v62 = vadd.f32 %v3061_v37, %v3060_v39  ;;  %v2385_v31 = vadd.f32 %v6145_v4, %v6144_v36  ;;  %v2900_v39 = vmul.f32 %v2505_v61, %v2505_v61  ;;  %v3071_v37 = vsel %vm712_vm7, %v2898_v19, 0.0  ;;  %v1630_v51 = vpop.f32.mrf.mxu0 }
 0x3f4   : > { %v2685_v58 = vadd.f32 %v2684_v10, %v2683_v63  ;;  %v6146_v63 = vld [vmem:[#allocation107_spill] sm:$0xff]  ;;  %v3069_v10 = vsel %vm712_vm7, %v2897_v3, 0.0  ;;  %v2902_v3 = vmul.f32 %v2507_v24, %v2507_v24  ;;  %v2702_v36 = vsel %vm712_vm7, %v2515_v25, 0.0 }
 0x3f5   : > { %v3064_v44 = vadd.f32 %v3063_v48, %v3062_v62  ;;  %v2386_v22 = vadd.f32 %v6146_v63, %v6145_v4  ;;  %v2513_v41 = vadd.f32 %v2385_v31, %v4962_v55  ;;  %v2903_v4 = vmul.f32 %v5090_v32, %v5090_v32  ;;  %v6148_v31 = vld [vmem:[#allocation9_spill] sm:$0xff] }
 0x3f6   : > { %v2687_v28 = vadd.f32 %v2686_v11, %v2685_v58  ;;  %v2696_v11 = vsel %vm712_vm7, %v5093_v29, 0.0  ;;  %v2904_v63 = vmul.f32 %v5436_v5, %v5436_v5 }
 0x3f7   : > { %v3066_v35 = vadd.f32 %v3065_v13, %v3064_v44  ;;  %v2514_v6 = vadd.f32 %v2386_v22, %v4978_v42  ;;  %v2698_v62 = vsel %vm712_vm7, %v2513_v41, 0.0  ;;  %v3075_v44 = vsel %vm712_vm7, %v2900_v39, 0.0  ;;  %v6150_v39 = vld [vmem:[#allocation26_spill] sm:$0xff] }
 0x3f8   : > { %v2689_v14 = vadd.f32 %v2688_v54, %v2687_v28  ;;  %v2901_v28 = vmul.f32 %v2506_v0, %v2506_v0  ;;  %v3079_v22 = vsel %vm712_vm7, %v2902_v3, 0.0  ;;  %v3081_v15 = vsel %vm712_vm7, %v2903_v4, 0.0 }
 0x3f9   : > { %v3068_v12 = vadd.f32 %v3067_v46, %v3066_v35  ;;  %v2700_v61 = vsel %vm712_vm7, %v2514_v6, 0.0  ;;  %v2908_v3 = vmul.f32 %v2513_v41, %v2513_v41 }
 0x3fa   : > { %v2691_v40 = vadd.f32 %v2690_v23, %v2689_v14  ;;  %v2389_v14 = vadd.f32 %v6147_v59, %v1630_v51  ;;  %v2390_v23 = vadd.f32 %v3849_v7, %v6147_v59  ;;  %v3077_v35 = vsel %vm712_vm7, %v2901_v28, 0.0 }
 0x3fb   : > { %v3070_v58 = vadd.f32 %v3069_v10, %v3068_v12  ;;  %v2704_v7 = vsel %vm712_vm7, %v5096_v1, 0.0  ;;  %v2905_v10 = vmul.f32 %v2510_v45, %v2510_v45  ;;  %v2906_v51 = vmul.f32 %v2511_v33, %v2511_v33 }
 0x3fc   : > { %v2693_v57 = vadd.f32 %v2692_v21, %v2691_v40  ;;  %v2517_v0 = vadd.f32 %v2389_v14, %v4962_v55  ;;  %v2391_v21 = vadd.f32 %v6147_v59, %v6148_v31  ;;  %v2518_v24 = vadd.f32 %v2390_v23, %v4978_v42  ;;  %v6152_v59 = vld [vmem:[#allocation14_spill] sm:$0xff] }
 0x3fd   : > { %v3072_v18 = vadd.f32 %v3071_v37, %v3070_v58  ;;  %v6149_v58 = vld [vmem:[#allocation12_spill] sm:$0xff]  ;;  %v2395_v14 = vadd.f32 %v6150_v39, %v6152_v59  ;;  %v3087_v23 = vsel %vm712_vm7, %v2906_v51, 0.0 }
 0x3fe   : > { %v2695_v2 = vadd.f32 %v2694_v52, %v2693_v57  ;;  %v2706_v32 = vsel %vm712_vm7, %v2517_v0, 0.0  ;;  %v2519_v52 = vadd.f32 %v2391_v21, %v4992_v26  ;;  %v2393_v37 = vadd.f32 %v6150_v39, %v6149_v58 }
 0x3ff   : > { %v3074_v54 = vadd.f32 %v3073_v30, %v3072_v18  ;;  %v2708_v5 = vsel %vm712_vm7, %v2518_v24, 0.0  ;;  %v3085_v30 = vsel %vm712_vm7, %v2905_v10, 0.0  ;;  %v2911_v58 = vmul.f32 %v5096_v1, %v5096_v1 }
 0x400   : > { %v2697_v47 = vadd.f32 %v2696_v11, %v2695_v2  ;;  %v3083_v11 = vsel %vm712_vm7, %v2904_v63, 0.0  ;;  %v6154_v63 = vld [vmem:[#allocation28_spill] sm:$0xff]  ;;  %v2912_v51 = vmul.f32 %v2517_v0, %v2517_v0  ;;  %v6158_v0 = vld [vmem:[#allocation31_spill] sm:$0xff] }
 0x401   : > { %v3076_v40 = vadd.f32 %v3075_v44, %v3074_v54  ;;  %v2907_v54 = vmul.f32 %v5093_v29, %v5093_v29  ;;  %v2523_v29 = vadd.f32 %v2395_v14, %v4992_v26  ;;  %v6157_v14 = vld [vmem:[#allocation22_spill] sm:$0xff] }
 0x402   : > { %v2699_v48 = vadd.f32 %v2698_v62, %v2697_v47  ;;  %v6151_v47 = vld [vmem:[#allocation10_spill] sm:$0xff]  ;;  %v2521_v62 = vadd.f32 %v2393_v37, %v4962_v55 }
 0x403   : > { %v3078_v19 = vadd.f32 %v3077_v35, %v3076_v40  ;;  %v2394_v18 = vadd.f32 %v6151_v47, %v6150_v39  ;;  %v3089_v31 = vsel %vm712_vm7, %v2907_v54, 0.0  ;;  %v6156_v39 = vld [vmem:[#allocation19_spill] sm:$0xff] }
 0x404   : > { %v2701_v13 = vadd.f32 %v2700_v61, %v2699_v48  ;;  %v2710_v48 = vsel %vm712_vm7, %v2519_v52, 0.0  ;;  %v2714_v4 = vsel %vm712_vm7, %v2521_v62, 0.0  ;;  %v2399_v37 = vadd.f32 %v6154_v63, %v6156_v39  ;;  %v6162_v39 = vld [vmem:[#allocation32_spill] sm:$0xff] }
 0x405   : > { %v3080_v12 = vadd.f32 %v3079_v22, %v3078_v19  ;;  %v2522_v33 = vadd.f32 %v2394_v18, %v4978_v42  ;;  %v6153_v19 = vld [vmem:[#allocation17_spill] sm:$0xff] }
 0x406   : > { %v2703_v46 = vadd.f32 %v2702_v36, %v2701_v13  ;;  %v2712_v13 = vsel %vm712_vm7, %v5099_v38, 0.0  ;;  %v2909_v36 = vmul.f32 %v2514_v6, %v2514_v6  ;;  %v2397_v22 = vadd.f32 %v6154_v63, %v6153_v19 }
 0x407   : > { %v3082_v2 = vadd.f32 %v3081_v15, %v3080_v12  ;;  %v2716_v41 = vsel %vm712_vm7, %v2522_v33, 0.0  ;;  %v6155_v12 = vld [vmem:[#allocation15_spill] sm:$0xff] }
 0x408   : > { %v2705_v57 = vadd.f32 %v2704_v7, %v2703_v46  ;;  %v3091_v7 = vsel %vm712_vm7, %v2908_v3, 0.0  ;;  %v2398_v10 = vadd.f32 %v6155_v12, %v6154_v63  ;;  %v5518_v15 = vadd.f32 %v2397_v22, %v4962_v55 }
 0x409   : > { %v3084_v28 = vadd.f32 %v3083_v11, %v3082_v2  ;;  %v2718_v2 = vsel %vm712_vm7, %v2523_v29, 0.0  ;;  %v2720_v55 = vsel %vm712_vm7, %v5102_v49, 0.0  ;;  %v3099_v3 = vsel %vm712_vm7, %v2912_v51, 0.0  ;;  %v6163_v51 = vld [vmem:[#allocation33_spill] sm:$0xff] }
 0x40a   : > { %v2707_v16 = vadd.f32 %v2706_v32, %v2705_v57  ;;  %v2910_v57 = vmul.f32 %v2515_v25, %v2515_v25  ;;  %v2526_v11 = vadd.f32 %v2398_v10, %v4978_v42  ;;  %v2722_v1 = vsel %vm712_vm7, %v5518_v15, 0.0 }
 0x40b   : > { %v3086_v44 = vadd.f32 %v3085_v30, %v3084_v28  ;;  %v2913_v28 = vmul.f32 %v2518_v24, %v2518_v24  ;;  %v2527_v30 = vadd.f32 %v2399_v37, %v4992_v26 }
 0x40c   : > { %v2709_v45 = vadd.f32 %v2708_v5, %v2707_v16  ;;  %v3093_v16 = vsel %vm712_vm7, %v2909_v36, 0.0  ;;  %v3095_v47 = vsel %vm712_vm7, %v2910_v57, 0.0  ;;  %v5541_v36 = vld [vmem:[%s4824_s26] sm:$0xff]  ;;  %v2728_v57 = vsel %vm712_vm7, %v5105_v53, 0.0 }
 0x40d   : > { %v3088_v35 = vadd.f32 %v3087_v23, %v3086_v44  ;;  %v2724_v44 = vsel %vm712_vm7, %v2526_v11, 0.0  ;;  %v2914_v23 = vmul.f32 %v2519_v52, %v2519_v52 }
 0x40e   : > { %v2711_v61 = vadd.f32 %v2710_v48, %v2709_v45  ;;  %v3097_v48 = vsel %vm712_vm7, %v2911_v58, 0.0  ;;  %v6161_v58 = vld [vmem:[#allocation36_spill] sm:$0xff] }
 0x40f   : > { %v3090_v46 = vadd.f32 %v3089_v31, %v3088_v35  ;;  %v2726_v31 = vsel %vm712_vm7, %v2527_v30, 0.0  ;;  %v2405_v37 = vadd.f32 %v6162_v39, %v6161_v58 }
 0x410   : > { %v2713_v40 = vadd.f32 %v2712_v13, %v2711_v61  ;;  %v2401_v61 = vadd.f32 %v6158_v0, %v6157_v14  ;;  %v6159_v13 = vld [vmem:[#allocation20_spill] sm:$0xff] }
 0x411   : > { %v3092_v32 = vadd.f32 %v3091_v7, %v3090_v46  ;;  %v2402_v24 = vadd.f32 %v6159_v13, %v6158_v0  ;;  %v6160_v46 = vld [vmem:[#allocation29_spill] sm:$0xff]  ;;  %v3103_v7 = vsel %vm712_vm7, %v2914_v23, 0.0  ;;  %v2736_v23 = vsel %vm712_vm7, %v5108_v17, 0.0 }
 0x412   : > { %v2715_v21 = vadd.f32 %v2714_v4, %v2713_v40  ;;  %v5544_v26 = vadd.f32 %v5541_v36, %v2401_v61  ;;  %v3101_v4 = vsel %vm712_vm7, %v2913_v28, 0.0  ;;  %v2403_v52 = vadd.f32 %v6158_v0, %v6160_v46  ;;  %v5585_v0 = vld [vmem:[%s4824_s26 + $0x8] sm:$0xff] }
 0x413   : > { %v3094_v25 = vadd.f32 %v3093_v16, %v3092_v32  ;;  %v5553_v22 = vadd.f32 %v2402_v24, %v4978_v42  ;;  %v5561_v32 = vld [vmem:[%s4824_s26 + $0x10] sm:$0xff]  ;;  %s4116_s26 = smov [#allocation4]  }
 0x414   : > { %v2717_v6 = vadd.f32 %v2716_v41, %v2715_v21  ;;  %v2915_v21 = vmul.f32 %v5099_v38, %v5099_v38  ;;  %v2916_v41 = vmul.f32 %v2521_v62, %v2521_v62  ;;  %v2730_v38 = vsel %vm712_vm7, %v5544_v26, 0.0  ;;  %v6165_v46 = vld [vmem:[#allocation52_spill] sm:$0xff]  ;;  %s4039_s27 = sshll.u32 %s4116_s26, 4  ;;  %s4040_s27 = int_to_ptr.vmem [resolvable:$false] %s4039_s27 }
 0x415   : > { %v3096_v45 = vadd.f32 %v3095_v47, %v3094_v25  ;;  %v5564_v16 = vadd.f32 %v5561_v32, %v2403_v52  ;;  %v2918_v25 = vmul.f32 %v2523_v29, %v2523_v29  ;;  %v2406_v47 = vadd.f32 %v6163_v51, %v6162_v39  ;;  %s4041_s12 = scalar_lea.vmem %s4040_s27, 64  ;;  %p4042_p1 = scmp.lt.s32.totalorder %s3287_s28, %s4040_s27 }
 0x416   : > { %v2719_v5 = vadd.f32 %v2718_v2, %v2717_v6  ;;  %v2917_v6 = vmul.f32 %v2522_v33, %v2522_v33  ;;  %v3105_v42 = vsel %vm712_vm7, %v2915_v21, 0.0  ;;  %v3107_v33 = vsel %vm712_vm7, %v2916_v41, 0.0  ;;  %p4043_p2 = scmp.lt.s32.totalorder %s4041_s12, %s4035_s25 }
 0x417   : > { %v3098_v59 = vadd.f32 %v3097_v48, %v3096_v45  ;;  %v5575_v45 = vadd.f32 %v5541_v36, %v2405_v37  ;;  %v2919_v48 = vmul.f32 %v5102_v49, %v5102_v49  ;;  %v2534_v61 = vadd.f32 %v5585_v0, %v2406_v47 }
 0x418   : > { %v2721_v18 = vadd.f32 %v2720_v55, %v2719_v5  ;;  %v2732_v5 = vsel %vm712_vm7, %v5553_v22, 0.0  ;;  %v3109_v28 = vsel %vm712_vm7, %v2917_v6, 0.0  ;;  %v2921_v49 = vmul.f32 %v2526_v11, %v2526_v11  ;;  %v6167_v11 = vld [vmem:[#allocation50_spill] sm:$0xff]  ;;  %p4044_p3 = por %p4043_p2, %p4042_p1 }
 0x419   : > { %v3100_v35 = vadd.f32 %v3099_v3, %v3098_v59  ;;  %v3111_v3 = vsel %vm712_vm7, %v2918_v25, 0.0  ;;  %v2922_v41 = vmul.f32 %v2527_v30, %v2527_v30  ;;  %v2924_v37 = vmul.f32 %v5544_v26, %v5544_v26 }
 0x41a   : > { %v2723_v54 = vadd.f32 %v2722_v1, %v2721_v18  ;;  %v2734_v1 = vsel %vm712_vm7, %v5564_v16, 0.0  ;;  %v4115_v25 = vmov 0.0   ;;  %v2925_v47 = vmul.f32 %v5553_v22, %v5553_v22  ;;  %v6171_v22 = vld [vmem:[#allocation56_spill] sm:$0xff]  ;;  %p4045_p5 = pnand %p4044_p3, %p4038_p0 }
 0x41b   : > { %v3102_v63 = vadd.f32 %v3101_v4, %v3100_v35  ;;  %v3113_v4 = vsel %vm712_vm7, %v2919_v48, 0.0  ;;  %738 = vst.msk [vmem:[#allocation2] sm:$0x1] %vm737_vm8, %v4115_v25  ;;  %739 = vst.msk [vmem:[#allocation3] sm:$0x1] %vm737_vm8, %v4115_v25  ;;  %v6169_v48 = vld [vmem:[#allocation58_spill] sm:$0xff] }
 0x41c   : > { %v2725_v40 = vadd.f32 %v2724_v44, %v2723_v54  ;;  %v6164_v54 = vld [vmem:[#allocation48_spill] sm:$0xff]  ;;  %v2920_v44 = vmul.f32 %v5518_v15, %v5518_v15  ;;  %v6166_v15 = vld [vmem:[#allocation37_spill] sm:$0xff] }
 0x41d   : > { %v3104_v10 = vadd.f32 %v3103_v7, %v3102_v63  ;;  %v2407_v59 = vadd.f32 %v6162_v39, %v6164_v54  ;;  %v2409_v52 = vadd.f32 %v6166_v15, %v6165_v46  ;;  %v2410_v7 = vadd.f32 %v6167_v11, %v6166_v15  ;;  %v6170_v54 = vld [vmem:[#allocation41_spill] sm:$0xff] }
 0x41e   : > { %v2727_v19 = vadd.f32 %v2726_v31, %v2725_v40  ;;  %v2738_v40 = vsel %vm712_vm7, %v5575_v45, 0.0  ;;  %v3115_v63 = vsel %vm712_vm7, %v2920_v44, 0.0  ;;  %v2926_v44 = vmul.f32 %v5564_v16, %v5564_v16 }
 0x41f   : > { %v3106_v62 = vadd.f32 %v3105_v42, %v3104_v10  ;;  %v5596_v35 = vadd.f32 %v5561_v32, %v2407_v59  ;;  %v3117_v42 = vsel %vm712_vm7, %v2921_v49, 0.0  ;;  %v2538_v39 = vadd.f32 %v5585_v0, %v2410_v7 }
 0x420   : > { %v2729_v12 = vadd.f32 %v2728_v57, %v2727_v19  ;;  %v2740_v19 = vsel %vm712_vm7, %v2534_v61, 0.0  ;;  %v6168_v57 = vld [vmem:[#allocation54_spill] sm:$0xff]  ;;  %v2413_v59 = vadd.f32 %v6170_v54, %v6169_v48  ;;  %v3125_v49 = vsel %vm712_vm7, %v2925_v47, 0.0 }
 0x421   : > { %v3108_v18 = vadd.f32 %v3107_v33, %v3106_v62  ;;  %v2923_v62 = vmul.f32 %v5105_v53, %v5105_v53  ;;  %v2744_v33 = vsel %vm712_vm7, %v5111_v27, 0.0  ;;  %v2929_v7 = vmul.f32 %v2534_v61, %v2534_v61  ;;  %v6174_v61 = vld [vmem:[#allocation62_spill] sm:$0xff] }
 0x422   : > { %v2731_v2 = vadd.f32 %v2730_v38, %v2729_v12  ;;  %v2411_v12 = vadd.f32 %v6166_v15, %v6168_v57  ;;  %v5608_v38 = vadd.f32 %v5541_v36, %v2409_v52  ;;  %v2928_v52 = vmul.f32 %v5575_v45, %v5575_v45  ;;  %v6175_v47 = vld [vmem:[#allocation66_spill] sm:$0xff] }
 0x423   : > { %v3110_v14 = vadd.f32 %v3109_v28, %v3108_v18  ;;  %v3121_v18 = vsel %vm712_vm7, %v2923_v62, 0.0  ;;  %v3133_v25 = vsel %vm712_vm7, %v2929_v7, 0.0 }
 0x424   : > { %v2733_v55 = vadd.f32 %v2732_v5, %v2731_v2  ;;  %v2742_v2 = vsel %vm712_vm7, %v5596_v35, 0.0  ;;  %v3119_v5 = vsel %vm712_vm7, %v2922_v41, 0.0  ;;  %v2539_v26 = vadd.f32 %v5561_v32, %v2411_v12 }
 0x425   : > { %v3112_v24 = vadd.f32 %v3111_v3, %v3110_v14  ;;  %v3123_v14 = vsel %vm712_vm7, %v2924_v37, 0.0  ;;  %v2414_v3 = vadd.f32 %v6171_v22, %v6170_v54  ;;  %v3131_v62 = vsel %vm712_vm7, %v2928_v52, 0.0 }
 0x426   : > { %v2735_v29 = vadd.f32 %v2734_v1, %v2733_v55  ;;  %v2746_v55 = vsel %vm712_vm7, %v5608_v38, 0.0 }
 0x427   : > { %v3114_v21 = vadd.f32 %v3113_v4, %v3112_v24  ;;  %v2541_v24 = vadd.f32 %v5541_v36, %v2413_v59  ;;  %v2927_v4 = vmul.f32 %v5108_v17, %v5108_v17  ;;  %v2542_v16 = vadd.f32 %v5585_v0, %v2414_v3 }
 0x428   : > { %v2737_v13 = vadd.f32 %v2736_v23, %v2735_v29  ;;  %v2748_v29 = vsel %vm712_vm7, %v2538_v39, 0.0 }
 0x429   : > { %v3116_v6 = vadd.f32 %v3115_v63, %v3114_v21  ;;  %v2752_v63 = vsel %vm712_vm7, %v5114_v60, 0.0  ;;  %v2754_v17 = vsel %vm712_vm7, %v2541_v24, 0.0  ;;  %v3129_v12 = vsel %vm712_vm7, %v2927_v4, 0.0 }
 0x42a   : > { %v2739_v31 = vadd.f32 %v2738_v40, %v2737_v13  ;;  %v2750_v40 = vsel %vm712_vm7, %v2539_v26, 0.0  ;;  %v2756_v45 = vsel %vm712_vm7, %v2542_v16, 0.0  ;;  %v2934_v4 = vmul.f32 %v2539_v26, %v2539_v26 }
 0x42b   : > { %v3118_v58 = vadd.f32 %v3117_v42, %v3116_v6  ;;  %v6173_v42 = vld [vmem:[#allocation64_spill] sm:$0xff] }
 0x42c   : > { %v2741_v10 = vadd.f32 %v2740_v19, %v2739_v31  ;;  %v6172_v31 = vld [vmem:[#allocation60_spill] sm:$0xff]  ;;  %v3127_v19 = vsel %vm712_vm7, %v2926_v44, 0.0 }
 0x42d   : > { %v3120_v53 = vadd.f32 %v3119_v5, %v3118_v58  ;;  %v2415_v21 = vadd.f32 %v6170_v54, %v6172_v31  ;;  %v2418_v58 = vadd.f32 %v6174_v61, %v4742_v8  ;;  %v2760_v54 = vsel %vm712_vm7, %v5117_v43, 0.0  ;;  %v6178_v31 = vld [vmem:[#allocation68_spill] sm:$0xff] }
 0x42e   : > { %v2743_v30 = vadd.f32 %v2742_v2, %v2741_v10  ;;  %v2417_v2 = vadd.f32 %v4742_v8, %v6173_v42 }
 0x42f   : > { %v3122_v1 = vadd.f32 %v3121_v18, %v3120_v53  ;;  %v2543_v57 = vadd.f32 %v5561_v32, %v2415_v21  ;;  %v2931_v53 = vmul.f32 %v5111_v27, %v5111_v27 }
 0x430   : > { %v2745_v51 = vadd.f32 %v2744_v33, %v2743_v30  ;;  %v2930_v30 = vmul.f32 %v5596_v35, %v5596_v35  ;;  %v2545_v33 = vadd.f32 %v5541_v36, %v2417_v2  ;;  %v2546_v35 = vadd.f32 %v5585_v0, %v2418_v58 }
 0x431   : > { %v3124_v13 = vadd.f32 %v3123_v14, %v3122_v1  ;;  %v2932_v1 = vmul.f32 %v5608_v38, %v5608_v38  ;;  %v2933_v14 = vmul.f32 %v2538_v39, %v2538_v39 }
 0x432   : > { %v2747_v28 = vadd.f32 %v2746_v55, %v2745_v51  ;;  %v2758_v51 = vsel %vm712_vm7, %v2543_v57, 0.0  ;;  %v2419_v55 = vadd.f32 %v4742_v8, %v6175_v47  ;;  %v3135_v48 = vsel %vm712_vm7, %v2930_v30, 0.0  ;;  %v6182_v47 = vld [vmem:[#allocation74_spill] sm:$0xff] }
 0x433   : > { %v3126_v15 = vadd.f32 %v3125_v49, %v3124_v13  ;;  %v2762_v27 = vsel %vm712_vm7, %v2545_v33, 0.0  ;;  %v3137_v8 = vsel %vm712_vm7, %v2931_v53, 0.0  ;;  %v6177_v13 = vld [vmem:[#allocation45_spill] sm:$0xff]  ;;  %v2764_v38 = vsel %vm712_vm7, %v2546_v35, 0.0 }
 0x434   : > { %v2749_v23 = vadd.f32 %v2748_v29, %v2747_v28  ;;  %v2547_v44 = vadd.f32 %v5561_v32, %v2419_v55  ;;  %v2422_v21 = vadd.f32 %v6178_v31, %v6177_v13  ;;  %v3141_v52 = vsel %vm712_vm7, %v2933_v14, 0.0 }
 0x435   : > { %v3128_v11 = vadd.f32 %v3127_v19, %v3126_v15  ;;  %v2938_v53 = vmul.f32 %v2543_v57, %v2543_v57 }
 0x436   : > { %v2751_v46 = vadd.f32 %v2750_v40, %v2749_v23  ;;  %v6176_v23 = vld [vmem:[#allocation70_spill] sm:$0xff]  ;;  %v3139_v40 = vsel %vm712_vm7, %v2932_v1, 0.0  ;;  %v2766_v19 = vsel %vm712_vm7, %v2547_v44, 0.0  ;;  %v2550_v26 = vadd.f32 %v5585_v0, %v2422_v21 }
 0x437   : > { %v3130_v6 = vadd.f32 %v3129_v12, %v3128_v11  ;;  %v2421_v49 = vadd.f32 %v6177_v13, %v6176_v23  ;;  %v2936_v12 = vmul.f32 %v2541_v24, %v2541_v24 }
 0x438   : > { %v2753_v41 = vadd.f32 %v2752_v63, %v2751_v46  ;;  %v2935_v63 = vmul.f32 %v5114_v60, %v5114_v60  ;;  %v2772_v24 = vsel %vm712_vm7, %v2550_v26, 0.0 }
 0x439   : > { %v3132_v5 = vadd.f32 %v3131_v62, %v3130_v6  ;;  %v2549_v15 = vadd.f32 %v5541_v36, %v2421_v49  ;;  %v2768_v6 = vsel %vm712_vm7, %v5120_v34, 0.0 }
 0x43a   : > { %v2755_v10 = vadd.f32 %v2754_v17, %v2753_v41  ;;  %v6179_v41 = vld [vmem:[#allocation72_spill] sm:$0xff]  ;;  %v3145_v30 = vsel %vm712_vm7, %v2935_v63, 0.0  ;;  %v2942_v63 = vmul.f32 %v2547_v44, %v2547_v44 }
 0x43b   : > { %v3134_v28 = vadd.f32 %v3133_v25, %v3132_v5  ;;  %v2423_v11 = vadd.f32 %v6177_v13, %v6179_v41  ;;  %v2770_v62 = vsel %vm712_vm7, %v2549_v15, 0.0  ;;  %v6181_v5 = vld [vmem:[#allocation35_spill] sm:$0xff]  ;;  %v6187_v41 = vld [vmem:[#allocation80_spill] sm:$0xff] }
 0x43c   : > { %v2757_v37 = vadd.f32 %v2756_v45, %v2755_v10  ;;  %v3143_v10 = vsel %vm712_vm7, %v2934_v4, 0.0  ;;  %v2937_v45 = vmul.f32 %v2542_v16, %v2542_v16  ;;  %v2426_v55 = vadd.f32 %v6182_v47, %v6181_v5 }
 0x43d   : > { %v3136_v29 = vadd.f32 %v3135_v48, %v3134_v28  ;;  %v2551_v60 = vadd.f32 %v5561_v32, %v2423_v11 }
 0x43e   : > { %v2759_v18 = vadd.f32 %v2758_v51, %v2757_v37  ;;  %v6180_v37 = vld [vmem:[#allocation76_spill] sm:$0xff]  ;;  %v3147_v51 = vsel %vm712_vm7, %v2936_v12, 0.0  ;;  %v3149_v1 = vsel %vm712_vm7, %v2937_v45, 0.0  ;;  %v2554_v57 = vadd.f32 %v5585_v0, %v2426_v55 }
 0x43f   : > { %v3138_v3 = vadd.f32 %v3137_v8, %v3136_v29  ;;  %v2425_v25 = vadd.f32 %v6181_v5, %v6180_v37  ;;  %v2774_v48 = vsel %vm712_vm7, %v2551_v60, 0.0  ;;  %v2940_v8 = vmul.f32 %v2545_v33, %v2545_v33 }
 0x440   : > { %v2761_v59 = vadd.f32 %v2760_v54, %v2759_v18  ;;  %v2939_v54 = vmul.f32 %v5117_v43, %v5117_v43  ;;  %v2780_v33 = vsel %vm712_vm7, %v2554_v57, 0.0 }
 0x441   : > { %v3140_v46 = vadd.f32 %v3139_v40, %v3138_v3  ;;  %v2553_v28 = vadd.f32 %v5541_v36, %v2425_v25  ;;  %v6184_v3 = vld [vmem:[#allocation83_spill] sm:$0xff] }
 0x442   : > { %v2763_v22 = vadd.f32 %v2762_v27, %v2761_v59  ;;  %v6183_v59 = vld [vmem:[#allocation78_spill] sm:$0xff]  ;;  %v2776_v23 = vsel %vm712_vm7, %v6184_v3, 0.0  ;;  %v3153_v4 = vsel %vm712_vm7, %v2939_v54, 0.0  ;;  %v2946_v54 = vmul.f32 %v2551_v60, %v2551_v60 }
 0x443   : > { %v3142_v17 = vadd.f32 %v3141_v52, %v3140_v46  ;;  %v2427_v29 = vadd.f32 %v6181_v5, %v6183_v59  ;;  %v2778_v40 = vsel %vm712_vm7, %v2553_v28, 0.0  ;;  %v6186_v46 = vld [vmem:[#allocation38_spill] sm:$0xff]  ;;  %v6192_v59 = vld [vmem:[#allocation87_spill] sm:$0xff] }
 0x444   : > { %v2765_v39 = vadd.f32 %v2764_v38, %v2763_v22  ;;  %v3151_v22 = vsel %vm712_vm7, %v2938_v53, 0.0  ;;  %v2941_v38 = vmul.f32 %v2546_v35, %v2546_v35  ;;  %v2430_v11 = vadd.f32 %v6187_v41, %v6186_v46 }
 0x445   : > { %v3144_v2 = vadd.f32 %v3143_v10, %v3142_v17  ;;  %v2555_v43 = vadd.f32 %v5561_v32, %v2427_v29 }
 0x446   : > { %v2767_v7 = vadd.f32 %v2766_v19, %v2765_v39  ;;  %v6185_v39 = vld [vmem:[#allocation82_spill] sm:$0xff]  ;;  %v3155_v19 = vsel %vm712_vm7, %v2940_v8, 0.0  ;;  %v3157_v12 = vsel %vm712_vm7, %v2941_v38, 0.0  ;;  %v2558_v44 = vadd.f32 %v5585_v0, %v2430_v11 }
 0x447   : > { %v3146_v58 = vadd.f32 %v3145_v30, %v3144_v2  ;;  %v2429_v52 = vadd.f32 %v6186_v46, %v6185_v39  ;;  %v2782_v10 = vsel %vm712_vm7, %v2555_v43, 0.0  ;;  %v2944_v30 = vmul.f32 %v2549_v15, %v2549_v15 }
 0x448   : > { %v2769_v42 = vadd.f32 %v2768_v6, %v2767_v7  ;;  %v2943_v6 = vmul.f32 %v5120_v34, %v5120_v34  ;;  %v2788_v15 = vsel %vm712_vm7, %v2558_v44, 0.0 }
 0x449   : > { %v3148_v18 = vadd.f32 %v3147_v51, %v3146_v58  ;;  %v2557_v17 = vadd.f32 %v5541_v36, %v2429_v52  ;;  %v6189_v58 = vld [vmem:[#allocation97_spill] sm:$0xff] }
 0x44a   : > { %v2771_v61 = vadd.f32 %v2770_v62, %v2769_v42  ;;  %v6188_v42 = vld [vmem:[#allocation85_spill] sm:$0xff]  ;;  %v2784_v37 = vsel %vm712_vm7, %v6189_v58, 0.0  ;;  %v3161_v53 = vsel %vm712_vm7, %v2943_v6, 0.0  ;;  %v2950_v6 = vmul.f32 %v2555_v43, %v2555_v43 }
 0x44b   : > { %v3150_v27 = vadd.f32 %v3149_v1, %v3148_v18  ;;  %v2431_v2 = vadd.f32 %v6186_v46, %v6188_v42  ;;  %v2786_v51 = vsel %vm712_vm7, %v2557_v17, 0.0  ;;  %v6191_v18 = vld [vmem:[#allocation39_spill] sm:$0xff]  ;;  %v6197_v42 = vld [vmem:[#allocation94_spill] sm:$0xff] }
 0x44c   : > { %v2773_v16 = vadd.f32 %v2772_v24, %v2771_v61  ;;  %v3159_v61 = vsel %vm712_vm7, %v2942_v63, 0.0  ;;  %v2945_v24 = vmul.f32 %v2550_v26, %v2550_v26  ;;  %v2434_v29 = vadd.f32 %v6192_v59, %v6191_v18 }
 0x44d   : > { %v3152_v49 = vadd.f32 %v3151_v22, %v3150_v27  ;;  %v2559_v34 = vadd.f32 %v5561_v32, %v2431_v2 }
 0x44e   : > { %v2775_v14 = vadd.f32 %v2774_v48, %v2773_v16  ;;  %v6190_v16 = vld [vmem:[#allocation89_spill] sm:$0xff]  ;;  %v3163_v48 = vsel %vm712_vm7, %v2944_v30, 0.0  ;;  %v3165_v8 = vsel %vm712_vm7, %v2945_v24, 0.0  ;;  %v2562_v60 = vadd.f32 %v5585_v0, %v2434_v29 }
 0x44f   : > { %v3154_v21 = vadd.f32 %v3153_v4, %v3152_v49  ;;  %v2433_v1 = vadd.f32 %v6191_v18, %v6190_v16  ;;  %v2790_v22 = vsel %vm712_vm7, %v2559_v34, 0.0  ;;  %v2948_v4 = vmul.f32 %v2553_v28, %v2553_v28 }
 0x450   : > { %v2777_v13 = vadd.f32 %v2776_v23, %v2775_v14  ;;  %v2947_v23 = vmul.f32 %v6184_v3, %v6184_v3  ;;  %v2796_v28 = vsel %vm712_vm7, %v2562_v60, 0.0 }
 0x451   : > { %v3156_v7 = vadd.f32 %v3155_v19, %v3154_v21  ;;  %v2561_v27 = vadd.f32 %v5541_v36, %v2433_v1  ;;  %v6194_v21 = vld [vmem:[#allocation104_spill] sm:$0xff] }
 0x452   : > { %v2779_v31 = vadd.f32 %v2778_v40, %v2777_v13  ;;  %v6193_v13 = vld [vmem:[#allocation92_spill] sm:$0xff]  ;;  %v2792_v39 = vsel %vm712_vm7, %v6194_v21, 0.0  ;;  %v3169_v63 = vsel %vm712_vm7, %v2947_v23, 0.0  ;;  %v2954_v23 = vmul.f32 %v2559_v34, %v2559_v34 }
 0x453   : > { %v3158_v62 = vadd.f32 %v3157_v12, %v3156_v7  ;;  %v2435_v49 = vadd.f32 %v6191_v18, %v6193_v13  ;;  %v2794_v19 = vsel %vm712_vm7, %v2561_v27, 0.0  ;;  %v6196_v7 = vld [vmem:[#allocation42_spill] sm:$0xff]  ;;  %v6202_v13 = vld [vmem:[#allocation101_spill] sm:$0xff] }
 0x454   : > { %v2781_v35 = vadd.f32 %v2780_v33, %v2779_v31  ;;  %v3167_v31 = vsel %vm712_vm7, %v2946_v54, 0.0  ;;  %v2949_v33 = vmul.f32 %v2554_v57, %v2554_v57  ;;  %v2438_v2 = vadd.f32 %v6197_v42, %v6196_v7 }
 0x455   : > { %v3160_v25 = vadd.f32 %v3159_v61, %v3158_v62  ;;  %v2563_v3 = vadd.f32 %v5561_v32, %v2435_v49 }
 0x456   : > { %v2783_v45 = vadd.f32 %v2782_v10, %v2781_v35  ;;  %v6195_v35 = vld [vmem:[#allocation96_spill] sm:$0xff]  ;;  %v3171_v10 = vsel %vm712_vm7, %v2948_v4, 0.0  ;;  %v3173_v30 = vsel %vm712_vm7, %v2949_v33, 0.0  ;;  %v2566_v43 = vadd.f32 %v5585_v0, %v2438_v2 }
 0x457   : > { %v3162_v55 = vadd.f32 %v3161_v53, %v3160_v25  ;;  %v2437_v12 = vadd.f32 %v6196_v7, %v6195_v35  ;;  %v2798_v61 = vsel %vm712_vm7, %v2563_v3, 0.0  ;;  %v2952_v53 = vmul.f32 %v2557_v17, %v2557_v17 }
 0x458   : > { %v2785_v5 = vadd.f32 %v2784_v37, %v2783_v45  ;;  %v2951_v37 = vmul.f32 %v6189_v58, %v6189_v58  ;;  %v2804_v17 = vsel %vm712_vm7, %v2566_v43, 0.0 }
 0x459   : > { %v3164_v14 = vadd.f32 %v3163_v48, %v3162_v55  ;;  %v2565_v62 = vadd.f32 %v5541_v36, %v2437_v12  ;;  %v6199_v55 = vld [vmem:[#allocation111_spill] sm:$0xff] }
 0x45a   : > { %v2787_v47 = vadd.f32 %v2786_v51, %v2785_v5  ;;  %v6198_v5 = vld [vmem:[#allocation99_spill] sm:$0xff]  ;;  %v2800_v16 = vsel %vm712_vm7, %v6199_v55, 0.0  ;;  %v3177_v54 = vsel %vm712_vm7, %v2951_v37, 0.0  ;;  %v2958_v37 = vmul.f32 %v2563_v3, %v2563_v3 }
 0x45b   : > { %v3166_v40 = vadd.f32 %v3165_v8, %v3164_v14  ;;  %v2439_v25 = vadd.f32 %v6196_v7, %v6198_v5  ;;  %v2802_v48 = vsel %vm712_vm7, %v2565_v62, 0.0  ;;  %v6201_v14 = vld [vmem:[#allocation40_spill] sm:$0xff] }
 0x45c   : > { %v2789_v26 = vadd.f32 %v2788_v15, %v2787_v47  ;;  %v3175_v47 = vsel %vm712_vm7, %v2950_v6, 0.0  ;;  %v2953_v15 = vmul.f32 %v2558_v44, %v2558_v44  ;;  %v2442_v49 = vadd.f32 %v6202_v13, %v6201_v14  ;;  %v6207_v5 = vld [vmem:[#allocation108_spill] sm:$0xff] }
 0x45d   : > { %v3168_v52 = vadd.f32 %v3167_v31, %v3166_v40  ;;  %v2567_v58 = vadd.f32 %v5561_v32, %v2439_v25 }
 0x45e   : > { %v2791_v38 = vadd.f32 %v2790_v22, %v2789_v26  ;;  %v6200_v26 = vld [vmem:[#allocation103_spill] sm:$0xff]  ;;  %v3179_v22 = vsel %vm712_vm7, %v2952_v53, 0.0  ;;  %v3181_v4 = vsel %vm712_vm7, %v2953_v15, 0.0  ;;  %v2570_v34 = vadd.f32 %v5585_v0, %v2442_v49 }
 0x45f   : > { %v3170_v11 = vadd.f32 %v3169_v63, %v3168_v52  ;;  %v2441_v8 = vadd.f32 %v6201_v14, %v6200_v26  ;;  %v2806_v31 = vsel %vm712_vm7, %v2567_v58, 0.0  ;;  %v2956_v63 = vmul.f32 %v2561_v27, %v2561_v27  ;;  %v6206_v27 = vld [vmem:[#allocation44_spill] sm:$0xff] }
 0x460   : > { %v2793_v46 = vadd.f32 %v2792_v39, %v2791_v38  ;;  %v2955_v39 = vmul.f32 %v6194_v21, %v6194_v21  ;;  %v2446_v25 = vadd.f32 %v6207_v5, %v6206_v27 }
 0x461   : > { %v3172_v45 = vadd.f32 %v3171_v10, %v3170_v11  ;;  %v2569_v40 = vadd.f32 %v5541_v36, %v2441_v8  ;;  %v6204_v11 = vld [vmem:[#allocation112_spill] sm:$0xff] }
 0x462   : > { %v2795_v41 = vadd.f32 %v2794_v19, %v2793_v46  ;;  %v6203_v46 = vld [vmem:[#allocation106_spill] sm:$0xff]  ;;  %v2808_v35 = vsel %vm712_vm7, %v6204_v11, 0.0  ;;  %v3185_v6 = vsel %vm712_vm7, %v2955_v39, 0.0  ;;  %v2574_v3 = vadd.f32 %v5585_v0, %v2446_v25  ;;  %v1960_v25 = vpop.f32.mrf.mxu1 }
 0x463   : > { %v3174_v51 = vadd.f32 %v3173_v30, %v3172_v45  ;;  %v2443_v52 = vadd.f32 %v6201_v14, %v6203_v46  ;;  %v2810_v10 = vsel %vm712_vm7, %v2569_v40, 0.0  ;;  %v6205_v45 = vld [vmem:[#allocation110_spill] sm:$0xff]  ;;  %v2961_v14 = vmul.f32 %v2566_v43, %v2566_v43  ;;  %v6211_v43 = vld [vmem:[#allocation7_spill] sm:$0xff] }
 0x464   : > { %v2797_v57 = vadd.f32 %v2796_v28, %v2795_v41  ;;  %v3183_v41 = vsel %vm712_vm7, %v2954_v23, 0.0  ;;  %v2957_v28 = vmul.f32 %v2562_v60, %v2562_v60  ;;  %v2445_v30 = vadd.f32 %v6206_v27, %v6205_v45  ;;  %v6210_v23 = vld [vmem:[#allocation11_spill] sm:$0xff] }
 0x465   : > { %v3176_v1 = vadd.f32 %v3175_v47, %v3174_v51  ;;  %v2571_v21 = vadd.f32 %v5561_v32, %v2443_v52  ;;  %v2449_v13 = vadd.f32 %v6115_v50, %v6210_v23  ;;  %v2450_v39 = vadd.f32 %v6211_v43, %v6115_v50 }
 0x466   : > { %v2799_v24 = vadd.f32 %v2798_v61, %v2797_v57  ;;  %v2812_v57 = vsel %vm712_vm7, %v2570_v34, 0.0  ;;  %v3187_v61 = vsel %vm712_vm7, %v2956_v63, 0.0  ;;  %v3189_v51 = vsel %vm712_vm7, %v2957_v28, 0.0 }
 0x467   : > { %v3178_v29 = vadd.f32 %v3177_v54, %v3176_v1  ;;  %v2573_v53 = vadd.f32 %v5541_v36, %v2445_v30  ;;  %v2814_v47 = vsel %vm712_vm7, %v2571_v21, 0.0  ;;  %v2960_v54 = vmul.f32 %v2565_v62, %v2565_v62 }
 0x468   : > { %v2801_v18 = vadd.f32 %v2800_v16, %v2799_v24  ;;  %v2959_v16 = vmul.f32 %v6199_v55, %v6199_v55  ;;  %v2820_v62 = vsel %vm712_vm7, %v2574_v3, 0.0  ;;  %v3197_v46 = vsel %vm712_vm7, %v2961_v14, 0.0 }
 0x469   : > { %v3180_v38 = vadd.f32 %v3179_v22, %v3178_v29  ;;  %v6209_v29 = vld [vmem:[#allocation113_spill] sm:$0xff]  ;;  %v2818_v22 = vsel %vm712_vm7, %v2573_v53, 0.0  ;;  %v2577_v63 = vadd.f32 %v5541_v36, %v2449_v13  ;;  %v2968_v14 = vmul.f32 %v2573_v53, %v2573_v53 }
 0x46a   : > { %v2803_v59 = vadd.f32 %v2802_v48, %v2801_v18  ;;  %v6208_v18 = vld [vmem:[#allocation90_spill] sm:$0xff]  ;;  %v2816_v26 = vsel %vm712_vm7, %v6209_v29, 0.0  ;;  %v3193_v49 = vsel %vm712_vm7, %v2959_v16, 0.0 }
 0x46b   : > { %v3182_v19 = vadd.f32 %v3181_v4, %v3180_v38  ;;  %v2447_v1 = vadd.f32 %v6206_v27, %v6208_v18  ;;  %v3195_v4 = vsel %vm712_vm7, %v2960_v54, 0.0  ;;  %v2826_v30 = vsel %vm712_vm7, %v2577_v63, 0.0 }
 0x46c   : > { %v2805_v44 = vadd.f32 %v2804_v17, %v2803_v59  ;;  %v3191_v59 = vsel %vm712_vm7, %v2958_v37, 0.0  ;;  %v3211_v53 = vsel %vm712_vm7, %v2968_v14, 0.0 }
 0x46d   : > { %v3184_v12 = vadd.f32 %v3183_v41, %v3182_v19  ;;  %v2575_v55 = vadd.f32 %v5561_v32, %v2447_v1  ;;  %v2963_v41 = vmul.f32 %v6204_v11, %v6204_v11 }
 0x46e   : > { %v2807_v33 = vadd.f32 %v2806_v31, %v2805_v44  ;;  %v2962_v31 = vmul.f32 %v2567_v58, %v2567_v58  ;;  %v2964_v58 = vmul.f32 %v2569_v40, %v2569_v40 }
 0x46f   : > { %v3186_v2 = vadd.f32 %v3185_v6, %v3184_v12  ;;  %v2822_v19 = vsel %vm712_vm7, %v2575_v55, 0.0  ;;  %v3201_v11 = vsel %vm712_vm7, %v2963_v41, 0.0 }
 0x470   : > { %v2809_v7 = vadd.f32 %v2808_v35, %v2807_v33  ;;  %v6212_v35 = vld [vmem:[#allocation8_spill] sm:$0xff]  ;;  %v3199_v6 = vsel %vm712_vm7, %v2962_v31, 0.0 }
 0x471   : > { %v3188_v24 = vadd.f32 %v3187_v61, %v3186_v2 }
 0x472   : > { %v2811_v42 = vadd.f32 %v2810_v10, %v2809_v7  ;;  %v2451_v7 = vadd.f32 %v6115_v50, %v6212_v35  ;;  %v2578_v10 = vadd.f32 %v5585_v0, %v2450_v39  ;;  %v6214_v50 = vld [vmem:[#allocation21_spill] sm:$0xff] }
 0x473   : > { %v3190_v48 = vadd.f32 %v3189_v51, %v3188_v24  ;;  %v2453_v37 = vadd.f32 %v6116_v9, %v6214_v50  ;;  %v2966_v24 = vmul.f32 %v2571_v21, %v2571_v21 }
 0x474   : > { %v2813_v60 = vadd.f32 %v2812_v57, %v2811_v42  ;;  %v6213_v42 = vld [vmem:[#allocation114_spill] sm:$0xff]  ;;  %v2965_v57 = vmul.f32 %v2570_v34, %v2570_v34  ;;  %v2579_v61 = vadd.f32 %v5561_v32, %v2451_v7  ;;  %v2828_v51 = vsel %vm712_vm7, %v2578_v10, 0.0  ;;  %v6215_v34 = vld [vmem:[#allocation16_spill] sm:$0xff] }
 0x475   : > { %v3192_v17 = vadd.f32 %v3191_v59, %v3190_v48  ;;  %v2824_v2 = vsel %vm712_vm7, %v6213_v42, 0.0  ;;  %v2581_v54 = vadd.f32 %v5541_v36, %v2453_v37  ;;  %v2455_v59 = vadd.f32 %v6116_v9, %v1960_v25 }
 0x476   : > { %v2815_v15 = vadd.f32 %v2814_v47, %v2813_v60  ;;  %v3203_v60 = vsel %vm712_vm7, %v2964_v58, 0.0  ;;  %v2454_v47 = vadd.f32 %v6215_v34, %v6116_v9  ;;  %v3205_v16 = vsel %vm712_vm7, %v2965_v57, 0.0 }
 0x477   : > { %v3194_v38 = vadd.f32 %v3193_v49, %v3192_v17  ;;  %v2830_v48 = vsel %vm712_vm7, %v2579_v61, 0.0  ;;  %v2832_v17 = vsel %vm712_vm7, %v5260_v56, 0.0  ;;  %v2969_v49 = vmul.f32 %v2574_v3, %v2574_v3 }
 0x478   : > { %v2817_v8 = vadd.f32 %v2816_v26, %v2815_v15  ;;  %v2967_v15 = vmul.f32 %v6209_v29, %v6209_v29  ;;  %v2583_v36 = vadd.f32 %v5561_v32, %v2455_v59  ;;  %v2971_v3 = vmul.f32 %v6213_v42, %v6213_v42 }
 0x479   : > { %v3196_v33 = vadd.f32 %v3195_v4, %v3194_v38  ;;  %v2973_v35 = vmul.f32 %v2578_v10, %v2578_v10 }
 0x47a   : > { %v2819_v44 = vadd.f32 %v2818_v22, %v2817_v8  ;;  %v3207_v8 = vsel %vm712_vm7, %v2966_v24, 0.0  ;;  %v2582_v22 = vadd.f32 %v5585_v0, %v2454_v47  ;;  %v3209_v29 = vsel %vm712_vm7, %v2967_v15, 0.0  ;;  %v2585_v24 = vld [vmem:[#allocation2] sm:$0x1] }
 0x47b   : > { %v3198_v28 = vadd.f32 %v3197_v46, %v3196_v33  ;;  %v3213_v0 = vsel %vm712_vm7, %v2969_v49, 0.0  ;;  %v2838_v39 = vsel %vm712_vm7, %v2583_v36, 0.0  ;;  %v2972_v33 = vmul.f32 %v2577_v63, %v2577_v63 }
 0x47c   : > { %v2821_v52 = vadd.f32 %v2820_v62, %v2819_v44  ;;  %v2834_v44 = vsel %vm712_vm7, %v2581_v54, 0.0  ;;  %v2970_v62 = vmul.f32 %v2575_v55, %v2575_v55  ;;  %v2836_v4 = vsel %vm712_vm7, %v2582_v22, 0.0 }
 0x47d   : > { %v3200_v27 = vadd.f32 %v3199_v6, %v3198_v28  ;;  %v3217_v7 = vsel %vm712_vm7, %v2971_v3, 0.0  ;;  %v3219_v58 = vsel %vm712_vm7, %v2972_v33, 0.0  ;;  %v2974_v6 = vmul.f32 %v2579_v61, %v2579_v61 }
 0x47e   : > { %v2823_v12 = vadd.f32 %v2822_v19, %v2821_v52  ;;  %v3215_v32 = vsel %vm712_vm7, %v2970_v62, 0.0  ;;  %v2840_v19 = vsel %vm712_vm7, %v5265_v20, 0.0  ;;  %v3221_v57 = vsel %vm712_vm7, %v2973_v35, 0.0 }
 0x47f   : > { %v3202_v5 = vadd.f32 %v3201_v11, %v3200_v27  ;;  %v2975_v63 = vmul.f32 %v5260_v56, %v5260_v56  ;;  %v2976_v11 = vmul.f32 %v2581_v54, %v2581_v54  ;;  %v2979_v47 = vmul.f32 %v5265_v20, %v5265_v20 }
 0x480   : > { %v2825_v45 = vadd.f32 %v2824_v2, %v2823_v12 }
 0x481   : > { %v3204_v18 = vadd.f32 %v3203_v60, %v3202_v5  ;;  %v3225_v37 = vsel %vm712_vm7, %v2975_v63, 0.0  ;;  %v3227_v25 = vsel %vm712_vm7, %v2976_v11, 0.0  ;;  %v2978_v60 = vmul.f32 %v2583_v36, %v2583_v36 }
 0x482   : > { %v2827_v40 = vadd.f32 %v2826_v30, %v2825_v45  ;;  %v3223_v30 = vsel %vm712_vm7, %v2974_v6, 0.0 }
 0x483   : > { %v3206_v26 = vadd.f32 %v3205_v16, %v3204_v18 }
 0x484   : > { %v2829_v1 = vadd.f32 %v2828_v51, %v2827_v40  ;;  %v2977_v40 = vmul.f32 %v2582_v22, %v2582_v22  ;;  %v2851_v22 = vld [vmem:[#allocation3] sm:$0x1] }
 0x485   : > { %v3208_v23 = vadd.f32 %v3207_v8, %v3206_v26 }
 0x486   : > { %v2831_v21 = vadd.f32 %v2830_v48, %v2829_v1  ;;  %v3229_v56 = vsel %vm712_vm7, %v2977_v40, 0.0  ;;  %v3231_v1 = vsel %vm712_vm7, %v2978_v60, 0.0  ;;  %v3233_v48 = vsel %vm712_vm7, %v2979_v47, 0.0 }
 0x487   : > { %v3210_v9 = vadd.f32 %v3209_v29, %v3208_v23 }
 0x488   : > { %v2833_v13 = vadd.f32 %v2832_v17, %v2831_v21 }
 0x489   : > { %v3212_v31 = vadd.f32 %v3211_v53, %v3210_v9 }
 0x48a   : > { %v2835_v38 = vadd.f32 %v2834_v44, %v2833_v13 }
 0x48b   : > { %v3214_v46 = vadd.f32 %v3213_v0, %v3212_v31 }
 0x48c   : > { %v2837_v43 = vadd.f32 %v2836_v4, %v2835_v38 }
 0x48d   : > { %v3216_v55 = vadd.f32 %v3215_v32, %v3214_v46 }
 0x48e   : > { %v2839_v52 = vadd.f32 %v2838_v39, %v2837_v43 }
 0x48f   : > { %v3218_v12 = vadd.f32 %v3217_v7, %v3216_v55 }
 0x490   : > { %v2841_v41 = vadd.f32 %v2840_v19, %v2839_v52 }
 0x491   : > { %v3220_v42 = vadd.f32 %v3219_v58, %v3218_v12 }
 0x492   : > { %v2842_v28 = vrot.slane %v2841_v41, 4 }
 0x493   : > { %v3222_v45 = vadd.f32 %v3221_v57, %v3220_v42 }
 0x494   : > { %v2843_v2 = vadd.f32 %v2842_v28, %v2841_v41 }
 0x495   : > { %v3224_v10 = vadd.f32 %v3223_v30, %v3222_v45 }
 0x496   : > { %v2844_v27 = vrot.slane %v2843_v2, 2 }
 0x497   : > { %v3226_v5 = vadd.f32 %v3225_v37, %v3224_v10 }
 0x498   : > { %v2845_v50 = vadd.f32 %v2844_v27, %v2843_v2 }
 0x499   : > { %v3228_v51 = vadd.f32 %v3227_v25, %v3226_v5 }
 0x49a   : > { %v2846_v61 = vrot.slane %v2845_v50, 1 }
 0x49b   : > { %v3230_v16 = vadd.f32 %v3229_v56, %v3228_v51 }
 0x49c   : > { %v2847_v34 = vadd.f32 %v2846_v61, %v2845_v50 }
 0x49d   : > { %v3232_v15 = vadd.f32 %v3231_v1, %v3230_v16 }
 0x49e   : > { %v2848_v18 = vadd.f32 %v2847_v34, %v2585_v24 }
 0x49f   : > { %v3234_v54 = vadd.f32 %v3233_v48, %v3232_v15 }
 0x4a0   : > { %2850 = vst.msk [vmem:[#allocation2] sm:$0x1] %vm737_vm8, %v2848_v18 }
 0x4a1   : > { %v3235_v59 = vrot.slane %v3234_v54, 4 }
 0x4a3   : > { %v3236_v26 = vadd.f32 %v3235_v59, %v3234_v54 }
 0x4a5   : > { %v3237_v14 = vrot.slane %v3236_v26, 2 }
 0x4a7   : > { %v3246_v21 = vld [vmem:[#allocation2] sm:$0x1]  ;;  %v3238_v17 = vadd.f32 %v3237_v14, %v3236_v26 }
 0x4a8   : > { %v3247_v8 = vmul.f32 0.0009765625, %v3246_v21 }
 0x4a9   : > { %v3239_v20 = vrot.slane %v3238_v17, 1 }
 0x4aa   : > { %3254 = vst.msk [vmem:[%s380_s15] sm:$0x1] %vm737_vm8, %v3247_v8  ;;  %v3250_v49 = vmul.f32 %v3247_v8, %v3247_v8 }
 0x4ab   : > { %v3240_v23 = vadd.f32 %v3239_v20, %v3238_v17 }
 0x4ad   : > { %v3241_v13 = vadd.f32 %v3240_v23, %v2851_v22 }
 0x4af   : > { %3242 = vst.msk [vmem:[#allocation3] sm:$0x1] %vm737_vm8, %v3241_v13 }
 0x4b6   : > { %v3248_v29 = vld [vmem:[#allocation3] sm:$0x1] }
 0x4b7   : > { %v3249_v44 = vmul.f32 0.0009765625, %v3248_v29 }
 0x4b9   : > { %v3251_v36 = vsub.f32 %v3249_v44, %v3250_v49 }
 0x4bb   : > { %v3252_v9 = vadd.f32 1e-05, %v3251_v36 }
 0x4bd   : > { %4030 = vrsqrt.f32 %v3252_v9 }
 0x4ca   : > { %v4031_v38 = vpop.eup %4030 }
 0x4cb   : > { %3255 = vst.msk [vmem:[%s380_s15 + $0x1] sm:$0x1] %vm737_vm8, %v4031_v38 }
 0x4cc   : > { %4048 = shalt.err (!%p4045_p5)
}
 0x4cd   : > { %s4049_s15 = scalar_lea.hbm %s5886_s23, 32  ;;  %s4053_s18 = scalar_lea.hbm %s5936_s9, 64 }
 0x4ce   : > { %p4050_p6 = scmp.ne.s32.totalorder %s5886_s23, %s4049_s15  ;;  %p4054_p10 = scmp.lt.s32.totalorder %s5886_s23, %s5936_s9 }
 0x4cf   : > { %p4055_p11 = scmp.lt.s32.totalorder %s4053_s18, %s4049_s15 }
 0x4d0   : > { %p4051_p7 = pnand %p4050_p6, %p4207_p4 }
 0x4d1   : > { %p4056_p12 = por %p4055_p11, %p4054_p10 }
 0x4d2   : > { %p4052_p9 = pneg %p4051_p7 }
 0x4d4   : > { %p4057_p13 = pnand %p4056_p12, %p4052_p9 }
 0x4d6   : > { %4060 = shalt.err (!%p4057_p13)
}
 0x4d7   : > { %3952 = dma.vmem_to_hbm [thread:$0]  (%p4207_p4), %s3287_s28, 32, %s5886_s23, %s3267_s24  }
 0x4d8 PF: > { %p3958_p0 = scmp.ge.s32.totalorder %s4111_s14, 2  ;;  %s3314_s25 = sand.u32 1, %s4091_s30  }
 0x4d9   : > { %s3315_s27 = scalar_lea.sflag [#allocation5], %s3314_s25 }
 0x4da   : > { %p3955_p1 = pnand %p3958_p0, %p4214_p8 }
 0x4dc   : > { %p3956_p2 = pneg %p3955_p1 }
 0x4de   : > { %4086 = dma.done.wait (%p3956_p2), %s3315_s27, 32  }
 0x4df   : > { %4088 = vsyncadd (%p3956_p2), %s3315_s27, 4294967264  ;;  %s23_s14 = sadd.s32 1, %s4111_s14   ;;  %s6216_s30 = smov %s4095_s10 }
 0x4e0   : > { %p20_p3 = scmp.ge.s32.totalorder %s23_s14, 4   ;;  %s6217_s10 = smov %s4099_s11 }
 0x4e1   : > { %s6218_s11 = smov %s4220_s22  ;;  %s6219_s12 = smov %s4107_s13 }
 0x4e2   : > { %s6220_s13 = smov %s6222_s17  ;;  %22 = sbr.rel (!%p20_p3) target bundleno = 4 (0x4), region = 119 }
 0x4e7   :  { %3320 = vsyncpa [#allocation5], 1 }
 0x4e8   :  { %3322 = vsyncpa [#allocation5 + $0x1], 1 }

</bundles_post_ra>
